<compile_context>
chip_gen: v7x
topology: tpu7x:2x2x1
jax: 0.10.0
libtpu: 0.0.40
codegen_flags: <defaults>
</compile_context>

<pallas_src>
import functools

import numpy as np
import jax
import jax.numpy as jnp
from jax.experimental import pallas as pl

EPS = 1e-5
# _TAPS[parity] = ((padded_offset, kernel_tap), ...) for ConvTranspose2d(k=4, s=2, p=1)
_TAPS = (((1, 1), (0, 3)), ((1, 2), (2, 0)))


# ----------------------------------------------------------------------------
# Kernel 1: label-embedding multiply + Linear + BatchNorm1d (training stats)
# Weight columns are pre-permuted so the [B, F] output is NHWC-ordered.
# ----------------------------------------------------------------------------
def fc_bn_kernel(z_ref, e_ref, wt_ref, b_ref, g_ref, beta_ref, o_ref):
    x = (z_ref[...] * e_ref[...]).astype(jnp.bfloat16)                  # [B, L]
    h = jnp.dot(x, wt_ref[...], preferred_element_type=jnp.float32)     # [B, F]
    h = h + b_ref[...]
    n = h.shape[0]
    mu = jnp.sum(h, axis=0, keepdims=True) / n                          # one-pass stats
    msq = jnp.sum(h * h, axis=0, keepdims=True) / n
    var = msq - mu * mu
    o_ref[...] = (h - mu) * jax.lax.rsqrt(var + EPS) * g_ref[...] + beta_ref[...]


# ----------------------------------------------------------------------------
# Shared helper: concatenate the 9 shifted HxW windows of the padded NHWC input
# along the channel axis -> [B*H*W, 9*Cin] (bf16 MXU operand).
# ----------------------------------------------------------------------------
def _cat9(xp_ref, H, W):
    B = xp_ref.shape[0]
    Cin = xp_ref.shape[3]
    slices = [xp_ref[:, dy:dy + H, dx:dx + W, :].reshape(B * H * W, Cin)
              for dy in range(3) for dx in range(3)]
    return jnp.concatenate(slices, axis=1).astype(jnp.bfloat16)


# ----------------------------------------------------------------------------
# Kernel 2: ConvTranspose2d(128 -> 64) + BatchNorm2d, single matmul,
# parity-packed lane-dense output [B*H*W, 4*64].
# ----------------------------------------------------------------------------
def deconv_bn_kernel(xp_ref, w_ref, b_ref, g_ref, beta_ref, o_ref):
    B, Hp, Wp, _ = xp_ref.shape
    H, W = Hp - 2, Wp - 2
    Cout = g_ref.shape[1]
    xcat = _cat9(xp_ref, H, W)                                          # [M, 9*Cin]
    y = jnp.dot(xcat, w_ref[...], preferred_element_type=jnp.float32)   # [M, 4*Cout]
    y = y + b_ref[...]
    # BatchNorm2d training stats per channel over (parity, batch, H, W), one pass.
    n = 4.0 * y.shape[0]
    s1 = jnp.sum(y, axis=0, keepdims=True)                              # [1, 4*Cout]
    s2 = jnp.sum(y * y, axis=0, keepdims=True)
    s1c = (s1[:, 0:Cout] + s1[:, Cout:2 * Cout]
           + s1[:, 2 * Cout:3 * Cout] + s1[:, 3 * Cout:4 * Cout])       # [1, Cout]
    s2c = (s2[:, 0:Cout] + s2[:, Cout:2 * Cout]
           + s2[:, 2 * Cout:3 * Cout] + s2[:, 3 * Cout:4 * Cout])
    mean = s1c / n
    var = s2c / n - mean * mean
    scale_c = g_ref[...] * jax.lax.rsqrt(var + EPS)                     # [1, Cout]
    shift_c = beta_ref[...] - mean * scale_c
    scale = jnp.concatenate([scale_c] * 4, axis=1)                      # [1, 4*Cout]
    shift = jnp.concatenate([shift_c] * 4, axis=1)
    o_ref[...] = y * scale + shift


# ----------------------------------------------------------------------------
# Kernel 3: ConvTranspose2d(64 -> img_channels) + tanh, single matmul,
# parity-packed output [B*H*W, 4*C].
# ----------------------------------------------------------------------------
def deconv_tanh_kernel(xp_ref, w_ref, b_ref, o_ref):
    B, Hp, Wp, _ = xp_ref.shape
    H, W = Hp - 2, Wp - 2
    xcat = _cat9(xp_ref, H, W)                                          # [M, 9*Cin]
    y = jnp.dot(xcat, w_ref[...], preferred_element_type=jnp.float32) + b_ref[...]
    o_ref[...] = jnp.tanh(y)


# ----------------------------------------------------------------------------
# One-time weight repacking (outside jit)
# ----------------------------------------------------------------------------
def _pack_deconv_weight(w):
    """w: [Cin, Cout, 4, 4] (PyTorch ConvTranspose2d layout) -> [9*Cin, 4*Cout].
    Row-block (dy*3+dx), col-block p=2*r+s holds w[:, :, ky, kx] iff
    (dy,ky) in _TAPS[r] and (dx,kx) in _TAPS[s]; zero otherwise."""
    w = np.asarray(w, np.float32)
    Cin, Cout = w.shape[0], w.shape[1]
    wp = np.zeros((9 * Cin, 4 * Cout), np.float32)
    for r in range(2):
        for s in range(2):
            p = 2 * r + s
            for dy, ky in _TAPS[r]:
                for dx, kx in _TAPS[s]:
                    blk = dy * 3 + dx
                    wp[blk * Cin:(blk + 1) * Cin, p * Cout:(p + 1) * Cout] = w[:, :, ky, kx]
    return wp


def prepare_params(params, *, img_size, img_channels):
    H4 = img_size // 4
    # permute fc features from (c, y, x) to (y, x, c) so stage-1 output is NHWC directly
    perm = (np.arange(128)[None, :] * (H4 * H4)
            + np.arange(H4 * H4)[:, None]).reshape(-1)
    fc_wt = np.asarray(params['fc_w'], np.float32).T[:, perm]            # [L, F]
    return {
        'emb':  jnp.asarray(params['emb'], jnp.float32),
        'fc_wt': jnp.asarray(fc_wt, jnp.bfloat16),
        'fc_b': jnp.asarray(np.asarray(params['fc_b'], np.float32)[perm])[None, :],
        'bn_g': jnp.asarray(np.asarray(params['bn_g'], np.float32)[perm])[None, :],
        'bn_b': jnp.asarray(np.asarray(params['bn_b'], np.float32)[perm])[None, :],
        'w1p':  jnp.asarray(_pack_deconv_weight(params['w1']), jnp.bfloat16),
        'b1t':  jnp.asarray(np.tile(np.asarray(params['b1'], np.float32), 4))[None, :],
        'g1':   jnp.asarray(params['g1'], jnp.float32)[None, :],
        'be1':  jnp.asarray(params['be1'], jnp.float32)[None, :],
        'w2p':  jnp.asarray(_pack_deconv_weight(params['w2']), jnp.bfloat16),
        'b2t':  jnp.asarray(np.tile(np.asarray(params['b2'], np.float32), 4))[None, :],
    }


# ----------------------------------------------------------------------------
# Host-side forward
# ----------------------------------------------------------------------------
def generator_forward(z, labels, prep, *, img_size, img_channels):
    B, _ = z.shape
    H4 = img_size // 4
    H8 = 2 * H4
    F = 128 * H4 * H4

    emb = jnp.take(prep['emb'], labels, axis=0)                          # embedding gather

    # ---- Stage 1: fc + BatchNorm1d (single step, lane-dense [B, F]) ----
    h = pl.pallas_call(
        fc_bn_kernel,
        out_shape=jax.ShapeDtypeStruct((B, F), jnp.float32),
    )(z, emb, prep['fc_wt'], prep['fc_b'], prep['bn_g'], prep['bn_b'])

    # NHWC feature map (free reshape thanks to the pre-permuted fc weight) + zero pad
    x = h.reshape(B, H4, H4, 128)
    xp = jnp.pad(x, ((0, 0), (1, 1), (1, 1), (0, 0)))

    # ---- Stage 2: deconv1 + BatchNorm2d, parity-packed [M, 256] ----
    y = pl.pallas_call(
        deconv_bn_kernel,
        out_shape=jax.ShapeDtypeStruct((B * H4 * H4, 4 * 64), jnp.float32),
    )(xp, prep['w1p'], prep['b1t'], prep['g1'], prep['be1'])

    # parity re-interleave to [B, H8, H8, 64] + zero pad (tiny XLA glue)
    y1 = (y.reshape(B, H4, H4, 2, 2, 64)
           .transpose(0, 1, 3, 2, 4, 5)
           .reshape(B, H8, H8, 64))
    xp2 = jnp.pad(y1, ((0, 0), (1, 1), (1, 1), (0, 0)))

    # ---- Stage 3: deconv2 + tanh, parity-packed [M2, 4*C] ----
    y2 = pl.pallas_call(
        deconv_tanh_kernel,
        out_shape=jax.ShapeDtypeStruct((B * H8 * H8, 4 * img_channels), jnp.float32),
    )(xp2, prep['w2p'], prep['b2t'])

    # parity -> NCHW assembly (tiny)
    out = (y2.reshape(B, H8, H8, 2, 2, img_channels)
             .transpose(0, 5, 1, 3, 2, 4)
             .reshape(B, img_channels, img_size, img_size))
    return out


# ----------------------------------------------------------------------------
# Deterministic parameter init (shapes from Generator.__init__)
# ----------------------------------------------------------------------------
def init_params(key, latent_dim, img_channels, img_size, num_classes):
    F = 128 * (img_size // 4) ** 2
    ks = jax.random.split(key, 11)
    return {
        'emb': jax.random.normal(ks[0], (num_classes, latent_dim), jnp.float32),
        'fc_w': 0.05 * jax.random.normal(ks[1], (F, latent_dim), jnp.float32),
        'fc_b': 0.05 * jax.random.normal(ks[2], (F,), jnp.float32),
        'bn_g': 1.0 + 0.1 * jax.random.normal(ks[3], (F,), jnp.float32),
        'bn_b': 0.1 * jax.random.normal(ks[4], (F,), jnp.float32),
        'w1': 0.05 * jax.random.normal(ks[5], (128, 64, 4, 4), jnp.float32),
        'b1': 0.05 * jax.random.normal(ks[6], (64,), jnp.float32),
        'g1': 1.0 + 0.1 * jax.random.normal(ks[7], (64,), jnp.float32),
        'be1': 0.1 * jax.random.normal(ks[8], (64,), jnp.float32),
        'w2': 0.05 * jax.random.normal(ks[9], (64, img_channels, 4, 4), jnp.float32),
        'b2': 0.05 * jax.random.normal(ks[10], (img_channels,), jnp.float32),
    }


# ----------------------------------------------------------------------------
# NumPy reference (PyTorch semantics, NCHW, float64)
# ----------------------------------------------------------------------------
def _ref_deconv_nchw(x, w, b):
    B, Cin, H, W = x.shape
    Cout = w.shape[1]
    out = np.zeros((B, Cout, 2 * H, 2 * W), x.dtype)
    for iy in range(H):
        for ky in range(4):
            oy = 2 * iy - 1 + ky
            if not 0 <= oy < 2 * H:
                continue
            for ix in range(W):
                for kx in range(4):
                    ox = 2 * ix - 1 + kx
                    if not 0 <= ox < 2 * W:
                        continue
                    out[:, :, oy, ox] += x[:, :, iy, ix] @ w[:, :, ky, kx]
    return out + b[None, :, None, None]


def _ref_forward(z, labels, p, img_size):
    emb = p['emb'][labels]
    x = z * emb
    h = x @ p['fc_w'].T + p['fc_b']
    mu, var = h.mean(axis=0), h.var(axis=0)
    h = (h - mu) / np.sqrt(var + EPS) * p['bn_g'] + p['bn_b']
    B, h4 = z.shape[0], img_size // 4
    x4 = h.reshape(B, 128, h4, h4)
    y1 = _ref_deconv_nchw(x4, p['w1'], p['b1'])
    m1, v1 = y1.mean(axis=(0, 2, 3)), y1.var(axis=(0, 2, 3))
    y1 = ((y1 - m1[None, :, None, None]) / np.sqrt(v1 + EPS)[None, :, None, None]
          * p['g1'][None, :, None, None] + p['be1'][None, :, None, None])
    y2 = _ref_deconv_nchw(y1, p['w2'], p['b2'])
    return np.tanh(y2)


if __name__ == "__main__":
    LATENT, IMG, C, NCLS, B = 32, 16, 3, 10, 4

    key = jax.random.PRNGKey(0)
    kp, kz, kl = jax.random.split(key, 3)
    params = init_params(kp, LATENT, C, IMG, NCLS)
    prep = prepare_params(params, img_size=IMG, img_channels=C)
    z = jax.random.normal(kz, (B, LATENT), jnp.float32)
    labels = jax.random.randint(kl, (B,), 0, NCLS)

    fwd = jax.jit(functools.partial(generator_forward, img_size=IMG, img_channels=C))
    out = jax.block_until_ready(fwd(z, labels, prep))
    assert out.shape == (B, C, IMG, IMG), out.shape

    # bf16 MXU operands (f32 accumulate) vs a float64 reference -> loosened tolerance.
    np_params = {k: np.asarray(v, np.float64) for k, v in params.items()}
    ref = _ref_forward(np.asarray(z, np.float64), np.asarray(labels), np_params, IMG)
    np.testing.assert_allclose(np.asarray(out), ref, rtol=2e-2, atol=2e-2)

    print("KERNEL_OK")
</pallas_src>

<mosaic_0001>
module attributes {stable_mosaic.version = 11 : i64} {
  func.func @fc_bn_kernel(%arg0: memref<4x32xf32, #tpu.memory_space<vmem>>, %arg1: memref<4x32xf32, #tpu.memory_space<vmem>>, %arg2: memref<32x2048xbf16, #tpu.memory_space<vmem>>, %arg3: memref<1x2048xf32, #tpu.memory_space<vmem>>, %arg4: memref<1x2048xf32, #tpu.memory_space<vmem>>, %arg5: memref<1x2048xf32, #tpu.memory_space<vmem>>, %arg6: memref<4x2048xf32, #tpu.memory_space<vmem>>) attributes {dimension_semantics = [], scalar_prefetch = 0 : i64, scratch_operands = 0 : i64, tpu.core_type = #tpu.core_type<tc>} {
    %c0 = arith.constant 0 : index
    %c0_0 = arith.constant 0 : index
    %0 = vector.load %arg0[%c0, %c0_0] : memref<4x32xf32, #tpu.memory_space<vmem>>, vector<4x32xf32>
    %c0_1 = arith.constant 0 : index
    %c0_2 = arith.constant 0 : index
    %1 = vector.load %arg1[%c0_1, %c0_2] : memref<4x32xf32, #tpu.memory_space<vmem>>, vector<4x32xf32>
    %2 = arith.mulf %0, %1 : vector<4x32xf32>
    %3 = arith.truncf %2 : vector<4x32xf32> to vector<4x32xbf16>
    %c0_3 = arith.constant 0 : index
    %c0_4 = arith.constant 0 : index
    %4 = vector.load %arg2[%c0_3, %c0_4] : memref<32x2048xbf16, #tpu.memory_space<vmem>>, vector<32x2048xbf16>
    %cst = arith.constant dense<0.000000e+00> : vector<4x2048xf32>
    %5 = tpu.matmul %3, %4, %cst {dimension_numbers = #tpu.dot_dimension_numbers<[1], [0], [0], [1], [0, 0, 1, 1], [], []>} : vector<4x32xbf16>, vector<32x2048xbf16>, vector<4x2048xf32> -> vector<4x2048xf32>
    %c0_5 = arith.constant 0 : index
    %c0_6 = arith.constant 0 : index
    %6 = vector.load %arg3[%c0_5, %c0_6] : memref<1x2048xf32, #tpu.memory_space<vmem>>, vector<1x2048xf32>
    %7 = vector.broadcast %6 : vector<1x2048xf32> to vector<4x2048xf32>
    %8 = arith.addf %5, %7 : vector<4x2048xf32>
    %cst_7 = arith.constant dense<0.000000e+00> : vector<2048xf32>
    %9 = vector.multi_reduction <add>, %8, %cst_7 [0] : vector<4x2048xf32> to vector<2048xf32>
    %10 = vector.shape_cast %9 : vector<2048xf32> to vector<1x2048xf32>
    %cst_8 = arith.constant 4.000000e+00 : f32
    %11 = vector.broadcast %cst_8 : f32 to vector<1x2048xf32>
    %12 = arith.divf %10, %11 : vector<1x2048xf32>
    %13 = arith.mulf %8, %8 : vector<4x2048xf32>
    %cst_9 = arith.constant dense<0.000000e+00> : vector<2048xf32>
    %14 = vector.multi_reduction <add>, %13, %cst_9 [0] : vector<4x2048xf32> to vector<2048xf32>
    %15 = vector.shape_cast %14 : vector<2048xf32> to vector<1x2048xf32>
    %cst_10 = arith.constant 4.000000e+00 : f32
    %16 = vector.broadcast %cst_10 : f32 to vector<1x2048xf32>
    %17 = arith.divf %15, %16 : vector<1x2048xf32>
    %18 = arith.mulf %12, %12 : vector<1x2048xf32>
    %19 = arith.subf %17, %18 : vector<1x2048xf32>
    %20 = vector.broadcast %12 : vector<1x2048xf32> to vector<4x2048xf32>
    %21 = arith.subf %8, %20 : vector<4x2048xf32>
    %cst_11 = arith.constant 9.99999974E-6 : f32
    %22 = vector.broadcast %cst_11 : f32 to vector<1x2048xf32>
    %23 = arith.addf %19, %22 : vector<1x2048xf32>
    %24 = math.rsqrt %23 : vector<1x2048xf32>
    %25 = vector.broadcast %24 : vector<1x2048xf32> to vector<4x2048xf32>
    %26 = arith.mulf %21, %25 : vector<4x2048xf32>
    %c0_12 = arith.constant 0 : index
    %c0_13 = arith.constant 0 : index
    %27 = vector.load %arg4[%c0_12, %c0_13] : memref<1x2048xf32, #tpu.memory_space<vmem>>, vector<1x2048xf32>
    %28 = vector.broadcast %27 : vector<1x2048xf32> to vector<4x2048xf32>
    %29 = arith.mulf %26, %28 : vector<4x2048xf32>
    %c0_14 = arith.constant 0 : index
    %c0_15 = arith.constant 0 : index
    %30 = vector.load %arg5[%c0_14, %c0_15] : memref<1x2048xf32, #tpu.memory_space<vmem>>, vector<1x2048xf32>
    %31 = vector.broadcast %30 : vector<1x2048xf32> to vector<4x2048xf32>
    %32 = arith.addf %29, %31 : vector<4x2048xf32>
    %c0_16 = arith.constant 0 : index
    %c0_17 = arith.constant 0 : index
    %33 = vector.load %arg6[%c0_16, %c0_17] : memref<4x2048xf32, #tpu.memory_space<vmem>>, vector<4x2048xf32>
    tpu.vector_store %arg6[%c0_16, %c0_17], %32 {strides = array<i32>} : memref<4x2048xf32, #tpu.memory_space<vmem>>, vector<4x2048xf32>,
    return
  }
}

module attributes {stable_mosaic.version = 11 : i64} {
  func.func @deconv_bn_kernel(%arg0: memref<4x6x6x128xf32, #tpu.memory_space<vmem>>, %arg1: memref<1152x256xbf16, #tpu.memory_space<vmem>>, %arg2: memref<1x256xf32, #tpu.memory_space<vmem>>, %arg3: memref<1x64xf32, #tpu.memory_space<vmem>>, %arg4: memref<1x64xf32, #tpu.memory_space<vmem>>, %arg5: memref<64x256xf32, #tpu.memory_space<vmem>>) attributes {dimension_semantics = [], scalar_prefetch = 0 : i64, scratch_operands = 0 : i64, tpu.core_type = #tpu.core_type<tc>} {
    %c0 = arith.constant 0 : index
    %c0_0 = arith.constant 0 : index
    %c0_1 = arith.constant 0 : index
    %c0_2 = arith.constant 0 : index
    %0 = vector.load %arg0[%c0, %c0_0, %c0_1, %c0_2] : memref<4x6x6x128xf32, #tpu.memory_space<vmem>>, vector<4x4x4x128xf32>
    %1 = vector.shape_cast %0 : vector<4x4x4x128xf32> to vector<64x128xf32>
    %c0_3 = arith.constant 0 : index
    %c0_4 = arith.constant 0 : index
    %c1 = arith.constant 1 : index
    %c0_5 = arith.constant 0 : index
    %2 = vector.load %arg0[%c0_3, %c0_4, %c1, %c0_5] : memref<4x6x6x128xf32, #tpu.memory_space<vmem>>, vector<4x4x4x128xf32>
    %3 = vector.shape_cast %2 : vector<4x4x4x128xf32> to vector<64x128xf32>
    %c0_6 = arith.constant 0 : index
    %c0_7 = arith.constant 0 : index
    %c2 = arith.constant 2 : index
    %c0_8 = arith.constant 0 : index
    %4 = vector.load %arg0[%c0_6, %c0_7, %c2, %c0_8] : memref<4x6x6x128xf32, #tpu.memory_space<vmem>>, vector<4x4x4x128xf32>
    %5 = vector.shape_cast %4 : vector<4x4x4x128xf32> to vector<64x128xf32>
    %c0_9 = arith.constant 0 : index
    %c1_10 = arith.constant 1 : index
    %c0_11 = arith.constant 0 : index
    %c0_12 = arith.constant 0 : index
    %6 = vector.load %arg0[%c0_9, %c1_10, %c0_11, %c0_12] : memref<4x6x6x128xf32, #tpu.memory_space<vmem>>, vector<4x4x4x128xf32>
    %7 = vector.shape_cast %6 : vector<4x4x4x128xf32> to vector<64x128xf32>
    %c0_13 = arith.constant 0 : index
    %c1_14 = arith.constant 1 : index
    %c1_15 = arith.constant 1 : index
    %c0_16 = arith.constant 0 : index
    %8 = vector.load %arg0[%c0_13, %c1_14, %c1_15, %c0_16] : memref<4x6x6x128xf32, #tpu.memory_space<vmem>>, vector<4x4x4x128xf32>
    %9 = vector.shape_cast %8 : vector<4x4x4x128xf32> to vector<64x128xf32>
    %c0_17 = arith.constant 0 : index
    %c1_18 = arith.constant 1 : index
    %c2_19 = arith.constant 2 : index
    %c0_20 = arith.constant 0 : index
    %10 = vector.load %arg0[%c0_17, %c1_18, %c2_19, %c0_20] : memref<4x6x6x128xf32, #tpu.memory_space<vmem>>, vector<4x4x4x128xf32>
    %11 = vector.shape_cast %10 : vector<4x4x4x128xf32> to vector<64x128xf32>
    %c0_21 = arith.constant 0 : index
    %c2_22 = arith.constant 2 : index
    %c0_23 = arith.constant 0 : index
    %c0_24 = arith.constant 0 : index
    %12 = vector.load %arg0[%c0_21, %c2_22, %c0_23, %c0_24] : memref<4x6x6x128xf32, #tpu.memory_space<vmem>>, vector<4x4x4x128xf32>
    %13 = vector.shape_cast %12 : vector<4x4x4x128xf32> to vector<64x128xf32>
    %c0_25 = arith.constant 0 : index
    %c2_26 = arith.constant 2 : index
    %c1_27 = arith.constant 1 : index
    %c0_28 = arith.constant 0 : index
    %14 = vector.load %arg0[%c0_25, %c2_26, %c1_27, %c0_28] : memref<4x6x6x128xf32, #tpu.memory_space<vmem>>, vector<4x4x4x128xf32>
    %15 = vector.shape_cast %14 : vector<4x4x4x128xf32> to vector<64x128xf32>
    %c0_29 = arith.constant 0 : index
    %c2_30 = arith.constant 2 : index
    %c2_31 = arith.constant 2 : index
    %c0_32 = arith.constant 0 : index
    %16 = vector.load %arg0[%c0_29, %c2_30, %c2_31, %c0_32] : memref<4x6x6x128xf32, #tpu.memory_space<vmem>>, vector<4x4x4x128xf32>
    %17 = vector.shape_cast %16 : vector<4x4x4x128xf32> to vector<64x128xf32>
    %18 = tpu.concatenate %1, %3, %5, %7, %9, %11, %13, %15, %17 in 1 : vector<64x128xf32>, vector<64x128xf32>, vector<64x128xf32>, vector<64x128xf32>, vector<64x128xf32>, vector<64x128xf32>, vector<64x128xf32>, vector<64x128xf32>, vector<64x128xf32> -> vector<64x1152xf32>
    %19 = arith.truncf %18 : vector<64x1152xf32> to vector<64x1152xbf16>
    %c0_33 = arith.constant 0 : index
    %c0_34 = arith.constant 0 : index
    %20 = vector.load %arg1[%c0_33, %c0_34] : memref<1152x256xbf16, #tpu.memory_space<vmem>>, vector<1152x256xbf16>
    %cst = arith.constant dense<0.000000e+00> : vector<64x256xf32>
    %21 = tpu.matmul %19, %20, %cst {dimension_numbers = #tpu.dot_dimension_numbers<[1], [0], [0], [1], [0, 0, 1, 1], [], []>} : vector<64x1152xbf16>, vector<1152x256xbf16>, vector<64x256xf32> -> vector<64x256xf32>
    %c0_35 = arith.constant 0 : index
    %c0_36 = arith.constant 0 : index
    %22 = vector.load %arg2[%c0_35, %c0_36] : memref<1x256xf32, #tpu.memory_space<vmem>>, vector<1x256xf32>
    %23 = vector.broadcast %22 : vector<1x256xf32> to vector<64x256xf32>
    %24 = arith.addf %21, %23 : vector<64x256xf32>
    %cst_37 = arith.constant dense<0.000000e+00> : vector<256xf32>
    %25 = vector.multi_reduction <add>, %24, %cst_37 [0] : vector<64x256xf32> to vector<256xf32>
    %26 = vector.shape_cast %25 : vector<256xf32> to vector<1x256xf32>
    %27 = arith.mulf %24, %24 : vector<64x256xf32>
    %cst_38 = arith.constant dense<0.000000e+00> : vector<256xf32>
    %28 = vector.multi_reduction <add>, %27, %cst_38 [0] : vector<64x256xf32> to vector<256xf32>
    %29 = vector.shape_cast %28 : vector<256xf32> to vector<1x256xf32>
    %30 = vector.extract_strided_slice %26 {offsets = [0, 0], sizes = [1, 64], strides = [1, 1]} : vector<1x256xf32> to vector<1x64xf32>
    %31 = vector.extract_strided_slice %26 {offsets = [0, 64], sizes = [1, 64], strides = [1, 1]} : vector<1x256xf32> to vector<1x64xf32>
    %32 = arith.addf %30, %31 : vector<1x64xf32>
    %33 = vector.extract_strided_slice %26 {offsets = [0, 128], sizes = [1, 64], strides = [1, 1]} : vector<1x256xf32> to vector<1x64xf32>
    %34 = arith.addf %32, %33 : vector<1x64xf32>
    %35 = vector.extract_strided_slice %26 {offsets = [0, 192], sizes = [1, 64], strides = [1, 1]} : vector<1x256xf32> to vector<1x64xf32>
    %36 = arith.addf %34, %35 : vector<1x64xf32>
    %37 = vector.extract_strided_slice %29 {offsets = [0, 0], sizes = [1, 64], strides = [1, 1]} : vector<1x256xf32> to vector<1x64xf32>
    %38 = vector.extract_strided_slice %29 {offsets = [0, 64], sizes = [1, 64], strides = [1, 1]} : vector<1x256xf32> to vector<1x64xf32>
    %39 = arith.addf %37, %38 : vector<1x64xf32>
    %40 = vector.extract_strided_slice %29 {offsets = [0, 128], sizes = [1, 64], strides = [1, 1]} : vector<1x256xf32> to vector<1x64xf32>
    %41 = arith.addf %39, %40 : vector<1x64xf32>
    %42 = vector.extract_strided_slice %29 {offsets = [0, 192], sizes = [1, 64], strides = [1, 1]} : vector<1x256xf32> to vector<1x64xf32>
    %43 = arith.addf %41, %42 : vector<1x64xf32>
    %cst_39 = arith.constant 2.560000e+02 : f32
    %44 = vector.broadcast %cst_39 : f32 to vector<1x64xf32>
    %45 = arith.divf %36, %44 : vector<1x64xf32>
    %cst_40 = arith.constant 2.560000e+02 : f32
    %46 = vector.broadcast %cst_40 : f32 to vector<1x64xf32>
    %47 = arith.divf %43, %46 : vector<1x64xf32>
    %48 = arith.mulf %45, %45 : vector<1x64xf32>
    %49 = arith.subf %47, %48 : vector<1x64xf32>
    %c0_41 = arith.constant 0 : index
    %c0_42 = arith.constant 0 : index
    %50 = vector.load %arg3[%c0_41, %c0_42] : memref<1x64xf32, #tpu.memory_space<vmem>>, vector<1x64xf32>
    %cst_43 = arith.constant 9.99999974E-6 : f32
    %51 = vector.broadcast %cst_43 : f32 to vector<1x64xf32>
    %52 = arith.addf %49, %51 : vector<1x64xf32>
    %53 = math.rsqrt %52 : vector<1x64xf32>
    %54 = arith.mulf %50, %53 : vector<1x64xf32>
    %c0_44 = arith.constant 0 : index
    %c0_45 = arith.constant 0 : index
    %55 = vector.load %arg4[%c0_44, %c0_45] : memref<1x64xf32, #tpu.memory_space<vmem>>, vector<1x64xf32>
    %56 = arith.mulf %45, %54 : vector<1x64xf32>
    %57 = arith.subf %55, %56 : vector<1x64xf32>
    %58 = tpu.concatenate %54, %54, %54, %54 in 1 : vector<1x64xf32>, vector<1x64xf32>, vector<1x64xf32>, vector<1x64xf32> -> vector<1x256xf32>
    %59 = tpu.concatenate %57, %57, %57, %57 in 1 : vector<1x64xf32>, vector<1x64xf32>, vector<1x64xf32>, vector<1x64xf32> -> vector<1x256xf32>
    %60 = vector.broadcast %58 : vector<1x256xf32> to vector<64x256xf32>
    %61 = arith.mulf %24, %60 : vector<64x256xf32>
    %62 = vector.broadcast %59 : vector<1x256xf32> to vector<64x256xf32>
    %63 = arith.addf %61, %62 : vector<64x256xf32>
    %c0_46 = arith.constant 0 : index
    %c0_47 = arith.constant 0 : index
    %64 = vector.load %arg5[%c0_46, %c0_47] : memref<64x256xf32, #tpu.memory_space<vmem>>, vector<64x256xf32>
    tpu.vector_store %arg5[%c0_46, %c0_47], %63 {strides = array<i32>} : memref<64x256xf32, #tpu.memory_space<vmem>>, vector<64x256xf32>,
    return
  }
}

module attributes {stable_mosaic.version = 11 : i64} {
  func.func @deconv_tanh_kernel(%arg0: memref<4x10x10x64xf32, #tpu.memory_space<vmem>>, %arg1: memref<576x12xbf16, #tpu.memory_space<vmem>>, %arg2: memref<1x12xf32, #tpu.memory_space<vmem>>, %arg3: memref<256x12xf32, #tpu.memory_space<vmem>>) attributes {dimension_semantics = [], scalar_prefetch = 0 : i64, scratch_operands = 0 : i64, tpu.core_type = #tpu.core_type<tc>} {
    %c0 = arith.constant 0 : index
    %c0_0 = arith.constant 0 : index
    %c0_1 = arith.constant 0 : index
    %c0_2 = arith.constant 0 : index
    %0 = vector.load %arg0[%c0, %c0_0, %c0_1, %c0_2] : memref<4x10x10x64xf32, #tpu.memory_space<vmem>>, vector<4x8x8x64xf32>
    %1 = vector.shape_cast %0 : vector<4x8x8x64xf32> to vector<256x64xf32>
    %c0_3 = arith.constant 0 : index
    %c0_4 = arith.constant 0 : index
    %c1 = arith.constant 1 : index
    %c0_5 = arith.constant 0 : index
    %2 = vector.load %arg0[%c0_3, %c0_4, %c1, %c0_5] : memref<4x10x10x64xf32, #tpu.memory_space<vmem>>, vector<4x8x8x64xf32>
    %3 = vector.shape_cast %2 : vector<4x8x8x64xf32> to vector<256x64xf32>
    %c0_6 = arith.constant 0 : index
    %c0_7 = arith.constant 0 : index
    %c2 = arith.constant 2 : index
    %c0_8 = arith.constant 0 : index
    %4 = vector.load %arg0[%c0_6, %c0_7, %c2, %c0_8] : memref<4x10x10x64xf32, #tpu.memory_space<vmem>>, vector<4x8x8x64xf32>
    %5 = vector.shape_cast %4 : vector<4x8x8x64xf32> to vector<256x64xf32>
    %c0_9 = arith.constant 0 : index
    %c1_10 = arith.constant 1 : index
    %c0_11 = arith.constant 0 : index
    %c0_12 = arith.constant 0 : index
    %6 = vector.load %arg0[%c0_9, %c1_10, %c0_11, %c0_12] : memref<4x10x10x64xf32, #tpu.memory_space<vmem>>, vector<4x8x8x64xf32>
    %7 = vector.shape_cast %6 : vector<4x8x8x64xf32> to vector<256x64xf32>
    %c0_13 = arith.constant 0 : index
    %c1_14 = arith.constant 1 : index
    %c1_15 = arith.constant 1 : index
    %c0_16 = arith.constant 0 : index
    %8 = vector.load %arg0[%c0_13, %c1_14, %c1_15, %c0_16] : memref<4x10x10x64xf32, #tpu.memory_space<vmem>>, vector<4x8x8x64xf32>
    %9 = vector.shape_cast %8 : vector<4x8x8x64xf32> to vector<256x64xf32>
    %c0_17 = arith.constant 0 : index
    %c1_18 = arith.constant 1 : index
    %c2_19 = arith.constant 2 : index
    %c0_20 = arith.constant 0 : index
    %10 = vector.load %arg0[%c0_17, %c1_18, %c2_19, %c0_20] : memref<4x10x10x64xf32, #tpu.memory_space<vmem>>, vector<4x8x8x64xf32>
    %11 = vector.shape_cast %10 : vector<4x8x8x64xf32> to vector<256x64xf32>
    %c0_21 = arith.constant 0 : index
    %c2_22 = arith.constant 2 : index
    %c0_23 = arith.constant 0 : index
    %c0_24 = arith.constant 0 : index
    %12 = vector.load %arg0[%c0_21, %c2_22, %c0_23, %c0_24] : memref<4x10x10x64xf32, #tpu.memory_space<vmem>>, vector<4x8x8x64xf32>
    %13 = vector.shape_cast %12 : vector<4x8x8x64xf32> to vector<256x64xf32>
    %c0_25 = arith.constant 0 : index
    %c2_26 = arith.constant 2 : index
    %c1_27 = arith.constant 1 : index
    %c0_28 = arith.constant 0 : index
    %14 = vector.load %arg0[%c0_25, %c2_26, %c1_27, %c0_28] : memref<4x10x10x64xf32, #tpu.memory_space<vmem>>, vector<4x8x8x64xf32>
    %15 = vector.shape_cast %14 : vector<4x8x8x64xf32> to vector<256x64xf32>
    %c0_29 = arith.constant 0 : index
    %c2_30 = arith.constant 2 : index
    %c2_31 = arith.constant 2 : index
    %c0_32 = arith.constant 0 : index
    %16 = vector.load %arg0[%c0_29, %c2_30, %c2_31, %c0_32] : memref<4x10x10x64xf32, #tpu.memory_space<vmem>>, vector<4x8x8x64xf32>
    %17 = vector.shape_cast %16 : vector<4x8x8x64xf32> to vector<256x64xf32>
    %18 = tpu.concatenate %1, %3, %5, %7, %9, %11, %13, %15, %17 in 1 : vector<256x64xf32>, vector<256x64xf32>, vector<256x64xf32>, vector<256x64xf32>, vector<256x64xf32>, vector<256x64xf32>, vector<256x64xf32>, vector<256x64xf32>, vector<256x64xf32> -> vector<256x576xf32>
    %19 = arith.truncf %18 : vector<256x576xf32> to vector<256x576xbf16>
    %c0_33 = arith.constant 0 : index
    %c0_34 = arith.constant 0 : index
    %20 = vector.load %arg1[%c0_33, %c0_34] : memref<576x12xbf16, #tpu.memory_space<vmem>>, vector<576x12xbf16>
    %cst = arith.constant dense<0.000000e+00> : vector<256x12xf32>
    %21 = tpu.matmul %19, %20, %cst {dimension_numbers = #tpu.dot_dimension_numbers<[1], [0], [0], [1], [0, 0, 1, 1], [], []>} : vector<256x576xbf16>, vector<576x12xbf16>, vector<256x12xf32> -> vector<256x12xf32>
    %c0_35 = arith.constant 0 : index
    %c0_36 = arith.constant 0 : index
    %22 = vector.load %arg2[%c0_35, %c0_36] : memref<1x12xf32, #tpu.memory_space<vmem>>, vector<1x12xf32>
    %23 = vector.broadcast %22 : vector<1x12xf32> to vector<256x12xf32>
    %24 = arith.addf %21, %23 : vector<256x12xf32>
    %25 = math.tanh %24 : vector<256x12xf32>
    %c0_37 = arith.constant 0 : index
    %c0_38 = arith.constant 0 : index
    %26 = vector.load %arg3[%c0_37, %c0_38] : memref<256x12xf32, #tpu.memory_space<vmem>>, vector<256x12xf32>
    tpu.vector_store %arg3[%c0_37, %c0_38], %25 {strides = array<i32>} : memref<256x12xf32, #tpu.memory_space<vmem>>, vector<256x12xf32>,
    return
  }
}

</mosaic_0001>

<bundles_post_ra>
// kernel: generator_forward.3
= control target key start
LH: loop header
LB: loop body
LE: loop exit
PB: predicated region body
PF: predicated region fallthrough
CT: control target
= control target key end

     0   :  { %11 = vsyncpa [#allocation3], 0  ;;  %s1365_s21 = smov [#allocation2]   ;;  %s1944_s0 = inlined_call_operand.vmem [shape: f32[4,32], index: 0, kind: input, shape index: {}]   ;;  %s1945_s1 = inlined_call_operand.vmem [shape: f32[4,32], index: 1, kind: input, shape index: {}]   ;;  %s1946_s2 = inlined_call_operand.hbm [shape: bf16[32,2048], index: 2, kind: input, shape index: {}]   ;;  %s1947_s3 = inlined_call_operand.vmem [shape: f32[1,2048], index: 3, kind: input, shape index: {}]   ;;  %s1948_s4 = inlined_call_operand.vmem [shape: f32[1,2048], index: 4, kind: input, shape index: {}]   ;;  %s1949_s5 = inlined_call_operand.vmem [shape: f32[1,2048], index: 5, kind: input, shape index: {}]   ;;  %s1950_s6 = inlined_call_operand.vmem [shape: f32[4,2048], index: 6, kind: output, shape index: {}]  }
   0x1   :  { %s21_s22 = sshll.u32 %s1365_s21, 4  ;;  %s1341_s25 = scalar_lea.hbm %s1946_s2, 4096  ;;  %s22_s22 = int_to_ptr.vmem [resolvable:$true] %s21_s22 }
   0x2   :  { %p1342_p0 = scmp.ne.s32.totalorder %s1946_s2, %s1341_s25  ;;  %p1345_p1 = scmp.lt.u32.totalorder %s1341_s25, %s1946_s2 }
   0x4   :  { %p1347_p2 = pnand %p1345_p1, %p1342_p0 }
   0x6   :  { %1350 = shalt.err (!%p1347_p2)
}
   0x7   :  { %s1351_s30 = scalar_lea.vmem %s22_s22, 4096  ;;  %p1356_p4 = scmp.lt.s32.totalorder %s22_s22, %s22_s22 }
   0x8   :  { %p1352_p3 = scmp.ne.s32.totalorder %s22_s22, %s1351_s30  ;;  %p1357_p5 = scmp.lt.s32.totalorder %s1351_s30, %s1351_s30 }
   0xa   :  { %p1358_p6 = por %p1357_p5, %p1356_p4 }
   0xc   :  { %p1359_p7 = pnand %p1358_p6, %p1352_p3 }
   0xe   :  { %1362 = shalt.err (!%p1359_p7)
}
   0xf   :  { %s1366_s7 = smov 1024   ;;  %s1367_s8 = smov 64  }
  0x10   :  { %27 = dma.hbm_to_vmem [thread:$0]  %s1946_s2, 4096, %s22_s22, [#allocation3], %s1366_s7, %s1366_s7, %s1367_s8  }
  0x11   :  { %1363 = dma.done.wait [#allocation3], 4096  }
  0x12   :  { %1364 = vsyncadd [#allocation3], 4294963200  ;;  %v1368_v0 = vmov 0   ;;  %v42_v1 = vld [vmem:[#allocation2] sm:$0xff]  ;;  %v43_v3 = vld [vmem:[#allocation2 + $0x8] sm:$0xff]  ;;  %vm318_vm0 = vcmask 261120  }
  0x13   :  { %354 = vmatprep.mubr.bf16.mxu0 %v1368_v0  ;;  %395 = vmatprep.mubr.bf16.mxu1 %v1368_v0  ;;  %v50_v2 = vld [vmem:[#allocation2 + $0x40] sm:$0xff]  ;;  %v51_v5 = vld [vmem:[#allocation2 + $0x48] sm:$0xff]  ;;  %v44_v17 = vld [vmem:[#allocation2 + $0x10] sm:$0xff]  ;;  %vm650_vm1 = vcmask 1043456  }
  0x14   :  { %v1266_v4 = vcombine.high %v42_v1, %v50_v2  ;;  %v1265_v6 = vcombine.low %v42_v1, %v50_v2  ;;  %v58_v7 = vld [vmem:[#allocation2 + $0x80] sm:$0xff]  ;;  %v1268_v9 = vcombine.high %v43_v3, %v51_v5  ;;  %v1267_v10 = vcombine.low %v43_v3, %v51_v5  ;;  %v59_v12 = vld [vmem:[#allocation2 + $0x88] sm:$0xff]  ;;  %v52_v18 = vld [vmem:[#allocation2 + $0x50] sm:$0xff] }
  0x15   :  { %v66_v8 = vld [vmem:[#allocation2 + $0xc0] sm:$0xff]  ;;  %v67_v13 = vld [vmem:[#allocation2 + $0xc8] sm:$0xff]  ;;  %v45_v21 = vld [vmem:[#allocation2 + $0x18] sm:$0xff]  ;;  %v1270_v24 = vcombine.high %v44_v17, %v52_v18  ;;  %v1269_v31 = vcombine.low %v44_v17, %v52_v18 }
  0x16   :  { %v1282_v11 = vcombine.high %v58_v7, %v66_v8  ;;  %v38_v14 = vld [vmem:[%s1944_s0] sm:$0xf]  ;;  %322 = vmatprep.subr.bf16.mxu0 %v1266_v4  ;;  %v1284_v15 = vcombine.high %v59_v12, %v67_v13  ;;  %363 = vmatprep.subr.bf16.mxu1 %v1268_v9  ;;  %v1281_v19 = vcombine.low %v58_v7, %v66_v8  ;;  %v53_v22 = vld [vmem:[#allocation2 + $0x58] sm:$0xff]  ;;  %v60_v26 = vld [vmem:[#allocation2 + $0x90] sm:$0xff] }
  0x17   :  { %v39_v16 = vld [vmem:[%s1945_s1] sm:$0xf]  ;;  %323 = vmatpush1.bf16.msra.mxu0 %v1265_v6  ;;  %364 = vmatpush1.bf16.msra.mxu1 %v1267_v10  ;;  %v1283_v23 = vcombine.low %v59_v12, %v67_v13  ;;  %v1272_v25 = vcombine.high %v45_v21, %v53_v22  ;;  %v68_v27 = vld [vmem:[#allocation2 + $0xd0] sm:$0xff]  ;;  %v61_v29 = vld [vmem:[#allocation2 + $0x98] sm:$0xff]  ;;  %v1271_v32 = vcombine.low %v45_v21, %v53_v22  ;;  %v78_v6 = vlaneseq }
  0x18   :  { %v40_v20 = vmul.f32 %v39_v16, %v38_v14  ;;  %324 = vmatprep.subr.bf16.mxu0 %v1282_v11  ;;  %365 = vmatprep.subr.bf16.mxu1 %v1284_v15  ;;  %v69_v30 = vld [vmem:[#allocation2 + $0xd8] sm:$0xff]  ;;  %v1286_v33 = vcombine.high %v60_v26, %v68_v27  ;;  %v46_v35 = vld [vmem:[#allocation2 + $0x20] sm:$0xff]  ;;  %v47_v37 = vld [vmem:[#allocation2 + $0x28] sm:$0xff]  ;;  %v1285_v39 = vcombine.low %v60_v26, %v68_v27 }
  0x19   :  { %v1288_v34 = vcombine.high %v61_v29, %v69_v30  ;;  %v54_v36 = vld [vmem:[#allocation2 + $0x60] sm:$0xff]  ;;  %v55_v38 = vld [vmem:[#allocation2 + $0x68] sm:$0xff]  ;;  %v1287_v40 = vcombine.low %v61_v29, %v69_v30  ;;  %v48_v51 = vld [vmem:[#allocation2 + $0x30] sm:$0xff]  ;;  %v79_v7 = vshrl.u32 %v78_v6, 7 }
  0x1a   :  { %v1424_v28 = vpack.c.bf16 %v40_v20, %v40_v20  ;;  %v1274_v41 = vcombine.high %v46_v35, %v54_v36  ;;  %v1276_v42 = vcombine.high %v47_v37, %v55_v38  ;;  %v62_v43 = vld [vmem:[#allocation2 + $0xa0] sm:$0xff]  ;;  %v63_v45 = vld [vmem:[#allocation2 + $0xa8] sm:$0xff]  ;;  %v1273_v47 = vcombine.low %v46_v35, %v54_v36  ;;  %v56_v52 = vld [vmem:[#allocation2 + $0x70] sm:$0xff] }
  0x1b   :  { %325 = vmatpush1.bf16.msra.mxu0 %v1281_v19  ;;  %366 = vmatpush1.bf16.msra.mxu1 %v1283_v23  ;;  %v70_v44 = vld [vmem:[#allocation2 + $0xe0] sm:$0xff]  ;;  %v71_v46 = vld [vmem:[#allocation2 + $0xe8] sm:$0xff]  ;;  %v1275_v48 = vcombine.low %v47_v37, %v55_v38  ;;  %v49_v53 = vld [vmem:[#allocation2 + $0x38] sm:$0xff]  ;;  %v1278_v57 = vcombine.high %v48_v51, %v56_v52  ;;  %v1277_v63 = vcombine.low %v48_v51, %v56_v52  ;;  %v1448_v8 = vsub.s32 0, %v79_v7 }
  0x1c   :  { %404 = vmatprep.subr.bf16.mxu0 %v1270_v24  ;;  %445 = vmatprep.subr.bf16.mxu1 %v1272_v25  ;;  %v1290_v49 = vcombine.high %v62_v43, %v70_v44  ;;  %v1292_v50 = vcombine.high %v63_v45, %v71_v46  ;;  %v57_v54 = vld [vmem:[#allocation2 + $0x78] sm:$0xff]  ;;  %v1289_v55 = vcombine.low %v62_v43, %v70_v44  ;;  %v64_v59 = vld [vmem:[#allocation2 + $0xb0] sm:$0xff]  ;;  %v1450_v9 = vsub.s32 2, %v79_v7  ;;  %v1455_v10 = vld [vmem:[%s1947_s3] sm:$0xff] }
  0x1d   :  { %v1291_v56 = vcombine.low %v63_v45, %v71_v46  ;;  %v1280_v58 = vcombine.high %v49_v53, %v57_v54  ;;  %v72_v60 = vld [vmem:[#allocation2 + $0xf0] sm:$0xff]  ;;  %v65_v61 = vld [vmem:[#allocation2 + $0xb8] sm:$0xff]  ;;  %v1279_v1 = vcombine.low %v49_v53, %v57_v54  ;;  %v1459_v11 = vsub.s32 3, %v79_v7  ;;  %v1472_v16 = vld [vmem:[%s1948_s4] sm:$0xff] }
  0x1e   :  { %1297 = vmatmul.mubr.msk.bf16.vlgmr.msra.gmra.mrb[0].mxu0 %vm318_vm0, %v1424_v28  ;;  %1298 = vmatmul.mubr.msk.bf16.vlgmr.msra.gmra.mrb[0].mxu1 %vm318_vm0, %v1424_v28  ;;  %v73_v62 = vld [vmem:[#allocation2 + $0xf8] sm:$0xff]  ;;  %v1294_v2 = vcombine.high %v64_v59, %v72_v60  ;;  %v1293_v4 = vcombine.low %v64_v59, %v72_v60  ;;  %v1461_v12 = vsub.s32 4, %v79_v7  ;;  %v1463_v13 = vsub.s32 6, %v79_v7  ;;  %v1479_v18 = vld [vmem:[%s1949_s5] sm:$0xff]  ;;  %v1492_v23 = vld [vmem:[%s1947_s3 + $0x8] sm:$0xff] }
  0x1f   :  { %405 = vmatpush1.bf16.msra.mxu0 %v1269_v31  ;;  %446 = vmatpush1.bf16.msra.mxu1 %v1271_v32  ;;  %v1296_v3 = vcombine.high %v65_v61, %v73_v62  ;;  %v1295_v5 = vcombine.low %v65_v61, %v73_v62  ;;  %v1465_v14 = vsub.s32 5, %v79_v7  ;;  %v1467_v15 = vsub.s32 7, %v79_v7 }
  0x20   :  { %406 = vmatprep.subr.bf16.mxu0 %v1286_v33  ;;  %447 = vmatprep.subr.bf16.mxu1 %v1288_v34  ;;  %v81_v17 = vrot.slane %v1455_v10, %v1448_v8  ;;  %v89_v19 = vrot.slane %v1455_v10, %v1450_v9  ;;  %v93_v21 = vrot.slane %v1455_v10, %v1459_v11 }
  0x21   :  { %436 = vmatprep.mubr.bf16.mxu0 %v1368_v0  ;;  %477 = vmatprep.mubr.bf16.mxu1 %v1368_v0  ;;  %v97_v22 = vrot.slane %v1455_v10, %v1461_v12  ;;  %v1027_v24 = vrot.slane %v1472_v16, %v1448_v8  ;;  %v105_v25 = vrot.slane %v1455_v10, %v1463_v13 }
  0x22   :  { %v101_v26 = vrot.slane %v1455_v10, %v1465_v14  ;;  %v109_v27 = vrot.slane %v1455_v10, %v1467_v15  ;;  %v1035_v29 = vrot.slane %v1472_v16, %v1450_v9 }
  0x23   :  { %407 = vmatpush1.bf16.msra.mxu0 %v1285_v39  ;;  %448 = vmatpush1.bf16.msra.mxu1 %v1287_v40 }
  0x24   :  { %486 = vmatprep.subr.bf16.mxu0 %v1274_v41  ;;  %527 = vmatprep.subr.bf16.mxu1 %v1276_v42 }
  0x26   :  { %1299 = vmatmul.mubr.msk.bf16.vlgmr.msra.gmra.mrb[4].mxu0 %vm318_vm0, %v1424_v28  ;;  %1300 = vmatmul.mubr.msk.bf16.vlgmr.msra.gmra.mrb[4].mxu1 %vm318_vm0, %v1424_v28 }
  0x27   :  { %487 = vmatpush1.bf16.msra.mxu0 %v1273_v47  ;;  %528 = vmatpush1.bf16.msra.mxu1 %v1275_v48 }
  0x28   :  { %488 = vmatprep.subr.bf16.mxu0 %v1290_v49  ;;  %529 = vmatprep.subr.bf16.mxu1 %v1292_v50 }
  0x29   :  { %518 = vmatprep.mubr.bf16.mxu0 %v1368_v0  ;;  %559 = vmatprep.mubr.bf16.mxu1 %v1368_v0 }
  0x2b   :  { %489 = vmatpush1.bf16.msra.mxu0 %v1289_v55  ;;  %530 = vmatpush1.bf16.msra.mxu1 %v1291_v56 }
  0x2c   :  { %568 = vmatprep.subr.bf16.mxu0 %v1278_v57  ;;  %609 = vmatprep.subr.bf16.mxu1 %v1280_v58 }
  0x2e   :  { %1301 = vmatmul.mubr.msk.bf16.vlgmr.msra.gmra.mrb[8].mxu0 %vm318_vm0, %v1424_v28  ;;  %1302 = vmatmul.mubr.msk.bf16.vlgmr.msra.gmra.mrb[8].mxu1 %vm318_vm0, %v1424_v28 }
  0x2f   :  { %569 = vmatpush1.bf16.msra.mxu0 %v1277_v63  ;;  %610 = vmatpush1.bf16.msra.mxu1 %v1279_v1 }
  0x30   :  { %570 = vmatprep.subr.bf16.mxu0 %v1294_v2  ;;  %611 = vmatprep.subr.bf16.mxu1 %v1296_v3 }
  0x31   :  { %600 = vmatprep.mubr.bf16.mxu0 %v1368_v0  ;;  %641 = vmatprep.mubr.bf16.mxu1 %v1368_v0  ;;  %v1457_v0 = vsub.s32 1, %v79_v7 }
  0x33   :  { %571 = vmatpush1.bf16.msra.mxu0 %v1293_v4  ;;  %612 = vmatpush1.bf16.msra.mxu1 %v1295_v5  ;;  %v85_v20 = vrot.slane %v1455_v10, %v1457_v0 }
  0x36   :  { %1303 = vmatmul.mubr.msk.bf16.vlgmr.msra.gmra.mrb[12].mxu0 %vm318_vm0, %v1424_v28  ;;  %1304 = vmatmul.mubr.msk.bf16.vlgmr.msra.gmra.mrb[12].mxu1 %vm318_vm0, %v1424_v28  ;;  %v1127_v28 = vrot.slane %v1479_v18, %v1448_v8 }
  0xf1   :  { %v356_v36 = vpop.f32.mrb[0].mxu0  ;;  %v397_v42 = vpop.f32.mrb[0].mxu1 }
  0xf2   :  { %v1526_v41 = vadd.f32 %v356_v36, %v81_v17  ;;  %v358_v43 = vpop.f32.mrb[1].mxu0  ;;  %v1534_v47 = vadd.f32 %v397_v42, %v89_v19  ;;  %v399_v49 = vpop.f32.mrb[1].mxu1 }
  0xf3   :  { %v1536_v48 = vadd.f32 %v358_v43, %v85_v20  ;;  %v360_v50 = vpop.f32.mrb[2].mxu0  ;;  %v1546_v55 = vadd.f32 %v399_v49, %v93_v21  ;;  %v401_v56 = vpop.f32.mrb[2].mxu1 }
  0xf4   :  { %v651_v53 = vsel %vm650_vm1, %v1526_v41, 0.0  ;;  %v780_v54 = vmul.f32 %v1526_v41, %v1526_v41  ;;  %v361_v57 = vpop.f32.mrb[3].mxu0  ;;  %v665_v60 = vsel %vm650_vm1, %v1534_v47, 0.0  ;;  %v782_v61 = vmul.f32 %v1534_v47, %v1534_v47  ;;  %v402_v63 = vpop.f32.mrb[3].mxu1 }
  0xf5   :  { %v652_v59 = vrot.slane %v651_v53, 4  ;;  %v658_v62 = vsel %vm650_vm1, %v1536_v48, 0.0  ;;  %v666_v2 = vrot.slane %v665_v60, 4  ;;  %v781_v4 = vmul.f32 %v1536_v48, %v1536_v48 }
  0xf6   :  { %v796_v1 = vsel %vm650_vm1, %v780_v54, 0.0  ;;  %v659_v3 = vrot.slane %v658_v62, 4  ;;  %v810_v7 = vsel %vm650_vm1, %v782_v61, 0.0  ;;  %v672_v17 = vsel %vm650_vm1, %v1546_v55, 0.0 }
  0xf7   :  { %v653_v5 = vadd.f32 %v652_v59, %v651_v53  ;;  %v797_v6 = vrot.slane %v796_v1, 4  ;;  %v667_v19 = vadd.f32 %v666_v2, %v665_v60  ;;  %v811_v20 = vrot.slane %v810_v7, 4 }
  0xf8   :  { %v660_v21 = vadd.f32 %v659_v3, %v658_v62  ;;  %v803_v36 = vsel %vm650_vm1, %v781_v4, 0.0  ;;  %v673_v50 = vrot.slane %v672_v17, 4  ;;  %v783_v59 = vmul.f32 %v1546_v55, %v1546_v55 }
  0xf9   :  { %v654_v42 = vrot.slane %v653_v5, 2  ;;  %v798_v43 = vadd.f32 %v797_v6, %v796_v1  ;;  %v804_v49 = vrot.slane %v803_v36, 4  ;;  %v1563_v54 = vpop.f32.mrb[4].mxu0  ;;  %v668_v56 = vrot.slane %v667_v19, 2  ;;  %v479_v61 = vpop.f32.mrb[4].mxu1 }
  0xfa   :  { %v812_v57 = vadd.f32 %v811_v20, %v810_v7  ;;  %v661_v53 = vrot.slane %v660_v21, 2  ;;  %v1567_v63 = vpop.f32.mrb[5].mxu0  ;;  %v674_v3 = vadd.f32 %v673_v50, %v672_v17  ;;  %v1569_v4 = vpop.f32.mrb[5].mxu1  ;;  %v817_v58 = vsel %vm650_vm1, %v783_v59, 0.0 }
  0xfb   :  { %v655_v60 = vadd.f32 %v654_v42, %v653_v5  ;;  %v799_v2 = vrot.slane %v798_v43, 2  ;;  %v805_v62 = vadd.f32 %v804_v49, %v803_v36  ;;  %v442_v1 = vpop.f32.mrb[6].mxu0  ;;  %v669_v6 = vadd.f32 %v668_v56, %v667_v19  ;;  %v483_v7 = vpop.f32.mrb[6].mxu1 }
  0xfc   :  { %v813_v45 = vrot.slane %v812_v57, 2  ;;  %v662_v52 = vadd.f32 %v661_v53, %v660_v21  ;;  %v443_v20 = vpop.f32.mrb[7].mxu0  ;;  %v675_v38 = vrot.slane %v674_v3, 2  ;;  %v484_v37 = vpop.f32.mrb[7].mxu1  ;;  %v818_v36 = vrot.slane %v817_v58, 4 }
  0xfd   :  { %v656_v46 = vrot.slane %v655_v60, 1  ;;  %v800_v51 = vadd.f32 %v799_v2, %v798_v43  ;;  %v806_v44 = vrot.slane %v805_v62, 2  ;;  %v670_v40 = vrot.slane %v669_v6, 1 }
  0xfe   :  { %v814_v5 = vadd.f32 %v813_v45, %v812_v57  ;;  %v663_v42 = vrot.slane %v662_v52, 1  ;;  %v676_v1 = vadd.f32 %v675_v38, %v674_v3  ;;  %v819_v53 = vadd.f32 %v818_v36, %v817_v58 }
  0xff   :  { %v657_v17 = vadd.f32 %v656_v46, %v655_v60  ;;  %v801_v49 = vrot.slane %v800_v51, 1  ;;  %v807_v50 = vadd.f32 %v806_v44, %v805_v62  ;;  %v671_v19 = vadd.f32 %v670_v40, %v669_v6 }
 0x100   :  { %v815_v56 = vrot.slane %v814_v5, 1  ;;  %v664_v21 = vadd.f32 %v663_v42, %v662_v52  ;;  %v677_v43 = vrot.slane %v676_v1, 1  ;;  %v820_v46 = vrot.slane %v819_v53, 2 }
 0x101   :  { %v1572_v59 = vmul.f32 0.25, %v657_v17  ;;  %v802_v7 = vadd.f32 %v801_v49, %v800_v51  ;;  %v808_v20 = vrot.slane %v807_v50, 1  ;;  %v1574_v2 = vpop.f32.mrb[8].mxu0  ;;  %v1576_v37 = vmul.f32 0.25, %v671_v19  ;;  %v1580_v60 = vpop.f32.mrb[8].mxu1 }
 0x102   :  { %v816_v45 = vadd.f32 %v815_v56, %v814_v5  ;;  %v1578_v57 = vmul.f32 0.25, %v664_v21  ;;  %v1582_v38 = vpop.f32.mrb[9].mxu0  ;;  %v1586_v51 = vpop.f32.mrb[9].mxu1  ;;  %v678_v56 = vadd.f32 %v677_v43, %v676_v1  ;;  %v1615_v1 = vadd.f32 %v1567_v63, %v101_v26 }
 0x103   :  { %v908_v40 = vmul.f32 0.25, %v802_v7  ;;  %v924_v44 = vmul.f32 %v1572_v59, %v1572_v59  ;;  %v809_v52 = vadd.f32 %v808_v20, %v807_v50  ;;  %v524_v58 = vpop.f32.mrb[10].mxu0  ;;  %v956_v3 = vsub.f32 %v1526_v41, %v1572_v59  ;;  %v565_v36 = vpop.f32.mrb[10].mxu1 }
 0x104   :  { %v910_v6 = vmul.f32 0.25, %v816_v45  ;;  %v926_v5 = vmul.f32 %v1576_v37, %v1576_v37  ;;  %v925_v42 = vmul.f32 %v1578_v57, %v1578_v57  ;;  %v525_v17 = vpop.f32.mrb[11].mxu0  ;;  %v958_v50 = vsub.f32 %v1534_v47, %v1576_v37  ;;  %v566_v21 = vpop.f32.mrb[11].mxu1 }
 0x105   :  { %v940_v49 = vsub.f32 %v908_v40, %v924_v44  ;;  %v909_v19 = vmul.f32 0.25, %v809_v52  ;;  %v821_v20 = vadd.f32 %v820_v46, %v819_v53  ;;  %v1602_v45 = vadd.f32 %v1563_v54, %v97_v22 }
 0x106   :  { %v942_v7 = vsub.f32 %v910_v6, %v926_v5  ;;  %v1607_v58 = vadd.f32 %v479_v61, %v105_v25  ;;  %v1609_v36 = vmul.f32 0.25, %v678_v56  ;;  %v957_v25 = vsub.f32 %v1536_v48, %v1578_v57 }
 0x107   :  { %v972_v40 = vadd.f32 1e-05, %v940_v49  ;;  %v941_v44 = vsub.f32 %v909_v19, %v925_v42  ;;  %v822_v43 = vrot.slane %v821_v20, 1  ;;  %v679_v22 = vsel %vm650_vm1, %v1602_v45, 0.0 }
 0x108   :  { %v974_v53 = vadd.f32 1e-05, %v942_v7  ;;  %v784_v54 = vmul.f32 %v1602_v45, %v1602_v45  ;;  %v927_v46 = vmul.f32 %v1609_v36, %v1609_v36  ;;  %v680_v63 = vrot.slane %v679_v22, 4 }
 0x109   :  { %1309 = vrsqrt.f32 %v972_v40  ;;  %v973_v61 = vadd.f32 1e-05, %v941_v44  ;;  %v1625_v52 = vpop.f32.mrb[12].mxu0  ;;  %v823_v26 = vadd.f32 %v822_v43, %v821_v20  ;;  %v1628_v5 = vpop.f32.mrb[12].mxu1  ;;  %v693_v49 = vsel %vm650_vm1, %v1607_v58, 0.0 }
 0x10a   :  { %1311 = vrsqrt.f32 %v974_v53  ;;  %v824_v6 = vsel %vm650_vm1, %v784_v54, 0.0  ;;  %v1630_v42 = vpop.f32.mrb[13].mxu0  ;;  %v786_v19 = vmul.f32 %v1607_v58, %v1607_v58  ;;  %v1636_v56 = vpop.f32.mrb[13].mxu1  ;;  %v681_v20 = vadd.f32 %v680_v63, %v679_v22 }
 0x10b   :  { %1313 = vrsqrt.f32 %v973_v61  ;;  %v825_v17 = vrot.slane %v824_v6, 4  ;;  %v606_v21 = vpop.f32.mrb[14].mxu0  ;;  %v911_v7 = vmul.f32 0.25, %v823_v26  ;;  %v694_v40 = vrot.slane %v693_v49, 4  ;;  %v647_v53 = vpop.f32.mrb[14].mxu1 }
 0x10c   :  { %v686_v44 = vsel %vm650_vm1, %v1615_v1, 0.0  ;;  %v607_v43 = vpop.f32.mrb[15].mxu0  ;;  %v838_v61 = vsel %vm650_vm1, %v786_v19, 0.0  ;;  %v785_v34 = vmul.f32 %v1615_v1, %v1615_v1  ;;  %v648_v33 = vpop.f32.mrb[15].mxu1  ;;  %v682_v35 = vrot.slane %v681_v20, 2 }
 0x10d   :  { %v826_v54 = vadd.f32 %v825_v17, %v824_v6  ;;  %v687_v62 = vrot.slane %v686_v44, 4  ;;  %v943_v39 = vsub.f32 %v911_v7, %v927_v46  ;;  %v695_v30 = vadd.f32 %v694_v40, %v693_v49 }
 0x10e   :  { %v839_v21 = vrot.slane %v838_v61, 4  ;;  %v831_v63 = vsel %vm650_vm1, %v785_v34, 0.0  ;;  %v1648_v6 = vadd.f32 %v1569_v4, %v109_v27  ;;  %v683_v19 = vadd.f32 %v682_v35, %v681_v20 }
 0x10f   :  { %v827_v26 = vrot.slane %v826_v54, 2  ;;  %v688_v22 = vadd.f32 %v687_v62, %v686_v44  ;;  %v975_v17 = vadd.f32 1e-05, %v943_v39  ;;  %v696_v53 = vrot.slane %v695_v30, 2 }
 0x110   :  { %v840_v43 = vadd.f32 %v839_v21, %v838_v61  ;;  %v832_v46 = vrot.slane %v831_v63, 4  ;;  %v700_v49 = vsel %vm650_vm1, %v1648_v6, 0.0  ;;  %v684_v62 = vrot.slane %v683_v19, 1 }
 0x111   :  { %v828_v32 = vadd.f32 %v827_v26, %v826_v54  ;;  %v689_v33 = vrot.slane %v688_v22, 2  ;;  %1315 = vrsqrt.f32 %v975_v17  ;;  %v697_v7 = vadd.f32 %v696_v53, %v695_v30 }
 0x112   :  { %v841_v34 = vrot.slane %v840_v43, 2  ;;  %v833_v31 = vadd.f32 %v832_v46, %v831_v63  ;;  %v701_v27 = vrot.slane %v700_v49, 4  ;;  %v685_v39 = vadd.f32 %v684_v62, %v683_v19 }
 0x113   :  { %v1310_v40 = vpop.eup %1309  ;;  %v829_v44 = vrot.slane %v828_v32, 1  ;;  %v690_v10 = vadd.f32 %v689_v33, %v688_v22  ;;  %v698_v20 = vrot.slane %v697_v7, 1  ;;  %v1055_v57 = vrot.slane %v1472_v16, %v1467_v15 }
 0x114   :  { %v1312_v4 = vpop.eup %1311  ;;  %v1004_v35 = vmul.f32 %v1310_v40, %v956_v3  ;;  %v842_v54 = vadd.f32 %v841_v34, %v840_v43  ;;  %v834_v17 = vrot.slane %v833_v31, 2  ;;  %v1664_v59 = vmul.f32 0.25, %v685_v39 }
 0x115   :  { %v1314_v61 = vpop.eup %1313  ;;  %v1006_v21 = vmul.f32 %v1312_v4, %v958_v50  ;;  %v830_v30 = vadd.f32 %v829_v44, %v828_v32  ;;  %v691_v26 = vrot.slane %v690_v10, 1  ;;  %v699_v3 = vadd.f32 %v698_v20, %v697_v7 }
 0x116   :  { %v1104_v22 = vmul.f32 %v1027_v24, %v1004_v35  ;;  %v1005_v41 = vmul.f32 %v1314_v61, %v957_v25  ;;  %v843_v37 = vrot.slane %v842_v54, 1  ;;  %v1951_v24 = vrot.slane %v1472_v16, %v1457_v0 }
 0x117   :  { %v1106_v63 = vmul.f32 %v1035_v29, %v1006_v21  ;;  %v912_v47 = vmul.f32 0.25, %v830_v30  ;;  %v692_v32 = vadd.f32 %v691_v26, %v690_v10  ;;  %v928_v48 = vmul.f32 %v1664_v59, %v1664_v59 }
 0x118   :  { %v1204_v50 = vadd.f32 %v1127_v28, %v1104_v22  ;;  %v1105_v19 = vmul.f32 %v1951_v24, %v1005_v41  ;;  %v1679_v25 = vmul.f32 0.25, %v699_v3  ;;  %v844_v29 = vadd.f32 %v843_v37, %v842_v54 }
 0x119   :  { %v1681_v53 = vmul.f32 0.25, %v692_v32  ;;  %v1155_v43 = vrot.slane %v1479_v18, %v1467_v15  ;;  %v1952_v28 = vrot.slane %v1479_v18, %v1457_v0  ;;  %v944_v46 = vsub.f32 %v912_v47, %v928_v48 }
 0x11a   :  { %v835_v62 = vadd.f32 %v834_v17, %v833_v31  ;;  %v702_v7 = vadd.f32 %v701_v27, %v700_v49  ;;  %v1953_v34 = vrot.slane %v1479_v18, %v1450_v9  ;;  %v959_v44 = vsub.f32 %v1546_v55, %v1609_v36 }
 0x11b   :  { %v1205_v33 = vadd.f32 %v1952_v28, %v1105_v19  ;;  %v914_v10 = vmul.f32 0.25, %v844_v29  ;;  %v930_v4 = vmul.f32 %v1679_v25, %v1679_v25  ;;  %v1316_v35 = vpop.eup %1315  ;;  %v976_v20 = vadd.f32 1e-05, %v944_v46 }
 0x11c   :  { %v1206_v40 = vadd.f32 %v1953_v34, %v1106_v63  ;;  %v836_v54 = vrot.slane %v835_v62, 1  ;;  %v929_v61 = vmul.f32 %v1681_v53, %v1681_v53  ;;  %v1007_v31 = vmul.f32 %v1316_v35, %v959_v44 }
 0x11d   :  { %v1236_v39 = vcombine.low %v1204_v50, %v1205_v33  ;;  %v946_v49 = vsub.f32 %v914_v10, %v930_v4  ;;  %v703_v27 = vrot.slane %v702_v7, 2  ;;  %v787_v21 = vmul.f32 %v1648_v6, %v1648_v6 }
 0x11e   :  { %1317 = vrsqrt.f32 %v976_v20  ;;  %v837_v55 = vadd.f32 %v836_v54, %v835_v62  ;;  %v1954_v36 = vrot.slane %v1492_v23, %v1448_v8  ;;  %v1955_v26 = vrot.slane %v1492_v23, %v1450_v9 }
 0x11f   :  { %1252 = vst [vmem:[%s1950_s6] sm:$0xff] %v1236_v39  ;;  %v1956_v22 = vrot.slane %v1472_v16, %v1459_v11  ;;  %v978_v3 = vadd.f32 1e-05, %v946_v49  ;;  %v704_v63 = vadd.f32 %v703_v27, %v702_v7  ;;  %v845_v47 = vsel %vm650_vm1, %v787_v21, 0.0 }
 0x120   :  { %v1706_v30 = vadd.f32 %v1574_v2, %v1954_v36  ;;  %v1712_v17 = vadd.f32 %v1580_v60, %v1955_v26  ;;  %v913_v37 = vmul.f32 0.25, %v837_v55  ;;  %v846_v32 = vrot.slane %v845_v47, 4 }
 0x121   :  { %v1107_v41 = vmul.f32 %v1956_v22, %v1007_v31  ;;  %v1957_v60 = vrot.slane %v1479_v18, %v1459_v11  ;;  %1319 = vrsqrt.f32 %v978_v3  ;;  %v705_v19 = vrot.slane %v704_v63, 1 }
 0x122   :  { %v707_v2 = vsel %vm650_vm1, %v1706_v30, 0.0  ;;  %v788_v50 = vmul.f32 %v1706_v30, %v1706_v30  ;;  %v945_v29 = vsub.f32 %v913_v37, %v929_v61  ;;  %v847_v28 = vadd.f32 %v846_v32, %v845_v47 }
 0x123   :  { %v1207_v24 = vadd.f32 %v1957_v60, %v1107_v41  ;;  %v708_v48 = vrot.slane %v707_v2, 4  ;;  %v721_v46 = vsel %vm650_vm1, %v1712_v17, 0.0  ;;  %v706_v7 = vadd.f32 %v705_v19, %v704_v63 }
 0x124   :  { %v852_v33 = vsel %vm650_vm1, %v788_v50, 0.0  ;;  %v977_v10 = vadd.f32 1e-05, %v945_v29  ;;  %v848_v4 = vrot.slane %v847_v28, 2  ;;  %v722_v35 = vrot.slane %v721_v46, 4 }
 0x125   :  { %v1237_v62 = vcombine.low %v1206_v40, %v1207_v24  ;;  %v709_v34 = vadd.f32 %v708_v48, %v707_v2  ;;  %v853_v44 = vrot.slane %v852_v33, 4  ;;  %v790_v39 = vmul.f32 %v1712_v17, %v1712_v17 }
 0x126   :  { %v1733_v20 = vmul.f32 0.25, %v706_v7  ;;  %v1958_v40 = vrot.slane %v1492_v23, %v1457_v0  ;;  %1321 = vrsqrt.f32 %v977_v10  ;;  %v849_v49 = vadd.f32 %v848_v4, %v847_v28  ;;  %v1759_v4 = vld [vmem:[%s1948_s4 + $0x8] sm:$0xff] }
 0x127   :  { %1253 = vst [vmem:[%s1950_s6 + $0x8] sm:$0xff] %v1237_v62  ;;  %v710_v54 = vrot.slane %v709_v34, 2  ;;  %v854_v61 = vadd.f32 %v853_v44, %v852_v33  ;;  %v723_v27 = vadd.f32 %v722_v35, %v721_v46  ;;  %v866_v21 = vsel %vm650_vm1, %v790_v39, 0.0 }
 0x128   :  { %v1739_v31 = vadd.f32 %v1582_v38, %v1958_v40  ;;  %v960_v55 = vsub.f32 %v1602_v45, %v1664_v59  ;;  %v133_v22 = vrot.slane %v1492_v23, %v1465_v14  ;;  %v1318_v41 = vpop.eup %1317  ;;  %v850_v3 = vrot.slane %v849_v49, 1 }
 0x129   :  { %v711_v36 = vadd.f32 %v710_v54, %v709_v34  ;;  %v855_v26 = vrot.slane %v854_v61, 2  ;;  %v724_v63 = vrot.slane %v723_v27, 2  ;;  %v867_v47 = vrot.slane %v866_v21, 4 }
 0x12a   :  { %v714_v38 = vsel %vm650_vm1, %v1739_v31, 0.0  ;;  %v931_v37 = vmul.f32 %v1733_v20, %v1733_v20  ;;  %v1008_v60 = vmul.f32 %v1318_v41, %v960_v55  ;;  %v851_v45 = vadd.f32 %v850_v3, %v849_v49 }
 0x12b   :  { %v712_v32 = vrot.slane %v711_v36, 1  ;;  %v856_v2 = vadd.f32 %v855_v26, %v854_v61  ;;  %v715_v50 = vrot.slane %v714_v38, 4  ;;  %v725_v59 = vadd.f32 %v724_v63, %v723_v27  ;;  %v1320_v19 = vpop.eup %1319 }
 0x12c   :  { %v868_v24 = vadd.f32 %v867_v47, %v866_v21  ;;  %v962_v48 = vsub.f32 %v1607_v58, %v1679_v25  ;;  %v961_v46 = vsub.f32 %v1615_v1, %v1681_v53  ;;  %v915_v62 = vmul.f32 0.25, %v851_v45 }
 0x12d   :  { %v713_v29 = vadd.f32 %v712_v32, %v711_v36  ;;  %v857_v28 = vrot.slane %v856_v2, 1  ;;  %v716_v33 = vadd.f32 %v715_v50, %v714_v38  ;;  %v726_v7 = vrot.slane %v725_v59, 1 }
 0x12e   :  { %v869_v34 = vrot.slane %v868_v24, 2  ;;  %v789_v58 = vmul.f32 %v1739_v31, %v1739_v31  ;;  %v1959_v25 = vrot.slane %v1472_v16, %v1461_v12  ;;  %v947_v1 = vsub.f32 %v915_v62, %v931_v37 }
 0x12f   :  { %v1754_v44 = vmul.f32 0.25, %v713_v29  ;;  %v858_v10 = vadd.f32 %v857_v28, %v856_v2  ;;  %v717_v35 = vrot.slane %v716_v33, 2  ;;  %v727_v53 = vadd.f32 %v726_v7, %v725_v59 }
 0x130   :  { %v1108_v39 = vmul.f32 %v1959_v25, %v1008_v60  ;;  %v870_v54 = vadd.f32 %v869_v34, %v868_v24  ;;  %v1010_v61 = vmul.f32 %v1320_v19, %v962_v48  ;;  %v1322_v21 = vpop.eup %1321  ;;  %v979_v55 = vadd.f32 1e-05, %v947_v1 }
 0x131   :  { %v916_v40 = vmul.f32 0.25, %v858_v10  ;;  %v932_v49 = vmul.f32 %v1754_v44, %v1754_v44  ;;  %v718_v27 = vadd.f32 %v717_v35, %v716_v33  ;;  %v1059_v36 = vrot.slane %v1759_v4, %v1448_v8 }
 0x132   :  { %v1770_v26 = vmul.f32 0.25, %v727_v53  ;;  %v871_v41 = vrot.slane %v870_v54, 1  ;;  %v1009_v3 = vmul.f32 %v1322_v21, %v961_v46  ;;  %v859_v38 = vsel %vm650_vm1, %v789_v58, 0.0 }
 0x133   :  { %v948_v63 = vsub.f32 %v916_v40, %v932_v49  ;;  %v719_v47 = vrot.slane %v718_v27, 1  ;;  %v1960_v37 = vrot.slane %v1479_v18, %v1461_v12  ;;  %1323 = vrsqrt.f32 %v979_v55 }
 0x134   :  { %v872_v2 = vadd.f32 %v871_v41, %v870_v54  ;;  %v1067_v50 = vrot.slane %v1759_v4, %v1450_v9  ;;  %v1961_v60 = vrot.slane %v1472_v16, %v1463_v13  ;;  %v1962_v59 = vrot.slane %v1472_v16, %v1465_v14 }
 0x135   :  { %v1208_v32 = vadd.f32 %v1960_v37, %v1108_v39  ;;  %v980_v19 = vadd.f32 1e-05, %v948_v63  ;;  %v860_v48 = vrot.slane %v859_v38, 4  ;;  %v963_v29 = vsub.f32 %v1648_v6, %v1733_v20 }
 0x136   :  { %v1110_v45 = vmul.f32 %v1961_v60, %v1010_v61  ;;  %v1109_v24 = vmul.f32 %v1962_v59, %v1009_v3  ;;  %v720_v28 = vadd.f32 %v719_v47, %v718_v27  ;;  %v1963_v33 = vrot.slane %v1492_v23, %v1459_v11 }
 0x137   :  { %v1964_v62 = vrot.slane %v1492_v23, %v1461_v12  ;;  %v1965_v34 = vrot.slane %v1479_v18, %v1465_v14  ;;  %v934_v6 = vmul.f32 %v1770_v26, %v1770_v26  ;;  %v861_v20 = vadd.f32 %v860_v48, %v859_v38 }
 0x138   :  { %v1790_v46 = vadd.f32 %v1586_v51, %v1963_v33  ;;  %v1966_v35 = vrot.slane %v1492_v23, %v1463_v13  ;;  %v918_v58 = vmul.f32 0.25, %v872_v2  ;;  %v1967_v1 = vrot.slane %v1479_v18, %v1463_v13 }
 0x139   :  { %v1796_v7 = vadd.f32 %v1625_v52, %v1964_v62  ;;  %v1209_v10 = vadd.f32 %v1965_v34, %v1109_v24  ;;  %1325 = vrsqrt.f32 %v980_v19  ;;  %v862_v61 = vrot.slane %v861_v20, 2 }
 0x13a   :  { %v1807_v51 = vadd.f32 %v1628_v5, %v1966_v35  ;;  %v728_v25 = vsel %vm650_vm1, %v1790_v46, 0.0  ;;  %v791_v52 = vmul.f32 %v1790_v46, %v1790_v46  ;;  %v1210_v53 = vadd.f32 %v1967_v1, %v1110_v45 }
 0x13b   :  { %v735_v39 = vsel %vm650_vm1, %v1796_v7, 0.0  ;;  %v1238_v54 = vcombine.low %v1208_v32, %v1209_v10  ;;  %v1818_v40 = vmul.f32 0.25, %v720_v28  ;;  %v729_v5 = vrot.slane %v728_v25, 4 }
 0x13c   :  { %v873_v49 = vsel %vm650_vm1, %v791_v52, 0.0  ;;  %v736_v27 = vrot.slane %v735_v39, 4  ;;  %v863_v21 = vadd.f32 %v862_v61, %v861_v20  ;;  %v792_v41 = vmul.f32 %v1796_v7, %v1796_v7 }
 0x13d   :  { %1254 = vst [vmem:[%s1950_s6 + $0x10] sm:$0xff] %v1238_v54  ;;  %v874_v55 = vrot.slane %v873_v49, 4  ;;  %v749_v3 = vsel %vm650_vm1, %v1807_v51, 0.0  ;;  %v950_v63 = vsub.f32 %v918_v58, %v934_v6  ;;  %v730_v47 = vadd.f32 %v729_v5, %v728_v25  ;;  %v1324_v59 = vpop.eup %1323 }
 0x13e   :  { %v737_v38 = vadd.f32 %v736_v27, %v735_v39  ;;  %v750_v37 = vrot.slane %v749_v3, 4  ;;  %v864_v32 = vrot.slane %v863_v21, 1  ;;  %v880_v60 = vsel %vm650_vm1, %v792_v41, 0.0 }
 0x13f   :  { %v875_v2 = vadd.f32 %v874_v55, %v873_v49  ;;  %v794_v45 = vmul.f32 %v1807_v51, %v1807_v51  ;;  %v731_v24 = vrot.slane %v730_v47, 2  ;;  %v881_v48 = vrot.slane %v880_v60, 4 }
 0x140   :  { %v738_v19 = vrot.slane %v737_v38, 2  ;;  %v751_v28 = vadd.f32 %v750_v37, %v749_v3  ;;  %v1011_v33 = vmul.f32 %v1324_v59, %v963_v29  ;;  %v865_v62 = vadd.f32 %v864_v32, %v863_v21 }
 0x141   :  { %v933_v34 = vmul.f32 %v1818_v40, %v1818_v40  ;;  %v876_v10 = vrot.slane %v875_v2, 2  ;;  %v732_v6 = vadd.f32 %v731_v24, %v730_v47  ;;  %v882_v35 = vadd.f32 %v881_v48, %v880_v60 }
 0x142   :  { %v739_v20 = vadd.f32 %v738_v19, %v737_v38  ;;  %v752_v58 = vrot.slane %v751_v28, 2  ;;  %v1111_v25 = vmul.f32 %v1055_v57, %v1011_v33  ;;  %v917_v52 = vmul.f32 0.25, %v865_v62 }
 0x143   :  { %v877_v39 = vadd.f32 %v876_v10, %v875_v2  ;;  %v894_v1 = vsel %vm650_vm1, %v794_v45, 0.0  ;;  %v982_v54 = vadd.f32 1e-05, %v950_v63  ;;  %v733_v61 = vrot.slane %v732_v6, 1  ;;  %v1326_v49 = vpop.eup %1325  ;;  %v1843_v63 = vld [vmem:[%s1949_s5 + $0x8] sm:$0xff] }
 0x144   :  { %v740_v29 = vrot.slane %v739_v20, 1  ;;  %v883_v5 = vrot.slane %v882_v35, 2  ;;  %v1211_v27 = vadd.f32 %v1155_v43, %v1111_v25  ;;  %v949_v21 = vsub.f32 %v917_v52, %v933_v34 }
 0x145   :  { %v878_v55 = vrot.slane %v877_v39, 1  ;;  %v753_v41 = vadd.f32 %v752_v58, %v751_v28  ;;  %v734_v3 = vadd.f32 %v733_v61, %v732_v6  ;;  %v895_v57 = vrot.slane %v894_v1, 4 }
 0x146   :  { %v741_v47 = vadd.f32 %v740_v29, %v739_v20  ;;  %v884_v16 = vadd.f32 %v883_v5, %v882_v35  ;;  %v1239_v38 = vcombine.low %v1210_v53, %v1211_v27  ;;  %v981_v37 = vadd.f32 1e-05, %v949_v21 }
 0x147   :  { %v879_v32 = vadd.f32 %v878_v55, %v877_v39  ;;  %v754_v2 = vrot.slane %v753_v41, 1  ;;  %1327 = vrsqrt.f32 %v982_v54  ;;  %v1845_v60 = vmul.f32 0.25, %v734_v3 }
 0x148   :  { %v885_v18 = vrot.slane %v884_v16, 1  ;;  %v141_v43 = vrot.slane %v1492_v23, %v1467_v15  ;;  %1255 = vst [vmem:[%s1950_s6 + $0x18] sm:$0xff] %v1239_v38  ;;  %1329 = vrsqrt.f32 %v981_v37  ;;  %v1852_v45 = vmul.f32 0.25, %v741_v47 }
 0x149   :  { %v919_v53 = vmul.f32 0.25, %v879_v32  ;;  %v755_v59 = vadd.f32 %v754_v2, %v753_v41  ;;  %v1159_v24 = vrot.slane %v1843_v63, %v1448_v8  ;;  %v1167_v19 = vrot.slane %v1843_v63, %v1450_v9 }
 0x14a   :  { %v935_v48 = vmul.f32 %v1845_v60, %v1845_v60  ;;  %v886_v28 = vadd.f32 %v885_v18, %v884_v16  ;;  %v964_v33 = vsub.f32 %v1706_v30, %v1754_v44  ;;  %v1063_v62 = vrot.slane %v1759_v4, %v1457_v0 }
 0x14b   :  { %v1163_v34 = vrot.slane %v1843_v63, %v1457_v0  ;;  %v896_v10 = vadd.f32 %v895_v57, %v894_v1  ;;  %v966_v6 = vsub.f32 %v1712_v17, %v1770_v26  ;;  %v1872_v35 = vadd.f32 %v1630_v42, %v133_v22 }
 0x14c   :  { %v951_v20 = vsub.f32 %v919_v53, %v935_v48  ;;  %v1875_v58 = vadd.f32 %v1636_v56, %v141_v43  ;;  %v1012_v30 = vmul.f32 %v1326_v49, %v964_v33  ;;  %v936_v44 = vmul.f32 %v1852_v45, %v1852_v45 }
 0x14d   :  { %v1879_v25 = vmul.f32 0.25, %v755_v59  ;;  %v897_v0 = vrot.slane %v896_v10, 2  ;;  %v920_v39 = vmul.f32 0.25, %v886_v28  ;;  %v742_v17 = vsel %vm650_vm1, %v1872_v35, 0.0 }
 0x14e   :  { %v983_v52 = vadd.f32 1e-05, %v951_v20  ;;  %v793_v23 = vmul.f32 %v1872_v35, %v1872_v35  ;;  %v743_v22 = vrot.slane %v742_v17, 4  ;;  %v756_v56 = vsel %vm650_vm1, %v1875_v58, 0.0 }
 0x14f   :  { %v898_v42 = vadd.f32 %v897_v0, %v896_v10  ;;  %v795_v26 = vmul.f32 %v1875_v58, %v1875_v58  ;;  %v965_v1 = vsub.f32 %v1739_v31, %v1818_v40  ;;  %v757_v61 = vrot.slane %v756_v56, 4 }
 0x150   :  { %1331 = vrsqrt.f32 %v983_v52  ;;  %v887_v54 = vsel %vm650_vm1, %v793_v23, 0.0  ;;  %v744_v5 = vadd.f32 %v743_v22, %v742_v17  ;;  %v1112_v55 = vmul.f32 %v1059_v36, %v1012_v30 }
 0x151   :  { %v899_v29 = vrot.slane %v898_v42, 1  ;;  %v888_v49 = vrot.slane %v887_v54, 4  ;;  %v901_v27 = vsel %vm650_vm1, %v795_v26, 0.0  ;;  %v1328_v21 = vpop.eup %1327  ;;  %v938_v41 = vmul.f32 %v1879_v25, %v1879_v25 }
 0x152   :  { %v758_v3 = vadd.f32 %v757_v61, %v756_v56  ;;  %v902_v47 = vrot.slane %v901_v27, 4  ;;  %v1330_v31 = vpop.eup %1329  ;;  %v952_v40 = vsub.f32 %v920_v39, %v936_v44  ;;  %v745_v57 = vrot.slane %v744_v5, 2 }
 0x153   :  { %v900_v16 = vadd.f32 %v899_v29, %v898_v42  ;;  %v889_v38 = vadd.f32 %v888_v49, %v887_v54  ;;  %v1013_v37 = vmul.f32 %v1330_v31, %v965_v1  ;;  %v1071_v32 = vrot.slane %v1759_v4, %v1459_v11 }
 0x154   :  { %v759_v2 = vrot.slane %v758_v3, 2  ;;  %v903_v18 = vadd.f32 %v902_v47, %v901_v27  ;;  %v1014_v43 = vmul.f32 %v1328_v21, %v966_v6  ;;  %v746_v8 = vadd.f32 %v745_v57, %v744_v5 }
 0x155   :  { %v922_v53 = vmul.f32 0.25, %v900_v16  ;;  %v890_v36 = vrot.slane %v889_v38, 2  ;;  %v1212_v59 = vadd.f32 %v1159_v24, %v1112_v55  ;;  %v1113_v48 = vmul.f32 %v1063_v62, %v1013_v37 }
 0x156   :  { %v760_v28 = vadd.f32 %v759_v2, %v758_v3  ;;  %v904_v33 = vrot.slane %v903_v18, 2  ;;  %v984_v10 = vadd.f32 1e-05, %v952_v40  ;;  %v747_v30 = vrot.slane %v746_v8, 1 }
 0x157   :  { %v954_v20 = vsub.f32 %v922_v53, %v938_v41  ;;  %v891_v44 = vadd.f32 %v890_v36, %v889_v38  ;;  %v1213_v0 = vadd.f32 %v1163_v34, %v1113_v48  ;;  %v967_v52 = vsub.f32 %v1790_v46, %v1845_v60 }
 0x158   :  { %v761_v39 = vrot.slane %v760_v28, 1  ;;  %v905_v17 = vadd.f32 %v904_v33, %v903_v18  ;;  %v1114_v6 = vmul.f32 %v1067_v50, %v1014_v43  ;;  %v748_v42 = vadd.f32 %v747_v30, %v746_v8 }
 0x159   :  { %v986_v23 = vadd.f32 1e-05, %v954_v20  ;;  %v892_v24 = vrot.slane %v891_v44, 1  ;;  %v1240_v22 = vcombine.low %v1212_v59, %v1213_v0  ;;  %v1171_v56 = vrot.slane %v1843_v63, %v1459_v11 }
 0x15a   :  { %v1332_v62 = vpop.eup %1331  ;;  %v762_v26 = vadd.f32 %v761_v39, %v760_v28  ;;  %v906_v1 = vrot.slane %v905_v17, 1  ;;  %1333 = vrsqrt.f32 %v984_v10  ;;  %v777_v54 = vmul.f32 0.25, %v748_v42 }
 0x15b   :  { %v1015_v34 = vmul.f32 %v1332_v62, %v967_v52  ;;  %v893_v46 = vadd.f32 %v892_v24, %v891_v44  ;;  %1256 = vst [vmem:[%s1950_s6 + $0x20] sm:$0xff] %v1240_v22  ;;  %1335 = vrsqrt.f32 %v986_v23  ;;  %v1214_v61 = vadd.f32 %v1167_v19, %v1114_v6 }
 0x15c   :  { %v779_v50 = vmul.f32 0.25, %v762_v26  ;;  %v907_v60 = vadd.f32 %v906_v1, %v905_v17  ;;  %v937_v11 = vmul.f32 %v777_v54, %v777_v54  ;;  %v968_v19 = vsub.f32 %v1796_v7, %v1852_v45 }
 0x15d   :  { %v1115_v29 = vmul.f32 %v1071_v32, %v1015_v34  ;;  %v921_v5 = vmul.f32 0.25, %v893_v46  ;;  %v970_v16 = vsub.f32 %v1807_v51, %v1879_v25  ;;  %v1075_v38 = vrot.slane %v1759_v4, %v1461_v12 }
 0x15e   :  { %v923_v49 = vmul.f32 0.25, %v907_v60  ;;  %v939_v27 = vmul.f32 %v779_v50, %v779_v50  ;;  %v1083_v32 = vrot.slane %v1759_v4, %v1463_v13  ;;  %v1175_v18 = vrot.slane %v1843_v63, %v1461_v12 }
 0x15f   :  { %v1215_v21 = vadd.f32 %v1171_v56, %v1115_v29  ;;  %v953_v55 = vsub.f32 %v921_v5, %v937_v11  ;;  %v969_v43 = vsub.f32 %v1872_v35, %v777_v54  ;;  %v1079_v7 = vrot.slane %v1759_v4, %v1465_v14 }
 0x160   :  { %v955_v41 = vsub.f32 %v923_v49, %v939_v27  ;;  %v1183_v51 = vrot.slane %v1843_v63, %v1463_v13  ;;  %v971_v25 = vsub.f32 %v1875_v58, %v779_v50  ;;  %v1087_v8 = vrot.slane %v1759_v4, %v1467_v15 }
 0x161   :  { %v1241_v3 = vcombine.low %v1214_v61, %v1215_v21  ;;  %v985_v47 = vadd.f32 1e-05, %v953_v55  ;;  %v1179_v12 = vrot.slane %v1843_v63, %v1465_v14  ;;  %v1187_v35 = vrot.slane %v1843_v63, %v1467_v15 }
 0x162   :  { %v987_v31 = vadd.f32 1e-05, %v955_v41 }
 0x163   :  { %1257 = vst [vmem:[%s1950_s6 + $0x28] sm:$0xff] %v1241_v3  ;;  %1337 = vrsqrt.f32 %v985_v47 }
 0x164   :  { %1339 = vrsqrt.f32 %v987_v31  ;;  %v1334_v40 = vpop.eup %1333 }
 0x165   :  { %v1336_v9 = vpop.eup %1335  ;;  %v1016_v57 = vmul.f32 %v1334_v40, %v968_v19 }
 0x166   :  { %v1018_v37 = vmul.f32 %v1336_v9, %v970_v16 }
 0x167   :  { %v1116_v2 = vmul.f32 %v1075_v38, %v1016_v57 }
 0x168   :  { %v1118_v53 = vmul.f32 %v1083_v32, %v1018_v37 }
 0x169   :  { %v1216_v28 = vadd.f32 %v1175_v18, %v1116_v2 }
 0x16a   :  { %v1218_v10 = vadd.f32 %v1183_v51, %v1118_v53 }
 0x16d   :  { %v1338_v45 = vpop.eup %1337 }
 0x16e   :  { %v1340_v36 = vpop.eup %1339  ;;  %v1017_v59 = vmul.f32 %v1338_v45, %v969_v43 }
 0x16f   :  { %v1019_v48 = vmul.f32 %v1340_v36, %v971_v25 }
 0x170   :  { %v1117_v33 = vmul.f32 %v1079_v7, %v1017_v59 }
 0x171   :  { %v1119_v20 = vmul.f32 %v1087_v8, %v1019_v48 }
 0x172   :  { %v1217_v30 = vadd.f32 %v1179_v12, %v1117_v33 }
 0x173   :  { %v1219_v13 = vadd.f32 %v1187_v35, %v1119_v20 }
 0x174   :  { %v1242_v44 = vcombine.low %v1216_v28, %v1217_v30 }
 0x175   :  { %v1243_v58 = vcombine.low %v1218_v10, %v1219_v13 }
 0x176   :  { %1258 = vst [vmem:[%s1950_s6 + $0x30] sm:$0xff] %v1242_v44 }
 0x177   :  { %1259 = vst [vmem:[%s1950_s6 + $0x38] sm:$0xff] %v1243_v58 }
 0x178   :  { %1264 = vsyncpa [#allocation3], 1 }

// kernel: generator_forward.4
= control target key start
LH: loop header
LB: loop body
LE: loop exit
PB: predicated region body
PF: predicated region fallthrough
CT: control target
= control target key end

     0   :  { %10 = vsyncpa [#allocation3], 0  ;;  %s2583_s18 = smov [#allocation2]   ;;  %s3018_s0 = inlined_call_operand.vmem [shape: f32[4,6,6,128], index: 0, kind: input, shape index: {}]   ;;  %s3019_s1 = inlined_call_operand.hbm [shape: bf16[1152,256], index: 1, kind: input, shape index: {}]   ;;  %s3020_s2 = inlined_call_operand.vmem [shape: f32[1,256], index: 2, kind: input, shape index: {}]   ;;  %s3021_s3 = inlined_call_operand.vmem [shape: f32[1,64], index: 3, kind: input, shape index: {}]   ;;  %s3022_s4 = inlined_call_operand.vmem [shape: f32[1,64], index: 4, kind: input, shape index: {}]   ;;  %s3023_s5 = inlined_call_operand.vmem [shape: f32[64,256], index: 5, kind: output, shape index: {}]  }
   0x1   :  { %s18_s19 = sshll.u32 %s2583_s18, 4  ;;  %s2559_s22 = scalar_lea.hbm %s3019_s1, 18432  ;;  %s19_s19 = int_to_ptr.vmem [resolvable:$true] %s18_s19 }
   0x2   :  { %p2560_p0 = scmp.ne.s32.totalorder %s3019_s1, %s2559_s22  ;;  %p2563_p1 = scmp.lt.u32.totalorder %s2559_s22, %s3019_s1 }
   0x4   :  { %p2565_p2 = pnand %p2563_p1, %p2560_p0 }
   0x6   :  { %2568 = shalt.err (!%p2565_p2)
}
   0x7   :  { %s2569_s27 = scalar_lea.vmem %s19_s19, 18432  ;;  %p2574_p4 = scmp.lt.s32.totalorder %s19_s19, %s19_s19 }
   0x8   :  { %p2570_p3 = scmp.ne.s32.totalorder %s19_s19, %s2569_s27  ;;  %p2575_p5 = scmp.lt.s32.totalorder %s2569_s27, %s2569_s27 }
   0xa   :  { %p2576_p6 = por %p2575_p5, %p2574_p4 }
   0xc   :  { %p2577_p7 = pnand %p2576_p6, %p2570_p3 }
   0xe   :  { %2580 = shalt.err (!%p2577_p7)
}
   0xf   :  { %s2584_s28 = smov 128   ;;  %s2585_s29 = smov 8  }
  0x10   :  { %24 = dma.hbm_to_vmem [thread:$0]  %s3019_s1, 18432, %s19_s19, [#allocation3], %s2584_s28, %s2584_s28, %s2585_s29  }
  0x11   :  { %2581 = dma.done.wait [#allocation3], 18432  }
  0x12   :  { %2582 = vsyncadd [#allocation3], 4294948864  ;;  %v2269_v0 = vld [vmem:[#allocation2 + $0x4] ss:$8 sps:$4 sm:$0xff]   ;;  %v2273_v2 = vld [vmem:[#allocation2] ss:$8 sps:$4 sm:$0xff]  }
  0x13   :  { %v2271_v1 = vld [vmem:[#allocation2 + $0x204] ss:$8 sps:$4 sm:$0xff]   ;;  %1381 = vmatprep.subr.bf16.mxu1 %v2269_v0  ;;  %v2274_v3 = vld [vmem:[#allocation2 + $0x200] ss:$8 sps:$4 sm:$0xff]   ;;  %v2275_v4 = vld [vmem:[#allocation2 + $0x14] ss:$8 sps:$4 sm:$0xff]  }
  0x14   :  { %1527 = vmatprep.subr.bf16.mxu0 %v2271_v1  ;;  %1382 = vmatpush1.bf16.msra.mxu1 %v2273_v2  ;;  %v2277_v5 = vld [vmem:[#allocation2 + $0x214] ss:$8 sps:$4 sm:$0xff]   ;;  %v2279_v6 = vld [vmem:[#allocation2 + $0x10] ss:$8 sps:$4 sm:$0xff]   ;;  %v2281_v8 = vld [vmem:[#allocation2 + $0x24] ss:$8 sps:$4 sm:$0xff]  }
  0x15   :  { %1528 = vmatpush1.bf16.msra.mxu0 %v2274_v3  ;;  %1383 = vmatprep.subr.bf16.mxu1 %v2275_v4  ;;  %v2280_v7 = vld [vmem:[#allocation2 + $0x210] ss:$8 sps:$4 sm:$0xff]   ;;  %v2283_v9 = vld [vmem:[#allocation2 + $0x224] ss:$8 sps:$4 sm:$0xff]   ;;  %v2285_v10 = vld [vmem:[#allocation2 + $0x20] ss:$8 sps:$4 sm:$0xff]  }
  0x16   :  { %1529 = vmatprep.subr.bf16.mxu0 %v2277_v5  ;;  %v2286_v11 = vld [vmem:[#allocation2 + $0x220] ss:$8 sps:$4 sm:$0xff]   ;;  %v2287_v12 = vld [vmem:[#allocation2 + $0x34] ss:$8 sps:$4 sm:$0xff]   ;;  %v2291_v14 = vld [vmem:[#allocation2 + $0x30] ss:$8 sps:$4 sm:$0xff]  }
  0x17   :  { %v2289_v13 = vld [vmem:[#allocation2 + $0x234] ss:$8 sps:$4 sm:$0xff]   ;;  %v2292_v15 = vld [vmem:[#allocation2 + $0x230] ss:$8 sps:$4 sm:$0xff]   ;;  %v2293_v16 = vld [vmem:[#allocation2 + $0x44] ss:$8 sps:$4 sm:$0xff]  }
  0x18   :  { %1384 = vmatpush1.bf16.msra.mxu1 %v2279_v6  ;;  %v2295_v17 = vld [vmem:[#allocation2 + $0x244] ss:$8 sps:$4 sm:$0xff]   ;;  %v2297_v18 = vld [vmem:[#allocation2 + $0x40] ss:$8 sps:$4 sm:$0xff]   ;;  %v2299_v20 = vld [vmem:[#allocation2 + $0x54] ss:$8 sps:$4 sm:$0xff]  }
  0x19   :  { %1530 = vmatpush1.bf16.msra.mxu0 %v2280_v7  ;;  %1385 = vmatprep.subr.bf16.mxu1 %v2281_v8  ;;  %v2298_v19 = vld [vmem:[#allocation2 + $0x240] ss:$8 sps:$4 sm:$0xff]   ;;  %v2301_v21 = vld [vmem:[#allocation2 + $0x254] ss:$8 sps:$4 sm:$0xff]   ;;  %v2303_v22 = vld [vmem:[#allocation2 + $0x50] ss:$8 sps:$4 sm:$0xff]  }
  0x1a   :  { %1531 = vmatprep.subr.bf16.mxu0 %v2283_v9  ;;  %v2304_v23 = vld [vmem:[#allocation2 + $0x250] ss:$8 sps:$4 sm:$0xff]   ;;  %v2305_v24 = vld [vmem:[#allocation2 + $0x64] ss:$8 sps:$4 sm:$0xff]   ;;  %v2309_v26 = vld [vmem:[#allocation2 + $0x60] ss:$8 sps:$4 sm:$0xff]  }
  0x1b   :  { %v2307_v25 = vld [vmem:[#allocation2 + $0x264] ss:$8 sps:$4 sm:$0xff]   ;;  %v2310_v27 = vld [vmem:[#allocation2 + $0x260] ss:$8 sps:$4 sm:$0xff]   ;;  %v2311_v28 = vld [vmem:[#allocation2 + $0x74] ss:$8 sps:$4 sm:$0xff]  }
  0x1c   :  { %1386 = vmatpush1.bf16.msra.mxu1 %v2285_v10  ;;  %v2313_v29 = vld [vmem:[#allocation2 + $0x274] ss:$8 sps:$4 sm:$0xff]   ;;  %v2315_v30 = vld [vmem:[#allocation2 + $0x70] ss:$8 sps:$4 sm:$0xff]   ;;  %v2317_v32 = vld [vmem:[#allocation2 + $0x84] ss:$8 sps:$4 sm:$0xff]  }
  0x1d   :  { %1532 = vmatpush1.bf16.msra.mxu0 %v2286_v11  ;;  %1387 = vmatprep.subr.bf16.mxu1 %v2287_v12  ;;  %v2316_v31 = vld [vmem:[#allocation2 + $0x270] ss:$8 sps:$4 sm:$0xff]   ;;  %v2319_v33 = vld [vmem:[#allocation2 + $0x284] ss:$8 sps:$4 sm:$0xff]   ;;  %v2321_v34 = vld [vmem:[#allocation2 + $0x80] ss:$8 sps:$4 sm:$0xff]  }
  0x1e   :  { %1533 = vmatprep.subr.bf16.mxu0 %v2289_v13  ;;  %v2322_v35 = vld [vmem:[#allocation2 + $0x280] ss:$8 sps:$4 sm:$0xff]   ;;  %v2323_v36 = vld [vmem:[#allocation2 + $0x94] ss:$8 sps:$4 sm:$0xff]   ;;  %v2327_v38 = vld [vmem:[#allocation2 + $0x90] ss:$8 sps:$4 sm:$0xff]  }
  0x1f   :  { %v2325_v37 = vld [vmem:[#allocation2 + $0x294] ss:$8 sps:$4 sm:$0xff]   ;;  %v2328_v39 = vld [vmem:[#allocation2 + $0x290] ss:$8 sps:$4 sm:$0xff]   ;;  %v2329_v40 = vld [vmem:[#allocation2 + $0xa4] ss:$8 sps:$4 sm:$0xff]  }
  0x20   :  { %1388 = vmatpush1.bf16.msra.mxu1 %v2291_v14  ;;  %v2331_v41 = vld [vmem:[#allocation2 + $0x2a4] ss:$8 sps:$4 sm:$0xff]   ;;  %v2333_v42 = vld [vmem:[#allocation2 + $0xa0] ss:$8 sps:$4 sm:$0xff]   ;;  %v2335_v44 = vld [vmem:[#allocation2 + $0xb4] ss:$8 sps:$4 sm:$0xff]  }
  0x21   :  { %1534 = vmatpush1.bf16.msra.mxu0 %v2292_v15  ;;  %1389 = vmatprep.subr.bf16.mxu1 %v2293_v16  ;;  %v2334_v43 = vld [vmem:[#allocation2 + $0x2a0] ss:$8 sps:$4 sm:$0xff]   ;;  %v2337_v45 = vld [vmem:[#allocation2 + $0x2b4] ss:$8 sps:$4 sm:$0xff]   ;;  %v2339_v46 = vld [vmem:[#allocation2 + $0xb0] ss:$8 sps:$4 sm:$0xff]  }
  0x22   :  { %1535 = vmatprep.subr.bf16.mxu0 %v2295_v17  ;;  %v2340_v47 = vld [vmem:[#allocation2 + $0x2b0] ss:$8 sps:$4 sm:$0xff]   ;;  %v2365_v48 = vld [vmem:[%s3018_s0 + $0x1] ss:$8 sps:$4 sm:$0xff]   ;;  %v2347_v57 = vld [vmem:[#allocation2 + $0xd4] ss:$8 sps:$4 sm:$0xff]  }
  0x23   :  { %v2366_v49 = vld [vmem:[%s3018_s0 + $0x11] ss:$8 sps:$4 sm:$0xff]   ;;  %v2341_v50 = vld [vmem:[#allocation2 + $0xc4] ss:$8 sps:$4 sm:$0xff]   ;;  %v2345_v52 = vld [vmem:[#allocation2 + $0xc0] ss:$8 sps:$4 sm:$0xff]  }
  0x24   :  { %1390 = vmatpush1.bf16.msra.mxu1 %v2297_v18  ;;  %v2343_v51 = vld [vmem:[#allocation2 + $0x2c4] ss:$8 sps:$4 sm:$0xff]   ;;  %v2346_v53 = vld [vmem:[#allocation2 + $0x2c0] ss:$8 sps:$4 sm:$0xff]   ;;  %v470_v54 = vpack.c.bf16 %v2366_v49, %v2365_v48  ;;  %v2349_v58 = vld [vmem:[#allocation2 + $0x2d4] ss:$8 sps:$4 sm:$0xff]  }
  0x25   :  { %1536 = vmatpush1.bf16.msra.mxu0 %v2298_v19  ;;  %1391 = vmatprep.subr.bf16.mxu1 %v2299_v20  ;;  %v2370_v55 = vld [vmem:[%s3018_s0 + $0xa] ss:$8 sps:$4 sm:$0xff]   ;;  %v2371_v56 = vld [vmem:[%s3018_s0 + $0x1a] ss:$8 sps:$4 sm:$0xff]   ;;  %vm1856_vm0 = vcmask 523264  }
  0x26   :  { %1537 = vmatprep.subr.bf16.mxu0 %v2301_v21  ;;  %v474_v59 = vpack.c.bf16 %v2371_v56, %v2370_v55  ;;  %v2351_v60 = vld [vmem:[#allocation2 + $0xd0] ss:$8 sps:$4 sm:$0xff]   ;;  %1413 = vmatprep.mubr.bf16.mxu1 %v470_v54  ;;  %v2353_v62 = vld [vmem:[#allocation2 + $0xe4] ss:$8 sps:$4 sm:$0xff]   ;;  %v2357_v0 = vld [vmem:[#allocation2 + $0xe0] ss:$8 sps:$4 sm:$0xff]  }
  0x27   :  { %v2352_v61 = vld [vmem:[#allocation2 + $0x2d0] ss:$8 sps:$4 sm:$0xff]   ;;  %v2355_v63 = vld [vmem:[#allocation2 + $0x2e4] ss:$8 sps:$4 sm:$0xff]   ;;  %v2358_v1 = vld [vmem:[#allocation2 + $0x2e0] ss:$8 sps:$4 sm:$0xff]  }
  0x28   :  { %1392 = vmatpush1.bf16.msra.mxu1 %v2303_v22  ;;  %1559 = vmatprep.mubr.bf16.mxu0 %v474_v59  ;;  %v2359_v2 = vld [vmem:[#allocation2 + $0xf4] ss:$8 sps:$4 sm:$0xff]   ;;  %v2363_v4 = vld [vmem:[#allocation2 + $0xf0] ss:$8 sps:$4 sm:$0xff]   ;;  %v2375_v6 = vld [vmem:[%s3018_s0] ss:$8 sps:$4 sm:$0xff]  }
  0x29   :  { %1538 = vmatpush1.bf16.msra.mxu0 %v2304_v23  ;;  %1393 = vmatprep.subr.bf16.mxu1 %v2305_v24  ;;  %v2361_v3 = vld [vmem:[#allocation2 + $0x2f4] ss:$8 sps:$4 sm:$0xff]   ;;  %v2364_v5 = vld [vmem:[#allocation2 + $0x2f0] ss:$8 sps:$4 sm:$0xff]   ;;  %v2369_v10 = vld [vmem:[#allocation2 + $0x104] ss:$8 sps:$4 sm:$0xff]  }
  0x2a   :  { %1539 = vmatprep.subr.bf16.mxu0 %v2307_v25  ;;  %v2376_v7 = vld [vmem:[%s3018_s0 + $0x10] ss:$8 sps:$4 sm:$0xff]   ;;  %v2374_v11 = vld [vmem:[#allocation2 + $0x304] ss:$8 sps:$4 sm:$0xff]   ;;  %v2367_v12 = vld [vmem:[#allocation2 + $0x100] ss:$8 sps:$4 sm:$0xff]  }
  0x2b   :  { %v2377_v8 = vld [vmem:[%s3018_s0 + $0x9] ss:$8 sps:$4 sm:$0xff]   ;;  %v2378_v9 = vld [vmem:[%s3018_s0 + $0x19] ss:$8 sps:$4 sm:$0xff]   ;;  %v469_v14 = vpack.c.bf16 %v2376_v7, %v2375_v6 }
  0x2c   :  { %1394 = vmatpush1.bf16.msra.mxu1 %v2309_v26  ;;  %v2372_v13 = vld [vmem:[#allocation2 + $0x300] ss:$8 sps:$4 sm:$0xff]   ;;  %v473_v15 = vpack.c.bf16 %v2378_v9, %v2377_v8  ;;  %v2381_v16 = vld [vmem:[#allocation2 + $0x114] ss:$8 sps:$4 sm:$0xff]   ;;  %v2379_v18 = vld [vmem:[#allocation2 + $0x110] ss:$8 sps:$4 sm:$0xff]  }
  0x2d   :  { %1540 = vmatpush1.bf16.msra.mxu0 %v2310_v27  ;;  %1395 = vmatprep.subr.bf16.mxu1 %v2311_v28  ;;  %v2384_v17 = vld [vmem:[#allocation2 + $0x314] ss:$8 sps:$4 sm:$0xff]   ;;  %v2382_v19 = vld [vmem:[#allocation2 + $0x310] ss:$8 sps:$4 sm:$0xff]   ;;  %v2387_v20 = vld [vmem:[#allocation2 + $0x124] ss:$8 sps:$4 sm:$0xff]  }
  0x2e   :  { %1541 = vmatprep.subr.bf16.mxu0 %v2313_v29  ;;  %v2390_v21 = vld [vmem:[#allocation2 + $0x324] ss:$8 sps:$4 sm:$0xff]   ;;  %v2385_v22 = vld [vmem:[#allocation2 + $0x120] ss:$8 sps:$4 sm:$0xff]   ;;  %v2393_v24 = vld [vmem:[#allocation2 + $0x134] ss:$8 sps:$4 sm:$0xff]  }
  0x2f   :  { %v2388_v23 = vld [vmem:[#allocation2 + $0x320] ss:$8 sps:$4 sm:$0xff]   ;;  %v2396_v25 = vld [vmem:[#allocation2 + $0x334] ss:$8 sps:$4 sm:$0xff]   ;;  %v2391_v26 = vld [vmem:[#allocation2 + $0x130] ss:$8 sps:$4 sm:$0xff]  }
  0x30   :  { %1396 = vmatpush1.bf16.msra.mxu1 %v2315_v30  ;;  %v2394_v27 = vld [vmem:[#allocation2 + $0x330] ss:$8 sps:$4 sm:$0xff]   ;;  %v2399_v28 = vld [vmem:[#allocation2 + $0x144] ss:$8 sps:$4 sm:$0xff]   ;;  %v2397_v30 = vld [vmem:[#allocation2 + $0x140] ss:$8 sps:$4 sm:$0xff]  }
  0x31   :  { %1542 = vmatpush1.bf16.msra.mxu0 %v2316_v31  ;;  %1397 = vmatprep.subr.bf16.mxu1 %v2317_v32  ;;  %v2402_v29 = vld [vmem:[#allocation2 + $0x344] ss:$8 sps:$4 sm:$0xff]   ;;  %v2400_v31 = vld [vmem:[#allocation2 + $0x340] ss:$8 sps:$4 sm:$0xff]   ;;  %v2433_v32 = vld [vmem:[%s3018_s0 + $0x31] ss:$8 sps:$4 sm:$0xff]  }
  0x32   :  { %1543 = vmatprep.subr.bf16.mxu0 %v2319_v33  ;;  %v2405_v33 = vld [vmem:[#allocation2 + $0x154] ss:$8 sps:$4 sm:$0xff]   ;;  %v2409_v49 = vld [vmem:[#allocation2 + $0x160] ss:$8 sps:$4 sm:$0xff]   ;;  %v2415_v54 = vld [vmem:[#allocation2 + $0x170] ss:$8 sps:$4 sm:$0xff]  }
  0x33   :  { %v2443_v48 = vld [vmem:[%s3018_s0 + $0x49] ss:$8 sps:$4 sm:$0xff]  }
  0x34   :  { %1398 = vmatpush1.bf16.msra.mxu1 %v2321_v34  ;;  %v2408_v34 = vld [vmem:[#allocation2 + $0x354] ss:$8 sps:$4 sm:$0xff]   ;;  %v2418_v55 = vld [vmem:[#allocation2 + $0x370] ss:$8 sps:$4 sm:$0xff]   ;;  %v2423_v56 = vld [vmem:[#allocation2 + $0x184] ss:$8 sps:$4 sm:$0xff]  }
  0x35   :  { %1544 = vmatpush1.bf16.msra.mxu0 %v2322_v35  ;;  %1399 = vmatprep.subr.bf16.mxu1 %v2323_v36  ;;  %v2434_v35 = vld [vmem:[%s3018_s0 + $0x41] ss:$8 sps:$4 sm:$0xff]   ;;  %v2454_v59 = vld [vmem:[%s3018_s0 + $0x71] ss:$8 sps:$4 sm:$0xff]  }
  0x36   :  { %1545 = vmatprep.subr.bf16.mxu0 %v2325_v37  ;;  %v2435_v36 = vld [vmem:[%s3018_s0 + $0x3a] ss:$8 sps:$4 sm:$0xff]   ;;  %v479_v37 = vpack.c.bf16 %v2434_v35, %v2433_v32  ;;  %v2462_v9 = vld [vmem:[%s3018_s0 + $0x69] ss:$8 sps:$4 sm:$0xff]  }
  0x37   :  { %v2427_v6 = vld [vmem:[#allocation2 + $0x190] ss:$8 sps:$4 sm:$0xff]   ;;  %v2469_v32 = vld [vmem:[#allocation2 + $0x1d4] ss:$8 sps:$4 sm:$0xff]  }
  0x38   :  { %1400 = vmatpush1.bf16.msra.mxu1 %v2327_v38  ;;  %v2436_v38 = vld [vmem:[%s3018_s0 + $0x4a] ss:$8 sps:$4 sm:$0xff]   ;;  %v2482_v35 = vld [vmem:[%s3018_s0 + $0x99] ss:$8 sps:$4 sm:$0xff]  }
  0x39   :  { %1546 = vmatpush1.bf16.msra.mxu0 %v2328_v39  ;;  %1401 = vmatprep.subr.bf16.mxu1 %v2329_v40  ;;  %v2403_v39 = vld [vmem:[#allocation2 + $0x150] ss:$8 sps:$4 sm:$0xff]  }
  0x3a   :  { %1547 = vmatprep.subr.bf16.mxu0 %v2331_v41  ;;  %v2406_v40 = vld [vmem:[#allocation2 + $0x350] ss:$8 sps:$4 sm:$0xff]  }
  0x3b   :  { %v2437_v41 = vld [vmem:[%s3018_s0 + $0x30] ss:$8 sps:$4 sm:$0xff]  }
  0x3c   :  { %1402 = vmatpush1.bf16.msra.mxu1 %v2333_v42  ;;  %v483_v42 = vpack.c.bf16 %v2436_v38, %v2435_v36  ;;  %v2430_v7 = vld [vmem:[#allocation2 + $0x390] ss:$8 sps:$4 sm:$0xff]  }
  0x3d   :  { %1548 = vmatpush1.bf16.msra.mxu0 %v2334_v43  ;;  %1403 = vmatprep.subr.bf16.mxu1 %v2335_v44  ;;  %v2438_v43 = vld [vmem:[%s3018_s0 + $0x40] ss:$8 sps:$4 sm:$0xff]   ;;  %v2411_v44 = vld [vmem:[#allocation2 + $0x164] ss:$8 sps:$4 sm:$0xff]   ;;  %v2470_v38 = vld [vmem:[#allocation2 + $0x3d0] ss:$8 sps:$4 sm:$0xff]  }
  0x3e   :  { %1549 = vmatprep.subr.bf16.mxu0 %v2337_v45  ;;  %v2414_v45 = vld [vmem:[#allocation2 + $0x364] ss:$8 sps:$4 sm:$0xff]  }
  0x3f   :  { %v2483_v36 = vld [vmem:[%s3018_s0 + $0xa9] ss:$8 sps:$4 sm:$0xff]  }
  0x40   :  { %1404 = vmatpush1.bf16.msra.mxu1 %v2339_v46  ;;  %v478_v46 = vpack.c.bf16 %v2438_v43, %v2437_v41  ;;  %v2486_v41 = vld [vmem:[#allocation2 + $0x3e4] ss:$8 sps:$4 sm:$0xff]   ;;  %v2484_v43 = vld [vmem:[#allocation2 + $0x3e0] ss:$8 sps:$4 sm:$0xff]  }
  0x41   :  { %1550 = vmatpush1.bf16.msra.mxu0 %v2340_v47  ;;  %1405 = vmatprep.subr.bf16.mxu1 %v2341_v50  ;;  %v2442_v47 = vld [vmem:[%s3018_s0 + $0x39] ss:$8 sps:$4 sm:$0xff]  }
  0x42   :  { %1551 = vmatprep.subr.bf16.mxu0 %v2343_v51  ;;  %v2412_v50 = vld [vmem:[#allocation2 + $0x360] ss:$8 sps:$4 sm:$0xff]   ;;  %v2417_v51 = vld [vmem:[#allocation2 + $0x174] ss:$8 sps:$4 sm:$0xff]  }
  0x44   :  { %1406 = vmatpush1.bf16.msra.mxu1 %v2345_v52  ;;  %v482_v52 = vpack.c.bf16 %v2443_v48, %v2442_v47  ;;  %v2494_v47 = vld [vmem:[%s3018_s0 + $0x18] ss:$8 sps:$4 sm:$0xff]  }
  0x45   :  { %1552 = vmatpush1.bf16.msra.mxu0 %v2346_v53  ;;  %1407 = vmatprep.subr.bf16.mxu1 %v2347_v57  ;;  %v2420_v53 = vld [vmem:[#allocation2 + $0x374] ss:$8 sps:$4 sm:$0xff]   ;;  %v2426_v57 = vld [vmem:[#allocation2 + $0x384] ss:$8 sps:$4 sm:$0xff]  }
  0x46   :  { %1553 = vmatprep.subr.bf16.mxu0 %v2349_v58  ;;  %v2453_v58 = vld [vmem:[%s3018_s0 + $0x61] ss:$8 sps:$4 sm:$0xff]   ;;  %v2495_v48 = vld [vmem:[%s3018_s0 + $0x11] ss:$8 sps:$4 sm:$0xff]  }
  0x48   :  { %1408 = vmatpush1.bf16.msra.mxu1 %v2351_v60  ;;  %v2421_v60 = vld [vmem:[#allocation2 + $0x180] ss:$8 sps:$4 sm:$0xff]  }
  0x49   :  { %1554 = vmatpush1.bf16.msra.mxu0 %v2352_v61  ;;  %1409 = vmatprep.subr.bf16.mxu1 %v2353_v62  ;;  %v2424_v61 = vld [vmem:[#allocation2 + $0x380] ss:$8 sps:$4 sm:$0xff]   ;;  %v488_v62 = vpack.c.bf16 %v2454_v59, %v2453_v58  ;;  %v2503_v58 = vld [vmem:[#allocation2 + $0x404] ss:$8 sps:$4 sm:$0xff]  }
  0x4a   :  { %1555 = vmatprep.subr.bf16.mxu0 %v2355_v63  ;;  %v2455_v63 = vld [vmem:[%s3018_s0 + $0x6a] ss:$8 sps:$4 sm:$0xff]  }
  0x4c   :  { %1410 = vmatpush1.bf16.msra.mxu1 %v2357_v0  ;;  %v2456_v0 = vld [vmem:[%s3018_s0 + $0x7a] ss:$8 sps:$4 sm:$0xff]  }
  0x4d   :  { %1556 = vmatpush1.bf16.msra.mxu0 %v2358_v1  ;;  %1411 = vmatprep.subr.bf16.mxu1 %v2359_v2  ;;  %v492_v1 = vpack.c.bf16 %v2456_v0, %v2455_v63  ;;  %v2457_v2 = vld [vmem:[%s3018_s0 + $0x60] ss:$8 sps:$4 sm:$0xff]  }
  0x4e   :  { %1557 = vmatprep.subr.bf16.mxu0 %v2361_v3  ;;  %v2458_v3 = vld [vmem:[%s3018_s0 + $0x70] ss:$8 sps:$4 sm:$0xff]  }
  0x4f   :  { %v487_v8 = vpack.c.bf16 %v2458_v3, %v2457_v2  ;;  %v2507_v63 = vld [vmem:[%s3018_s0 + $0x38] ss:$8 sps:$4 sm:$0xff]   ;;  %v2508_v0 = vld [vmem:[%s3018_s0 + $0x48] ss:$8 sps:$4 sm:$0xff]  }
  0x50   :  { %1412 = vmatpush1.bf16.msra.mxu1 %v2363_v4  ;;  %v2429_v4 = vld [vmem:[#allocation2 + $0x194] ss:$8 sps:$4 sm:$0xff]   ;;  %v481_v2 = vpack.c.bf16 %v2508_v0, %v2507_v63  ;;  %v2509_v3 = vld [vmem:[%s3018_s0 + $0x41] ss:$8 sps:$4 sm:$0xff]  }
  0x51   :  { %1558 = vmatpush1.bf16.msra.mxu0 %v2364_v5  ;;  %1454 = vmatprep.subr.bf16.mxu1 %v2369_v10  ;;  %v2432_v5 = vld [vmem:[#allocation2 + $0x394] ss:$8 sps:$4 sm:$0xff]  }
  0x52   :  { %1600 = vmatprep.subr.bf16.mxu0 %v2374_v11  ;;  %v2463_v10 = vld [vmem:[%s3018_s0 + $0x79] ss:$8 sps:$4 sm:$0xff]  }
  0x53   :  { %1414 = vmatmul.mubr.bf16.vlgmr.msra.gmra.mrb[0].mxu1 %v469_v14  ;;  %v2441_v11 = vld [vmem:[#allocation2 + $0x1a4] ss:$8 sps:$4 sm:$0xff]   ;;  %v2439_v14 = vld [vmem:[#allocation2 + $0x1a0] ss:$8 sps:$4 sm:$0xff]  }
  0x54   :  { %1560 = vmatmul.mubr.bf16.vlgmr.msra.gmra.mrb[0].mxu0 %v473_v15  ;;  %1455 = vmatpush1.bf16.msra.mxu1 %v2367_v12  ;;  %v2446_v12 = vld [vmem:[#allocation2 + $0x3a4] ss:$8 sps:$4 sm:$0xff]   ;;  %v2444_v15 = vld [vmem:[#allocation2 + $0x3a0] ss:$8 sps:$4 sm:$0xff]  }
  0x55   :  { %1601 = vmatpush1.bf16.msra.mxu0 %v2372_v13  ;;  %1456 = vmatprep.subr.bf16.mxu1 %v2381_v16  ;;  %v491_v13 = vpack.c.bf16 %v2463_v10, %v2462_v9  ;;  %v2449_v16 = vld [vmem:[#allocation2 + $0x1b4] ss:$8 sps:$4 sm:$0xff]   ;;  %v2513_v9 = vld [vmem:[%s3018_s0 + $0x40] ss:$8 sps:$4 sm:$0xff]   ;;  %v2514_v10 = vld [vmem:[%s3018_s0 + $0x50] ss:$8 sps:$4 sm:$0xff]  }
  0x56   :  { %1602 = vmatprep.subr.bf16.mxu0 %v2384_v17  ;;  %1423 = vmatprep.mubr.bf16.mxu1 %v479_v37  ;;  %v2452_v17 = vld [vmem:[#allocation2 + $0x3b4] ss:$8 sps:$4 sm:$0xff]   ;;  %v2467_v37 = vld [vmem:[#allocation2 + $0x1d0] ss:$8 sps:$4 sm:$0xff]  }
  0x57   :  { %1569 = vmatprep.mubr.bf16.mxu0 %v483_v42  ;;  %v2479_v42 = vld [vmem:[#allocation2 + $0x1e0] ss:$8 sps:$4 sm:$0xff]  }
  0x58   :  { %1457 = vmatpush1.bf16.msra.mxu1 %v2379_v18  ;;  %v2473_v18 = vld [vmem:[%s3018_s0 + $0x91] ss:$8 sps:$4 sm:$0xff]  }
  0x59   :  { %1603 = vmatpush1.bf16.msra.mxu0 %v2382_v19  ;;  %1458 = vmatprep.subr.bf16.mxu1 %v2387_v20  ;;  %v2474_v19 = vld [vmem:[%s3018_s0 + $0xa1] ss:$8 sps:$4 sm:$0xff]   ;;  %v2447_v20 = vld [vmem:[#allocation2 + $0x1b0] ss:$8 sps:$4 sm:$0xff]  }
  0x5a   :  { %1604 = vmatprep.subr.bf16.mxu0 %v2390_v21  ;;  %v2450_v21 = vld [vmem:[#allocation2 + $0x3b0] ss:$8 sps:$4 sm:$0xff]  }
  0x5b   :  { %1424 = vmatmul.mubr.bf16.gmra.mrb[4].mxu1 %v478_v46  ;;  %v2492_v46 = vld [vmem:[#allocation2 + $0x3f4] ss:$8 sps:$4 sm:$0xff]  }
  0x5c   :  { %1459 = vmatpush1.bf16.msra.mxu1 %v2385_v22  ;;  %1570 = vmatmul.mubr.bf16.gmra.mrb[4].mxu0 %v482_v52  ;;  %v2461_v22 = vld [vmem:[#allocation2 + $0x1c4] ss:$8 sps:$4 sm:$0xff]   ;;  %v2490_v52 = vld [vmem:[#allocation2 + $0x3f0] ss:$8 sps:$4 sm:$0xff]  }
  0x5d   :  { %1605 = vmatpush1.bf16.msra.mxu0 %v2388_v23  ;;  %1460 = vmatprep.subr.bf16.mxu1 %v2393_v24  ;;  %v2466_v23 = vld [vmem:[#allocation2 + $0x3c4] ss:$8 sps:$4 sm:$0xff]   ;;  %v497_v24 = vpack.c.bf16 %v2474_v19, %v2473_v18  ;;  %v2523_v19 = vld [vmem:[%s3018_s0 + $0x71] ss:$8 sps:$4 sm:$0xff]  }
  0x5e   :  { %1606 = vmatprep.subr.bf16.mxu0 %v2396_v25  ;;  %1433 = vmatprep.mubr.bf16.mxu1 %v488_v62  ;;  %v2475_v25 = vld [vmem:[%s3018_s0 + $0x9a] ss:$8 sps:$4 sm:$0xff]  }
  0x5f   :  { %1579 = vmatprep.mubr.bf16.mxu0 %v492_v1  ;;  %v2506_v62 = vld [vmem:[#allocation2 + $0x414] ss:$8 sps:$4 sm:$0xff]   ;;  %v2504_v1 = vld [vmem:[#allocation2 + $0x410] ss:$8 sps:$4 sm:$0xff]  }
  0x60   :  { %1461 = vmatpush1.bf16.msra.mxu1 %v2391_v26  ;;  %v2476_v26 = vld [vmem:[%s3018_s0 + $0xaa] ss:$8 sps:$4 sm:$0xff]  }
  0x61   :  { %1607 = vmatpush1.bf16.msra.mxu0 %v2394_v27  ;;  %1462 = vmatprep.subr.bf16.mxu1 %v2399_v28  ;;  %v501_v27 = vpack.c.bf16 %v2476_v26, %v2475_v25  ;;  %v2477_v28 = vld [vmem:[%s3018_s0 + $0x90] ss:$8 sps:$4 sm:$0xff]   ;;  %v2528_v26 = vld [vmem:[%s3018_s0 + $0x80] ss:$8 sps:$4 sm:$0xff]  }
  0x62   :  { %1608 = vmatprep.subr.bf16.mxu0 %v2402_v29  ;;  %v2478_v29 = vld [vmem:[%s3018_s0 + $0xa0] ss:$8 sps:$4 sm:$0xff]   ;;  %v2527_v25 = vld [vmem:[%s3018_s0 + $0x70] ss:$8 sps:$4 sm:$0xff]  }
  0x63   :  { %1434 = vmatmul.mubr.bf16.gmra.mrb[8].mxu1 %v487_v8 }
  0x64   :  { %1463 = vmatpush1.bf16.msra.mxu1 %v2397_v30  ;;  %1580 = vmatmul.mubr.bf16.gmra.mrb[8].mxu0 %v491_v13  ;;  %v2459_v30 = vld [vmem:[#allocation2 + $0x1c0] ss:$8 sps:$4 sm:$0xff]   ;;  %v2517_v13 = vld [vmem:[#allocation2 + $0x424] ss:$8 sps:$4 sm:$0xff]  }
  0x65   :  { %1609 = vmatpush1.bf16.msra.mxu0 %v2400_v31  ;;  %1464 = vmatprep.subr.bf16.mxu1 %v2405_v33  ;;  %v2464_v31 = vld [vmem:[#allocation2 + $0x3c0] ss:$8 sps:$4 sm:$0xff]   ;;  %v2472_v33 = vld [vmem:[#allocation2 + $0x3d4] ss:$8 sps:$4 sm:$0xff]  }
  0x66   :  { %1610 = vmatprep.subr.bf16.mxu0 %v2408_v34  ;;  %1443 = vmatprep.mubr.bf16.mxu1 %v497_v24  ;;  %v496_v34 = vpack.c.bf16 %v2478_v29, %v2477_v28  ;;  %v2531_v28 = vld [vmem:[#allocation2 + $0x444] ss:$8 sps:$4 sm:$0xff]   ;;  %v493_v29 = vpack.c.bf16 %v2528_v26, %v2527_v25 }
  0x67   :  { %1589 = vmatprep.mubr.bf16.mxu0 %v501_v27  ;;  %v2529_v27 = vld [vmem:[#allocation2 + $0x440] ss:$8 sps:$4 sm:$0xff]  }
  0x68   :  { %1465 = vmatpush1.bf16.msra.mxu1 %v2403_v39  ;;  %v500_v39 = vpack.c.bf16 %v2483_v36, %v2482_v35  ;;  %v2538_v36 = vld [vmem:[%s3018_s0 + $0xb1] ss:$8 sps:$4 sm:$0xff]  }
  0x69   :  { %1611 = vmatpush1.bf16.msra.mxu0 %v2406_v40  ;;  %1466 = vmatprep.subr.bf16.mxu1 %v2411_v44  ;;  %v2481_v40 = vld [vmem:[#allocation2 + $0x1e4] ss:$8 sps:$4 sm:$0xff]   ;;  %v2493_v44 = vld [vmem:[%s3018_s0 + $0x8] ss:$8 sps:$4 sm:$0xff]  }
  0x6a   :  { %1612 = vmatprep.subr.bf16.mxu0 %v2414_v45  ;;  %v2489_v45 = vld [vmem:[#allocation2 + $0x1f4] ss:$8 sps:$4 sm:$0xff]  }
  0x6b   :  { %1444 = vmatmul.mubr.bf16.gmra.mrb[12].mxu1 %v496_v34  ;;  %v2537_v34 = vld [vmem:[%s3018_s0 + $0xa1] ss:$8 sps:$4 sm:$0xff]  }
  0x6c   :  { %1467 = vmatpush1.bf16.msra.mxu1 %v2409_v49  ;;  %1590 = vmatmul.mubr.bf16.gmra.mrb[12].mxu0 %v500_v39  ;;  %v472_v49 = vpack.c.bf16 %v2494_v47, %v2493_v44  ;;  %v2540_v39 = vld [vmem:[%s3018_s0 + $0xa2] ss:$8 sps:$4 sm:$0xff]   ;;  %v2548_v47 = vld [vmem:[#allocation2 + $0x474] ss:$8 sps:$4 sm:$0xff]  }
  0x6d   :  { %1613 = vmatpush1.bf16.msra.mxu0 %v2412_v50  ;;  %1468 = vmatprep.subr.bf16.mxu1 %v2417_v51  ;;  %v2496_v50 = vld [vmem:[%s3018_s0 + $0x21] ss:$8 sps:$4 sm:$0xff]   ;;  %v2487_v51 = vld [vmem:[#allocation2 + $0x1f0] ss:$8 sps:$4 sm:$0xff]  }
  0x6e   :  { %1614 = vmatprep.subr.bf16.mxu0 %v2420_v53  ;;  %v2497_v53 = vld [vmem:[%s3018_s0 + $0x2] ss:$8 sps:$4 sm:$0xff]   ;;  %1486 = vmatprep.mubr.bf16.mxu1 %v472_v49 }
  0x6f   :  { %v2545_v44 = vld [vmem:[#allocation2 + $0x464] ss:$8 sps:$4 sm:$0xff]  }
  0x70   :  { %1469 = vmatpush1.bf16.msra.mxu1 %v2415_v54  ;;  %v476_v54 = vpack.c.bf16 %v2496_v50, %v2495_v48  ;;  %v2549_v48 = vld [vmem:[%s3018_s0 + $0x12] ss:$8 sps:$4 sm:$0xff]   ;;  %v2550_v49 = vld [vmem:[%s3018_s0 + $0x22] ss:$8 sps:$4 sm:$0xff]   ;;  %v2586_v50 = vmov 0  }
  0x71   :  { %1615 = vmatpush1.bf16.msra.mxu0 %v2418_v55  ;;  %1470 = vmatprep.subr.bf16.mxu1 %v2423_v56  ;;  %v2498_v55 = vld [vmem:[%s3018_s0 + $0x12] ss:$8 sps:$4 sm:$0xff]  }
  0x72   :  { %1616 = vmatprep.subr.bf16.mxu0 %v2426_v57  ;;  %v2499_v56 = vld [vmem:[%s3018_s0 + $0x10] ss:$8 sps:$4 sm:$0xff]   ;;  %v2500_v57 = vld [vmem:[%s3018_s0 + $0x20] ss:$8 sps:$4 sm:$0xff]   ;;  %1632 = vmatprep.mubr.bf16.mxu0 %v476_v54  ;;  %v471_v59 = vpack.c.bf16 %v2498_v55, %v2497_v53  ;;  %v477_v53 = vpack.c.bf16 %v2550_v49, %v2549_v48 }
  0x73   :  { %v2555_v55 = vld [vmem:[%s3018_s0 + $0xa2] ss:$8 sps:$4 sm:$0xff]  }
  0x74   :  { %1471 = vmatpush1.bf16.msra.mxu1 %v2421_v60  ;;  %v475_v60 = vpack.c.bf16 %v2500_v57, %v2499_v56  ;;  %v2556_v56 = vld [vmem:[%s3018_s0 + $0xb2] ss:$8 sps:$4 sm:$0xff]   ;;  %v2553_v57 = vld [vmem:[%s3018_s0 + $0x42] ss:$8 sps:$4 sm:$0xff]  }
  0x75   :  { %1617 = vmatpush1.bf16.msra.mxu0 %v2424_v61  ;;  %1472 = vmatprep.subr.bf16.mxu1 %v2429_v4  ;;  %v2501_v61 = vld [vmem:[#allocation2 + $0x400] ss:$8 sps:$4 sm:$0xff]   ;;  %v2510_v4 = vld [vmem:[%s3018_s0 + $0x51] ss:$8 sps:$4 sm:$0xff]  }
  0x76   :  { %1618 = vmatprep.subr.bf16.mxu0 %v2432_v5  ;;  %v485_v5 = vpack.c.bf16 %v2510_v4, %v2509_v3 }
  0x78   :  { %1473 = vmatpush1.bf16.msra.mxu1 %v2427_v6  ;;  %v2511_v6 = vld [vmem:[%s3018_s0 + $0x32] ss:$8 sps:$4 sm:$0xff]  }
  0x79   :  { %1619 = vmatpush1.bf16.msra.mxu0 %v2430_v7  ;;  %1474 = vmatprep.subr.bf16.mxu1 %v2441_v11  ;;  %v2512_v7 = vld [vmem:[%s3018_s0 + $0x42] ss:$8 sps:$4 sm:$0xff]  }
  0x7a   :  { %1620 = vmatprep.subr.bf16.mxu0 %v2446_v12  ;;  %v480_v8 = vpack.c.bf16 %v2512_v7, %v2511_v6  ;;  %v2515_v11 = vld [vmem:[#allocation2 + $0x420] ss:$8 sps:$4 sm:$0xff]   ;;  %v484_v12 = vpack.c.bf16 %v2514_v10, %v2513_v9 }
  0x7c   :  { %1475 = vmatpush1.bf16.msra.mxu1 %v2439_v14  ;;  %v2520_v14 = vld [vmem:[#allocation2 + $0x434] ss:$8 sps:$4 sm:$0xff]  }
  0x7d   :  { %1621 = vmatpush1.bf16.msra.mxu0 %v2444_v15  ;;  %1476 = vmatprep.subr.bf16.mxu1 %v2449_v16  ;;  %v2518_v15 = vld [vmem:[#allocation2 + $0x430] ss:$8 sps:$4 sm:$0xff]  }
  0x7e   :  { %1622 = vmatprep.subr.bf16.mxu0 %v2452_v17  ;;  %v2521_v16 = vld [vmem:[%s3018_s0 + $0x68] ss:$8 sps:$4 sm:$0xff]   ;;  %v2522_v17 = vld [vmem:[%s3018_s0 + $0x78] ss:$8 sps:$4 sm:$0xff]  }
  0x7f   :  { %v490_v18 = vpack.c.bf16 %v2522_v17, %v2521_v16 }
  0x80   :  { %1477 = vmatpush1.bf16.msra.mxu1 %v2447_v20  ;;  %v2524_v20 = vld [vmem:[%s3018_s0 + $0x81] ss:$8 sps:$4 sm:$0xff]  }
  0x81   :  { %1623 = vmatpush1.bf16.msra.mxu0 %v2450_v21  ;;  %1478 = vmatprep.subr.bf16.mxu1 %v2461_v22  ;;  %v494_v21 = vpack.c.bf16 %v2524_v20, %v2523_v19  ;;  %v2525_v22 = vld [vmem:[%s3018_s0 + $0x62] ss:$8 sps:$4 sm:$0xff]  }
  0x82   :  { %1624 = vmatprep.subr.bf16.mxu0 %v2466_v23  ;;  %v2526_v23 = vld [vmem:[%s3018_s0 + $0x72] ss:$8 sps:$4 sm:$0xff]  }
  0x83   :  { %v489_v24 = vpack.c.bf16 %v2526_v23, %v2525_v22 }
  0x84   :  { %1479 = vmatpush1.bf16.msra.mxu1 %v2459_v30  ;;  %v2532_v30 = vld [vmem:[#allocation2 + $0x450] ss:$8 sps:$4 sm:$0xff]  }
  0x85   :  { %1625 = vmatpush1.bf16.msra.mxu0 %v2464_v31  ;;  %1480 = vmatprep.subr.bf16.mxu1 %v2469_v32  ;;  %v2534_v31 = vld [vmem:[#allocation2 + $0x454] ss:$8 sps:$4 sm:$0xff]   ;;  %v2535_v32 = vld [vmem:[%s3018_s0 + $0x98] ss:$8 sps:$4 sm:$0xff]  }
  0x86   :  { %1626 = vmatprep.subr.bf16.mxu0 %v2472_v33  ;;  %v2536_v33 = vld [vmem:[%s3018_s0 + $0xa8] ss:$8 sps:$4 sm:$0xff]  }
  0x87   :  { %v499_v35 = vpack.c.bf16 %v2536_v33, %v2535_v32 }
  0x88   :  { %1481 = vmatpush1.bf16.msra.mxu1 %v2467_v37  ;;  %v2539_v37 = vld [vmem:[%s3018_s0 + $0x92] ss:$8 sps:$4 sm:$0xff]  }
  0x89   :  { %1627 = vmatpush1.bf16.msra.mxu0 %v2470_v38  ;;  %1482 = vmatprep.subr.bf16.mxu1 %v2481_v40  ;;  %v503_v38 = vpack.c.bf16 %v2538_v36, %v2537_v34  ;;  %v2541_v40 = vld [vmem:[%s3018_s0 + $0xa0] ss:$8 sps:$4 sm:$0xff]  }
  0x8a   :  { %1628 = vmatprep.subr.bf16.mxu0 %v2486_v41  ;;  %v498_v41 = vpack.c.bf16 %v2540_v39, %v2539_v37 }
  0x8c   :  { %1483 = vmatpush1.bf16.msra.mxu1 %v2479_v42  ;;  %v2542_v42 = vld [vmem:[%s3018_s0 + $0xb0] ss:$8 sps:$4 sm:$0xff]  }
  0x8d   :  { %1629 = vmatpush1.bf16.msra.mxu0 %v2484_v43  ;;  %1484 = vmatprep.subr.bf16.mxu1 %v2489_v45  ;;  %v2543_v43 = vld [vmem:[#allocation2 + $0x460] ss:$8 sps:$4 sm:$0xff]   ;;  %v502_v45 = vpack.c.bf16 %v2542_v42, %v2541_v40 }
  0x8e   :  { %1630 = vmatprep.subr.bf16.mxu0 %v2492_v46  ;;  %v2546_v46 = vld [vmem:[#allocation2 + $0x470] ss:$8 sps:$4 sm:$0xff]  }
  0x90   :  { %1485 = vmatpush1.bf16.msra.mxu1 %v2487_v51  ;;  %v2551_v51 = vld [vmem:[%s3018_s0 + $0x72] ss:$8 sps:$4 sm:$0xff]  }
  0x91   :  { %1631 = vmatpush1.bf16.msra.mxu0 %v2490_v52  ;;  %2168 = vmatprep.subr.bf16.mxu1 %v2503_v58  ;;  %v2552_v52 = vld [vmem:[%s3018_s0 + $0x82] ss:$8 sps:$4 sm:$0xff]  }
  0x92   :  { %1673 = vmatprep.subr.bf16.mxu0 %v2503_v58  ;;  %v495_v54 = vpack.c.bf16 %v2552_v52, %v2551_v51  ;;  %v2554_v58 = vld [vmem:[%s3018_s0 + $0x52] ss:$8 sps:$4 sm:$0xff]  }
  0x93   :  { %1487 = vmatmul.mubr.bf16.vlgmr.msra.gmra.mrb[0].mxu1 %v471_v59  ;;  %v504_v59 = vpack.c.bf16 %v2556_v56, %v2555_v55 }
  0x94   :  { %1633 = vmatmul.mubr.bf16.vlgmr.msra.gmra.mrb[0].mxu0 %v475_v60  ;;  %2176 = vmatpush1.bf16.msra.mxu1 %v2501_v61  ;;  %v486_v60 = vpack.c.bf16 %v2554_v58, %v2553_v57 }
  0x95   :  { %1674 = vmatpush1.bf16.msra.mxu0 %v2501_v61  ;;  %2169 = vmatprep.subr.bf16.mxu1 %v2506_v62 }
  0x96   :  { %1675 = vmatprep.subr.bf16.mxu0 %v2506_v62  ;;  %1496 = vmatprep.mubr.bf16.mxu1 %v481_v2 }
  0x97   :  { %1642 = vmatprep.mubr.bf16.mxu0 %v485_v5 }
  0x98   :  { %2177 = vmatpush1.bf16.msra.mxu1 %v2504_v1 }
  0x99   :  { %1676 = vmatpush1.bf16.msra.mxu0 %v2504_v1  ;;  %2170 = vmatprep.subr.bf16.mxu1 %v2517_v13  ;;  %v651_v1 = vlaneseq }
  0x9a   :  { %1677 = vmatprep.subr.bf16.mxu0 %v2517_v13 }
  0x9b   :  { %1497 = vmatmul.mubr.bf16.gmra.mrb[4].mxu1 %v480_v8  ;;  %v652_v2 = vshrl.u32 %v651_v1, 7  ;;  %v649_v8 = vld [vmem:[%s3020_s2] sm:$0x3]  ;;  %s2587_s2 = smov 64  }
  0x9c   :  { %1643 = vmatmul.mubr.bf16.gmra.mrb[4].mxu0 %v484_v12  ;;  %2178 = vmatpush1.bf16.msra.mxu1 %v2515_v11 }
  0x9d   :  { %1678 = vmatpush1.bf16.msra.mxu0 %v2515_v11  ;;  %2171 = vmatprep.subr.bf16.mxu1 %v2520_v14  ;;  %v2850_v7 = vsub.s32 0, %v652_v2  ;;  %v657_v9 = vsub.s32 1, %v652_v2 }
  0x9e   :  { %1679 = vmatprep.subr.bf16.mxu0 %v2520_v14  ;;  %1506 = vmatprep.mubr.bf16.mxu1 %v490_v18 }
  0x9f   :  { %1652 = vmatprep.mubr.bf16.mxu0 %v494_v21  ;;  %v654_v10 = vrot.slane %v649_v8, %v2850_v7  ;;  %v658_v11 = vrot.slane %v649_v8, %v657_v9 }
  0xa0   :  { %2179 = vmatpush1.bf16.msra.mxu1 %v2518_v15 }
  0xa1   :  { %1680 = vmatpush1.bf16.msra.mxu0 %v2518_v15  ;;  %2172 = vmatprep.subr.bf16.mxu1 %v2531_v28 }
  0xa2   :  { %1681 = vmatprep.subr.bf16.mxu0 %v2531_v28 }
  0xa3   :  { %1507 = vmatmul.mubr.bf16.gmra.mrb[8].mxu1 %v489_v24 }
  0xa4   :  { %1653 = vmatmul.mubr.bf16.gmra.mrb[8].mxu0 %v493_v29  ;;  %2180 = vmatpush1.bf16.msra.mxu1 %v2529_v27 }
  0xa5   :  { %1682 = vmatpush1.bf16.msra.mxu0 %v2529_v27  ;;  %2173 = vmatprep.subr.bf16.mxu1 %v2534_v31 }
  0xa6   :  { %1683 = vmatprep.subr.bf16.mxu0 %v2534_v31  ;;  %1516 = vmatprep.mubr.bf16.mxu1 %v499_v35 }
  0xa7   :  { %1662 = vmatprep.mubr.bf16.mxu0 %v503_v38 }
  0xa8   :  { %2181 = vmatpush1.bf16.msra.mxu1 %v2532_v30 }
  0xa9   :  { %1684 = vmatpush1.bf16.msra.mxu0 %v2532_v30  ;;  %2174 = vmatprep.subr.bf16.mxu1 %v2545_v44 }
  0xaa   :  { %1685 = vmatprep.subr.bf16.mxu0 %v2545_v44 }
  0xab   :  { %1517 = vmatmul.mubr.bf16.gmra.mrb[12].mxu1 %v498_v41 }
  0xac   :  { %1663 = vmatmul.mubr.bf16.gmra.mrb[12].mxu0 %v502_v45  ;;  %2182 = vmatpush1.bf16.msra.mxu1 %v2543_v43 }
  0xad   :  { %1686 = vmatpush1.bf16.msra.mxu0 %v2543_v43  ;;  %2175 = vmatprep.subr.bf16.mxu1 %v2548_v47 }
  0xae   :  { %1687 = vmatprep.subr.bf16.mxu0 %v2548_v47  ;;  %1705 = vmatprep.mubr.bf16.mxu0 %v2586_v50 }
  0xaf   :  { %1725 = vmatprep.mubr.bf16.mxu1 %v2586_v50 }
  0xb0   :  { %2183 = vmatpush1.bf16.msra.mxu1 %v2546_v46 }
  0xb1   :  { %1688 = vmatpush1.bf16.msra.mxu0 %v2546_v46 }
  0xb3   :  { %1726 = vmatmul.mubr.bf16.vlgmr.msra.gmra.mrb[16].mxu1 %v495_v54 }
  0xb4   :  { %1706 = vmatmul.mubr.bf16.vlgmr.msra.gmra.mrb[0].mxu0 %v477_v53  ;;  %1735 = vmatprep.mubr.bf16.mxu1 %v2586_v50 }
  0xb5   :  { %1715 = vmatprep.mubr.bf16.mxu0 %v2586_v50 }
  0xbb   :  { %1736 = vmatmul.mubr.bf16.gmra.mrb[20].mxu1 %v504_v59 }
  0xbc   :  { %1716 = vmatmul.mubr.bf16.gmra.mrb[4].mxu0 %v486_v60 }
 0x166   :  { %v1488_v61 = vpop.f32.mrb[0].mxu1 }
 0x167   :  { %v1490_v62 = vpop.f32.mrb[1].mxu1  ;;  %v2184_v44 = vadd.f32 %v1488_v61, %v654_v10 }
 0x168   :  { %v1492_v63 = vpop.f32.mrb[2].mxu1  ;;  %v2186_v46 = vadd.f32 %v1490_v62, %v658_v11 }
 0x169   :  { %v1494_v0 = vpop.f32.mrb[3].mxu1  ;;  %v2188_v50 = vadd.f32 %v1492_v63, %v654_v10 }
 0x16a   :  { %v2190_v55 = vadd.f32 %v1494_v0, %v658_v11 }
 0x16e   :  { %v1498_v3 = vpop.f32.mrb[4].mxu1 }
 0x16f   :  { %v1500_v4 = vpop.f32.mrb[5].mxu1  ;;  %v2192_v63 = vadd.f32 %v1498_v3, %v654_v10 }
 0x170   :  { %v2846_v5 = vpop.f32.mrb[6].mxu1  ;;  %v2194_v2 = vadd.f32 %v1500_v4, %v658_v11 }
 0x171   :  { %v2848_v6 = vpop.f32.mrb[7].mxu1  ;;  %v2196_v0 = vadd.f32 %v2846_v5, %v654_v10 }
 0x176   :  { %v1508_v12 = vpop.f32.mrb[8].mxu1 }
 0x177   :  { %v2200_v13 = vadd.f32 %v1508_v12, %v654_v10  ;;  %v1510_v14 = vpop.f32.mrb[9].mxu1  ;;  %v1654_v15 = vpop.f32.mrb[8].mxu0  ;;  %v2198_v12 = vadd.f32 %v2848_v6, %v658_v11 }
 0x178   :  { %v2203_v16 = vadd.f32 %v1510_v14, %v658_v11  ;;  %v1512_v17 = vpop.f32.mrb[10].mxu1  ;;  %v1656_v19 = vpop.f32.mrb[9].mxu0 }
 0x179   :  { %v2201_v18 = vadd.f32 %v2200_v13, %v1654_v15  ;;  %v2206_v20 = vadd.f32 %v1512_v17, %v654_v10  ;;  %v1514_v21 = vpop.f32.mrb[11].mxu1  ;;  %v1658_v23 = vpop.f32.mrb[10].mxu0 }
 0x17a   :  { %v2204_v22 = vadd.f32 %v2203_v16, %v1656_v19  ;;  %v2209_v24 = vadd.f32 %v1514_v21, %v658_v11  ;;  %v1660_v26 = vpop.f32.mrb[11].mxu0 }
 0x17b   :  { %v2207_v25 = vadd.f32 %v2206_v20, %v1658_v23 }
 0x17c   :  { %v2210_v27 = vadd.f32 %v2209_v24, %v1660_v26 }
 0x17e   :  { %v1518_v28 = vpop.f32.mrb[12].mxu1 }
 0x17f   :  { %v2212_v29 = vadd.f32 %v1518_v28, %v654_v10  ;;  %v1520_v30 = vpop.f32.mrb[13].mxu1  ;;  %v1664_v31 = vpop.f32.mrb[12].mxu0 }
 0x180   :  { %v2215_v32 = vadd.f32 %v1520_v30, %v658_v11  ;;  %v1522_v33 = vpop.f32.mrb[14].mxu1  ;;  %v1666_v35 = vpop.f32.mrb[13].mxu0 }
 0x181   :  { %v2213_v34 = vadd.f32 %v2212_v29, %v1664_v31  ;;  %v2218_v36 = vadd.f32 %v1522_v33, %v654_v10  ;;  %v1524_v37 = vpop.f32.mrb[15].mxu1  ;;  %v1668_v39 = vpop.f32.mrb[14].mxu0 }
 0x182   :  { %v2216_v38 = vadd.f32 %v2215_v32, %v1666_v35  ;;  %v2221_v40 = vadd.f32 %v1524_v37, %v658_v11  ;;  %v1670_v42 = vpop.f32.mrb[15].mxu0 }
 0x183   :  { %v2219_v41 = vadd.f32 %v2218_v36, %v1668_v39 }
 0x184   :  { %v2222_v43 = vadd.f32 %v2221_v40, %v1670_v42 }
 0x186   :  { %v1727_v45 = vpop.f32.mrb[16].mxu1 }
 0x187   :  { %v1707_v47 = vpop.f32.mrb[0].mxu0  ;;  %v2856_v48 = vadd.f32 %v2201_v18, %v1727_v45  ;;  %v1729_v49 = vpop.f32.mrb[17].mxu1 }
 0x188   :  { %v2858_v51 = vadd.f32 %v2184_v44, %v1707_v47  ;;  %v1709_v52 = vpop.f32.mrb[1].mxu0  ;;  %v2860_v53 = vadd.f32 %v2204_v22, %v1729_v49  ;;  %v1731_v54 = vpop.f32.mrb[18].mxu1 }
 0x189   :  { %v2862_v56 = vadd.f32 %v2186_v46, %v1709_v52  ;;  %v1711_v57 = vpop.f32.mrb[2].mxu0  ;;  %v2864_v58 = vadd.f32 %v2207_v25, %v1731_v54  ;;  %v1733_v59 = vpop.f32.mrb[19].mxu1  ;;  %v1780_v39 = vmul.f32 %v2856_v48, %v2856_v48 }
 0x18a   :  { %v2866_v60 = vadd.f32 %v2188_v50, %v1711_v57  ;;  %v1713_v61 = vpop.f32.mrb[3].mxu0  ;;  %v2868_v62 = vadd.f32 %v2210_v27, %v1733_v59  ;;  %v1772_v17 = vmul.f32 %v2858_v51, %v2858_v51  ;;  %v1781_v42 = vmul.f32 %v2860_v53, %v2860_v53 }
 0x18b   :  { %v2870_v1 = vadd.f32 %v2190_v55, %v1713_v61  ;;  %v1773_v6 = vmul.f32 %v2862_v56, %v2862_v56 }
 0x18c   :  { %v1774_v8 = vmul.f32 %v2866_v60, %v2866_v60  ;;  %v1746_v3 = vadd.f32 %v2866_v60, %v2858_v51  ;;  %v1783_v49 = vmul.f32 %v2868_v62, %v2868_v62 }
 0x18d   :  { %v1775_v13 = vmul.f32 %v2870_v1, %v2870_v1  ;;  %v1759_v10 = vadd.f32 %v2870_v1, %v2862_v56 }
 0x18e   :  { %v1737_v9 = vpop.f32.mrb[20].mxu1  ;;  %v1788_v23 = vadd.f32 %v1774_v8, %v1772_v17 }
 0x18f   :  { %v1717_v14 = vpop.f32.mrb[4].mxu0  ;;  %v2878_v15 = vadd.f32 %v2213_v34, %v1737_v9  ;;  %v1739_v16 = vpop.f32.mrb[21].mxu1  ;;  %v1801_v28 = vadd.f32 %v1775_v13, %v1773_v6 }
 0x190   :  { %v2884_v4 = vadd.f32 %v2192_v63, %v1717_v14  ;;  %v1719_v18 = vpop.f32.mrb[5].mxu0  ;;  %v2886_v19 = vadd.f32 %v2216_v38, %v1739_v16  ;;  %v1741_v5 = vpop.f32.mrb[22].mxu1 }
 0x191   :  { %v2892_v11 = vadd.f32 %v2194_v2, %v1719_v18  ;;  %v1721_v20 = vpop.f32.mrb[6].mxu0  ;;  %v2894_v21 = vadd.f32 %v2219_v41, %v1741_v5  ;;  %v1743_v22 = vpop.f32.mrb[23].mxu1  ;;  %v1784_v54 = vmul.f32 %v2878_v15, %v2878_v15 }
 0x192   :  { %v1747_v24 = vadd.f32 %v2884_v4, %v1746_v3  ;;  %v1776_v25 = vmul.f32 %v2884_v4, %v2884_v4  ;;  %v2899_v26 = vadd.f32 %v2196_v0, %v1721_v20  ;;  %v1723_v27 = vpop.f32.mrb[7].mxu0  ;;  %v2909_v35 = vadd.f32 %v2222_v43, %v1743_v22 }
 0x193   :  { %v1760_v29 = vadd.f32 %v2892_v11, %v1759_v10  ;;  %v1777_v30 = vmul.f32 %v2892_v11, %v2892_v11  ;;  %v2904_v31 = vadd.f32 %v2198_v12, %v1723_v27  ;;  %v1782_v43 = vmul.f32 %v2864_v58, %v2864_v58 }
 0x194   :  { %v1789_v32 = vadd.f32 %v1788_v23, %v1776_v25  ;;  %v1748_v33 = vadd.f32 %v2899_v26, %v1747_v24  ;;  %v1778_v34 = vmul.f32 %v2899_v26, %v2899_v26  ;;  %v1785_v59 = vmul.f32 %v2886_v19, %v2886_v19 }
 0x195   :  { %v1802_v36 = vadd.f32 %v1801_v28, %v1777_v30  ;;  %v1761_v37 = vadd.f32 %v2904_v31, %v1760_v29  ;;  %v1779_v38 = vmul.f32 %v2904_v31, %v2904_v31  ;;  %v1786_v8 = vmul.f32 %v2894_v21, %v2894_v21 }
 0x196   :  { %v1749_v40 = vadd.f32 %v2856_v48, %v1748_v33  ;;  %v1790_v41 = vadd.f32 %v1789_v32, %v1778_v34  ;;  %v1787_v12 = vmul.f32 %v2909_v35, %v2909_v35 }
 0x197   :  { %v1762_v44 = vadd.f32 %v2860_v53, %v1761_v37  ;;  %v1803_v45 = vadd.f32 %v1802_v36, %v1779_v38 }
 0x198   :  { %v1791_v46 = vadd.f32 %v1790_v41, %v1780_v39  ;;  %v1750_v47 = vadd.f32 %v2864_v58, %v1749_v40 }
 0x199   :  { %v1804_v50 = vadd.f32 %v1803_v45, %v1781_v42  ;;  %v1763_v52 = vadd.f32 %v2868_v62, %v1762_v44 }
 0x19a   :  { %v1751_v55 = vadd.f32 %v2878_v15, %v1750_v47  ;;  %v1792_v57 = vadd.f32 %v1791_v46, %v1782_v43 }
 0x19b   :  { %v1764_v61 = vadd.f32 %v2886_v19, %v1763_v52  ;;  %v1805_v63 = vadd.f32 %v1804_v50, %v1783_v49 }
 0x19c   :  { %v1752_v2 = vadd.f32 %v2894_v21, %v1751_v55  ;;  %v1793_v9 = vadd.f32 %v1792_v57, %v1784_v54 }
 0x19d   :  { %v1765_v0 = vadd.f32 %v2909_v35, %v1764_v61  ;;  %v1806_v13 = vadd.f32 %v1805_v63, %v1785_v59 }
 0x19e   :  { %v1753_v14 = vrot.slane %v1752_v2, 4  ;;  %v1794_v16 = vadd.f32 %v1793_v9, %v1786_v8 }
 0x19f   :  { %v1766_v17 = vrot.slane %v1765_v0, 4  ;;  %v1807_v3 = vadd.f32 %v1806_v13, %v1787_v12 }
 0x1a0   :  { %v1795_v18 = vrot.slane %v1794_v16, 4  ;;  %v1754_v5 = vadd.f32 %v1753_v14, %v1752_v2  ;;  %v1841_v2 = vld [vmem:[%s3021_s3] sm:$0x1] }
 0x1a1   :  { %v1808_v6 = vrot.slane %v1807_v3, 4  ;;  %v1767_v10 = vadd.f32 %v1766_v17, %v1765_v0  ;;  %v1845_v0 = vld [vmem:[%s3022_s4] sm:$0x1] }
 0x1a2   :  { %v1755_v20 = vrot.slane %v1754_v5, 2  ;;  %v1796_v22 = vadd.f32 %v1795_v18, %v1794_v16 }
 0x1a3   :  { %v1768_v23 = vrot.slane %v1767_v10, 2  ;;  %v1809_v24 = vadd.f32 %v1808_v6, %v1807_v3 }
 0x1a4   :  { %v1756_v25 = vadd.f32 %v1755_v20, %v1754_v5  ;;  %v1797_v27 = vrot.slane %v1796_v22, 2 }
 0x1a5   :  { %v1769_v28 = vadd.f32 %v1768_v23, %v1767_v10  ;;  %v1810_v29 = vrot.slane %v1809_v24, 2 }
 0x1a6   :  { %v1757_v30 = vrot.slane %v1756_v25, 1  ;;  %v1798_v32 = vadd.f32 %v1797_v27, %v1796_v22 }
 0x1a7   :  { %v1770_v33 = vrot.slane %v1769_v28, 1  ;;  %v1811_v34 = vadd.f32 %v1810_v29, %v1809_v24 }
 0x1a8   :  { %v1758_v36 = vadd.f32 %v1757_v30, %v1756_v25  ;;  %v1799_v37 = vrot.slane %v1798_v32, 1 }
 0x1a9   :  { %v1771_v38 = vadd.f32 %v1770_v33, %v1769_v28  ;;  %v1812_v39 = vrot.slane %v1811_v34, 1 }
 0x1aa   :  { %1815 = vrot.lane.b32.xlu0 %v1758_v36, %s2587_s2  ;;  %v1800_v40 = vadd.f32 %v1799_v37, %v1798_v32 }
 0x1ab   :  { %1821 = vrot.lane.b32.xlu1 %v1771_v38, %s2587_s2  ;;  %v1813_v41 = vadd.f32 %v1812_v39, %v1811_v34 }
 0x1ae   :  { %1826 = vrot.lane.b32.xlu0 %v1800_v40, %s2587_s2 }
 0x1af   :  { %1832 = vrot.lane.b32.xlu1 %v1813_v41, %s2587_s2 }
 0x21c   :  { %v1816_v42 = vpop.permute.xlu0 %1815 }
 0x21d   :  { %v1818_v44 = vadd.f32 %v1816_v42, %v1758_v36  ;;  %v1822_v45 = vpop.permute.xlu1 %1821 }
 0x21f   :  { %v1819_v43 = vadd.f32 %v1818_v44, %v1771_v38 }
 0x220   :  { %v1827_v46 = vpop.permute.xlu0 %1826 }
 0x221   :  { %v1824_v47 = vadd.f32 %v1822_v45, %v1819_v43  ;;  %v1829_v49 = vadd.f32 %v1827_v46, %v1800_v40  ;;  %v1833_v54 = vpop.permute.xlu1 %1832 }
 0x223   :  { %v1837_v50 = vmul.f32 0.00390625, %v1824_v47  ;;  %v1830_v52 = vadd.f32 %v1829_v49, %v1813_v41 }
 0x225   :  { %v1835_v55 = vadd.f32 %v1833_v54, %v1830_v52  ;;  %v1839_v57 = vmul.f32 %v1837_v50, %v1837_v50 }
 0x227   :  { %v1838_v59 = vmul.f32 0.00390625, %v1835_v55 }
 0x229   :  { %v1840_v61 = vsub.f32 %v1838_v59, %v1839_v57 }
 0x22b   :  { %v1842_v63 = vadd.f32 1e-05, %v1840_v61 }
 0x22d   :  { %2557 = vrsqrt.f32 %v1842_v63 }
 0x237   :  { %v2558_v8 = vpop.eup %2557 }
 0x238   :  { %v1844_v9 = vmul.f32 %v2558_v8, %v1841_v2 }
 0x23a   :  { %v1852_v12 = vrot.slane %v1844_v9, %v2850_v7  ;;  %v1846_v13 = vmul.f32 %v1844_v9, %v1837_v50 }
 0x23c   :  { %1853 = vrot.lane.b32.xlu0 %v1852_v12, %s2587_s2  ;;  %v1847_v14 = vsub.f32 %v1845_v0, %v1846_v13 }
 0x23e   :  { %v1862_v16 = vrot.slane %v1847_v14, %v2850_v7 }
 0x240   :  { %1863 = vrot.lane.b32.xlu1 %v1862_v16, %s2587_s2 }
 0x2ae   :  { %v1854_v17 = vpop.permute.xlu0 %1853 }
 0x2af   :  { %v1857_v3 = vsel %vm1856_vm0, %v1844_v9, %v1854_v17 }
 0x2b0   :  { %v1870_v18 = vrot.slane %v1857_v3, %v2850_v7 }
 0x2b2   :  { %v1864_v5 = vpop.permute.xlu1 %1863  ;;  %v1871_v6 = vmul.f32 %v2858_v51, %v1870_v18  ;;  %v1872_v10 = vmul.f32 %v2862_v56, %v1870_v18  ;;  %v1873_v20 = vmul.f32 %v2866_v60, %v1870_v18  ;;  %v1874_v22 = vmul.f32 %v2870_v1, %v1870_v18 }
 0x2b3   :  { %v1875_v23 = vmul.f32 %v2884_v4, %v1870_v18  ;;  %v1876_v24 = vmul.f32 %v2892_v11, %v1870_v18  ;;  %v1877_v25 = vmul.f32 %v2899_v26, %v1870_v18  ;;  %v1878_v27 = vmul.f32 %v2904_v31, %v1870_v18 }
 0x2b4   :  { %v1879_v28 = vmul.f32 %v2856_v48, %v1870_v18  ;;  %v1866_v29 = vsel %vm1856_vm0, %v1847_v14, %v1864_v5  ;;  %v1880_v30 = vmul.f32 %v2860_v53, %v1870_v18  ;;  %v1881_v51 = vmul.f32 %v2864_v58, %v1870_v18 }
 0x2b5   :  { %v1882_v56 = vmul.f32 %v2868_v62, %v1870_v18  ;;  %v1890_v60 = vrot.slane %v1866_v29, %v2850_v7  ;;  %v1883_v1 = vmul.f32 %v2878_v15, %v1870_v18  ;;  %v1884_v4 = vmul.f32 %v2886_v19, %v1870_v18 }
 0x2b6   :  { %v1885_v11 = vmul.f32 %v2894_v21, %v1870_v18  ;;  %v1886_v26 = vmul.f32 %v2909_v35, %v1870_v18 }
 0x2b7   :  { %v1891_v31 = vadd.f32 %v1890_v60, %v1871_v6  ;;  %v1892_v32 = vadd.f32 %v1890_v60, %v1872_v10  ;;  %v1893_v48 = vadd.f32 %v1890_v60, %v1873_v20  ;;  %v1894_v33 = vadd.f32 %v1890_v60, %v1874_v22 }
 0x2b8   :  { %v1895_v34 = vadd.f32 %v1890_v60, %v1875_v23  ;;  %v1896_v53 = vadd.f32 %v1890_v60, %v1876_v24  ;;  %v1897_v36 = vadd.f32 %v1890_v60, %v1877_v25  ;;  %v1898_v58 = vadd.f32 %v1890_v60, %v1878_v27 }
 0x2b9   :  { %v1899_v37 = vadd.f32 %v1890_v60, %v1879_v28  ;;  %v1900_v62 = vadd.f32 %v1890_v60, %v1880_v30  ;;  %v1901_v38 = vadd.f32 %v1890_v60, %v1881_v51  ;;  %v1902_v7 = vadd.f32 %v1890_v60, %v1882_v56  ;;  %1907 = vst [vmem:[%s3023_s5] sm:$0xff] %v1891_v31 }
 0x2ba   :  { %1908 = vst [vmem:[%s3023_s5 + $0x8] sm:$0xff] %v1892_v32  ;;  %1909 = vst [vmem:[%s3023_s5 + $0x10] sm:$0xff] %v1893_v48  ;;  %v1903_v15 = vadd.f32 %v1890_v60, %v1883_v1  ;;  %v1904_v19 = vadd.f32 %v1890_v60, %v1884_v4  ;;  %v1905_v21 = vadd.f32 %v1890_v60, %v1885_v11 }
 0x2bb   :  { %1910 = vst [vmem:[%s3023_s5 + $0x18] sm:$0xff] %v1894_v33  ;;  %v1906_v35 = vadd.f32 %v1890_v60, %v1886_v26  ;;  %1911 = vst [vmem:[%s3023_s5 + $0x20] sm:$0xff] %v1895_v34 }
 0x2bc   :  { %1912 = vst [vmem:[%s3023_s5 + $0x28] sm:$0xff] %v1896_v53  ;;  %1913 = vst [vmem:[%s3023_s5 + $0x30] sm:$0xff] %v1897_v36 }
 0x2bd   :  { %1914 = vst [vmem:[%s3023_s5 + $0x38] sm:$0xff] %v1898_v58  ;;  %1915 = vst [vmem:[%s3023_s5 + $0x40] sm:$0xff] %v1899_v37 }
 0x2be   :  { %1916 = vst [vmem:[%s3023_s5 + $0x48] sm:$0xff] %v1900_v62  ;;  %1917 = vst [vmem:[%s3023_s5 + $0x50] sm:$0xff] %v1901_v38 }
 0x2bf   :  { %1918 = vst [vmem:[%s3023_s5 + $0x58] sm:$0xff] %v1902_v7  ;;  %1919 = vst [vmem:[%s3023_s5 + $0x60] sm:$0xff] %v1903_v15 }
 0x2c0   :  { %1920 = vst [vmem:[%s3023_s5 + $0x68] sm:$0xff] %v1904_v19  ;;  %1921 = vst [vmem:[%s3023_s5 + $0x70] sm:$0xff] %v1905_v21 }
 0x2c1   :  { %1922 = vst [vmem:[%s3023_s5 + $0x78] sm:$0xff] %v1906_v35 }
 0x2c2   :  { %1927 = vsyncpa [#allocation3], 1 }

// kernel: generator_forward.5
= control target key start
LH: loop header
LB: loop body
LE: loop exit
PB: predicated region body
PF: predicated region fallthrough
CT: control target
= control target key end

     0   :  { %s2889_s28 = smov 64   ;;  %vm817_vm0 = vcmask 523264   ;;  %vm1884_vm1 = vcmask 97280   ;;  %s4367_s0 = inlined_call_operand.vmem [shape: f32[4,10,10,64], index: 0, kind: input, shape index: {}]   ;;  %s4368_s1 = inlined_call_operand.vmem [shape: bf16[576,12], index: 1, kind: input, shape index: {}]   ;;  %s4369_s2 = inlined_call_operand.vmem [shape: f32[1,12], index: 2, kind: input, shape index: {}]   ;;  %s4370_s3 = inlined_call_operand.vmem [shape: f32[256,12], index: 3, kind: output, shape index: {}]  }
   0x1   :  { %v2913_v0 = vld [vmem:[%s4367_s0 + $0x1f0] sm:$0xff]  ;;  %v2918_v1 = vld [vmem:[%s4367_s0 + $0x200] sm:$0xff]  ;;  %v2789_v54 = vld [vmem:[%s4368_s1 + $0x48] sm:$0xff]  }
   0x2   :  { %v2923_v2 = vld [vmem:[%s4367_s0 + $0x10] sm:$0xff]  ;;  %v2467_v3 = vpack.i.bf16 %v2918_v1, %v2913_v0  ;;  %v2930_v4 = vld [vmem:[%s4367_s0 + $0x20] sm:$0xff]  ;;  %v2790_v56 = vld [vmem:[%s4368_s1 + $0x8] sm:$0xff]  }
   0x3   :  { %v71_v5 = vld [vmem:[%s4367_s0 + $0x1e1] sm:$0xff]  ;;  %v72_v6 = vld [vmem:[%s4367_s0 + $0x1f1] sm:$0xff]  ;;  %v2477_v7 = vpack.i.bf16 %v2930_v4, %v2923_v2 }
   0x4   :  { %v47_v8 = vld [vmem:[%s4367_s0 + $0x1] sm:$0xff]  ;;  %v2946_v9 = vld [vmem:[%s4367_s0 + $0x11] sm:$0xff]  ;;  %2468 = vrot.lane.b32.xlu0 %v2467_v3, %s2889_s28  ;;  %v2472_v10 = vpack.i.bf16 %v72_v6, %v71_v5 }
   0x5   :  { %2478 = vrot.lane.b32.xlu1 %v2477_v7, %s2889_s28  ;;  %v2482_v11 = vpack.i.bf16 %v2946_v9, %v47_v8  ;;  %v2954_v12 = vld [vmem:[%s4367_s0 + $0x210] sm:$0xff]  ;;  %v2959_v13 = vld [vmem:[%s4367_s0 + $0x220] sm:$0xff]  ;;  %v2793_v62 = vld [vmem:[%s4368_s1 + $0x58] sm:$0xff]  }
   0x6   :  { %v73_v14 = vld [vmem:[%s4367_s0 + $0x201] sm:$0xff]  ;;  %v74_v15 = vld [vmem:[%s4367_s0 + $0x211] sm:$0xff]  ;;  %v2487_v16 = vpack.i.bf16 %v2959_v13, %v2954_v12 }
   0x7   :  { %v2971_v17 = vpack.i.bf16 %v74_v15, %v73_v14  ;;  %v2976_v18 = vld [vmem:[%s4367_s0 + $0x30] sm:$0xff]  ;;  %v2981_v19 = vld [vmem:[%s4367_s0 + $0x40] sm:$0xff]  ;;  %v2794_v8 = vld [vmem:[%s4368_s1 + $0x18] sm:$0xff]  }
   0x8   :  { %2473 = vrot.lane.b32.xlu0 %v2472_v10, %s2889_s28  ;;  %v2986_v20 = vld [vmem:[%s4367_s0 + $0x21] sm:$0xff]  ;;  %v50_v21 = vld [vmem:[%s4367_s0 + $0x31] sm:$0xff]  ;;  %v2497_v22 = vpack.i.bf16 %v2981_v19, %v2976_v18 }
   0x9   :  { %2483 = vrot.lane.b32.xlu1 %v2482_v11, %s2889_s28  ;;  %v2502_v23 = vpack.i.bf16 %v50_v21, %v2986_v20  ;;  %v3000_v24 = vld [vmem:[%s4367_s0 + $0x230] sm:$0xff]  ;;  %v3005_v25 = vld [vmem:[%s4367_s0 + $0x240] sm:$0xff] }
   0xa   :  { %v75_v26 = vld [vmem:[%s4367_s0 + $0x221] sm:$0xff]  ;;  %v76_v27 = vld [vmem:[%s4367_s0 + $0x231] sm:$0xff]  ;;  %v2507_v28 = vpack.i.bf16 %v3005_v25, %v3000_v24 }
   0xb   :  { %v3017_v29 = vpack.i.bf16 %v76_v27, %v75_v26  ;;  %v3022_v30 = vld [vmem:[%s4367_s0 + $0x50] sm:$0xff]  ;;  %v3027_v31 = vld [vmem:[%s4367_s0 + $0x60] sm:$0xff] }
   0xc   :  { %2488 = vrot.lane.b32.xlu0 %v2487_v16, %s2889_s28  ;;  %v51_v32 = vld [vmem:[%s4367_s0 + $0x41] sm:$0xff]  ;;  %v52_v33 = vld [vmem:[%s4367_s0 + $0x51] sm:$0xff]  ;;  %v2517_v34 = vpack.i.bf16 %v3027_v31, %v3022_v30 }
   0xd   :  { %2493 = vrot.lane.b32.xlu1 %v2971_v17, %s2889_s28  ;;  %v3040_v35 = vpack.i.bf16 %v52_v33, %v51_v32  ;;  %v3045_v36 = vld [vmem:[%s4367_s0 + $0x250] sm:$0xff]  ;;  %v1952_v37 = vld [vmem:[%s4367_s0 + $0x260] sm:$0xff] }
   0xe   :  { %v77_v38 = vld [vmem:[%s4367_s0 + $0x241] sm:$0xff]  ;;  %v78_v39 = vld [vmem:[%s4367_s0 + $0x251] sm:$0xff]  ;;  %v2527_v40 = vpack.i.bf16 %v1952_v37, %v3045_v36 }
   0xf   :  { %v3060_v41 = vpack.i.bf16 %v78_v39, %v77_v38  ;;  %v3065_v42 = vld [vmem:[%s4367_s0 + $0x70] sm:$0xff]  ;;  %v1928_v43 = vld [vmem:[%s4367_s0 + $0x80] sm:$0xff] }
  0x10   :  { %2498 = vrot.lane.b32.xlu0 %v2497_v22, %s2889_s28  ;;  %v53_v44 = vld [vmem:[%s4367_s0 + $0x61] sm:$0xff]  ;;  %v54_v45 = vld [vmem:[%s4367_s0 + $0x71] sm:$0xff]  ;;  %v2537_v46 = vpack.i.bf16 %v1928_v43, %v3065_v42 }
  0x11   :  { %2503 = vrot.lane.b32.xlu1 %v2502_v23, %s2889_s28  ;;  %v2787_v47 = vld [vmem:[%s4368_s1 + $0x40] sm:$0xff]   ;;  %v3083_v48 = vpack.i.bf16 %v54_v45, %v53_v44  ;;  %v3091_v50 = vld [vmem:[%s4367_s0 + $0x12] sm:$0xff]  ;;  %v2797_v22 = vld [vmem:[%s4368_s1 + $0x68] sm:$0xff]  }
  0x12   :  { %v2788_v49 = vld [vmem:[%s4368_s1] sm:$0xff]   ;;  %2450 = vmatprep.subr.bf16.mxu1 %v2787_v47  ;;  %2166 = vmatprep.subr.bf16.mxu0 %v2787_v47  ;;  %v1929_v52 = vld [vmem:[%s4367_s0 + $0xb0] sm:$0xff]  ;;  %v2801_v45 = vld [vmem:[%s4368_s1 + $0x78] sm:$0xff]  }
  0x13   :  { %v3096_v51 = vld [vmem:[%s4367_s0 + $0x22] sm:$0xff]  ;;  %2458 = vmatpush3.bf16.msra.mxu1 %v2788_v49  ;;  %2167 = vmatpush3.bf16.msra.mxu0 %v2788_v49  ;;  %v2791_v58 = vld [vmem:[%s4368_s1 + $0x50] sm:$0xff]  }
  0x14   :  { %2508 = vrot.lane.b32.xlu0 %v2507_v28, %s2889_s28  ;;  %v1930_v53 = vld [vmem:[%s4367_s0 + $0xc0] sm:$0xff]  ;;  %v2552_v57 = vpack.i.bf16 %v3096_v51, %v3091_v50  ;;  %2451 = vmatprep.subr.bf16.mxu1 %v2789_v54  ;;  %v56_v59 = vld [vmem:[%s4367_s0 + $0xb1] sm:$0xff]  ;;  %v2798_v28 = vld [vmem:[%s4368_s1 + $0x28] sm:$0xff]  }
  0x15   :  { %2513 = vrot.lane.b32.xlu1 %v3017_v29, %s2889_s28  ;;  %v55_v55 = vld [vmem:[%s4367_s0 + $0xa1] sm:$0xff]  ;;  %2168 = vmatprep.subr.bf16.mxu0 %v2789_v54  ;;  %v2792_v60 = vld [vmem:[%s4368_s1 + $0x10] sm:$0xff]   ;;  %v2557_v61 = vpack.i.bf16 %v1930_v53, %v1929_v52  ;;  %v2802_v53 = vld [vmem:[%s4368_s1 + $0x38] sm:$0xff]  }
  0x16   :  { %v2562_v63 = vpack.i.bf16 %v56_v59, %v55_v55  ;;  %v3135_v3 = vld [vmem:[%s4367_s0 + $0x32] sm:$0xff]  ;;  %v3140_v5 = vld [vmem:[%s4367_s0 + $0x42] sm:$0xff] }
  0x17   :  { %2459 = vmatpush3.bf16.msra.mxu1 %v2790_v56  ;;  %2169 = vmatpush3.bf16.msra.mxu0 %v2790_v56  ;;  %v1931_v6 = vld [vmem:[%s4367_s0 + $0xd0] sm:$0xff]  ;;  %v1932_v7 = vld [vmem:[%s4367_s0 + $0xe0] sm:$0xff]  ;;  %v2572_v11 = vpack.i.bf16 %v3140_v5, %v3135_v3 }
  0x18   :  { %2518 = vrot.lane.b32.xlu0 %v2517_v34, %s2889_s28  ;;  %2452 = vmatprep.subr.bf16.mxu1 %v2791_v58  ;;  %v2795_v10 = vld [vmem:[%s4368_s1 + $0x60] sm:$0xff]   ;;  %v58_v15 = vld [vmem:[%s4367_s0 + $0xd1] sm:$0xff]  ;;  %v2577_v21 = vpack.i.bf16 %v1932_v7, %v1931_v6 }
  0x19   :  { %2523 = vrot.lane.b32.xlu1 %v3040_v35, %s2889_s28  ;;  %2170 = vmatprep.subr.bf16.mxu0 %v2791_v58  ;;  %v57_v14 = vld [vmem:[%s4367_s0 + $0xc1] sm:$0xff]  ;;  %v3176_v26 = vld [vmem:[%s4367_s0 + $0x52] sm:$0xff] }
  0x1a   :  { %v2796_v16 = vld [vmem:[%s4368_s1 + $0x20] sm:$0xff]   ;;  %v2799_v32 = vld [vmem:[%s4368_s1 + $0x70] sm:$0xff]  }
  0x1b   :  { %2460 = vmatpush3.bf16.msra.mxu1 %v2792_v60  ;;  %2171 = vmatpush3.bf16.msra.mxu0 %v2792_v60  ;;  %v3181_v27 = vld [vmem:[%s4367_s0 + $0x62] sm:$0xff]  ;;  %v1933_v34 = vld [vmem:[%s4367_s0 + $0xf0] sm:$0xff] }
  0x1c   :  { %2528 = vrot.lane.b32.xlu0 %v2527_v40, %s2889_s28  ;;  %2453 = vmatprep.subr.bf16.mxu1 %v2793_v62  ;;  %v2592_v33 = vpack.i.bf16 %v3181_v27, %v3176_v26  ;;  %v59_v37 = vld [vmem:[%s4367_s0 + $0xe1] sm:$0xff]  ;;  %v60_v38 = vld [vmem:[%s4367_s0 + $0xf1] sm:$0xff] }
  0x1d   :  { %2533 = vrot.lane.b32.xlu1 %v3060_v41, %s2889_s28  ;;  %2172 = vmatprep.subr.bf16.mxu0 %v2793_v62  ;;  %v2055_v39 = vld [vmem:[%s4367_s0 + $0x81] sm:$0xff]  ;;  %v2056_v40 = vld [vmem:[%s4367_s0 + $0x91] sm:$0xff] }
  0x1e   :  { %v2800_v43 = vld [vmem:[%s4368_s1 + $0x30] sm:$0xff]   ;;  %v1992_v49 = vld [vmem:[%s4367_s0 + $0x82] sm:$0xff]  ;;  %v2607_v54 = vpack.i.bf16 %v2056_v40, %v2055_v39 }
  0x1f   :  { %2461 = vmatpush3.bf16.msra.mxu1 %v2794_v8  ;;  %2173 = vmatpush3.bf16.msra.mxu0 %v2794_v8  ;;  %v3223_v47 = vld [vmem:[%s4367_s0 + $0x72] sm:$0xff]  ;;  %v1936_v52 = vld [vmem:[%s4367_s0 + $0x120] sm:$0xff] }
  0x20   :  { %2538 = vrot.lane.b32.xlu0 %v2537_v46, %s2889_s28  ;;  %2454 = vmatprep.subr.bf16.mxu1 %v2795_v10  ;;  %v2602_v46 = vpack.i.bf16 %v60_v38, %v59_v37  ;;  %v61_v55 = vld [vmem:[%s4367_s0 + $0x101] sm:$0xff]  ;;  %v62_v59 = vld [vmem:[%s4367_s0 + $0x111] sm:$0xff] }
  0x21   :  { %2543 = vrot.lane.b32.xlu1 %v3083_v48, %s2889_s28  ;;  %2174 = vmatprep.subr.bf16.mxu0 %v2795_v10  ;;  %v2803_v56 = vld [vmem:[%s4368_s1 + $0xc0] sm:$0xff]   ;;  %v3259_v62 = vld [vmem:[%s4367_s0 + $0xb2] sm:$0xff] }
  0x22   :  { %v3249_v58 = vld [vmem:[%s4368_s1 + $0x100] sm:$0xff]   ;;  %v1937_v6 = vld [vmem:[%s4367_s0 + $0x150] sm:$0xff] }
  0x23   :  { %2462 = vmatpush3.bf16.msra.mxu1 %v2796_v16  ;;  %2175 = vmatpush3.bf16.msra.mxu0 %v2796_v16  ;;  %v1938_v7 = vld [vmem:[%s4367_s0 + $0x160] sm:$0xff]  ;;  %v3288_v16 = vld [vmem:[%s4367_s0 + $0xd2] sm:$0xff] }
  0x24   :  { %2548 = vrot.lane.b32.xlu0 %v2502_v23, %s2889_s28  ;;  %v2582_v23 = vpack.i.bf16 %v58_v15, %v57_v14  ;;  %2455 = vmatprep.subr.bf16.mxu1 %v2797_v22  ;;  %v63_v10 = vld [vmem:[%s4367_s0 + $0x141] sm:$0xff]  ;;  %v2637_v14 = vpack.i.bf16 %v1938_v7, %v1937_v6  ;;  %v3316_v37 = vld [vmem:[%s4367_s0 + $0xf2] sm:$0xff] }
  0x25   :  { %2553 = vrot.lane.b32.xlu1 %v2552_v57, %s2889_s28  ;;  %2176 = vmatprep.subr.bf16.mxu0 %v2797_v22  ;;  %v2612_v57 = vpack.i.bf16 %v1992_v49, %v3223_v47  ;;  %v1998_v38 = vld [vmem:[%s4367_s0 + $0x102] sm:$0xff]  ;;  %v1941_v40 = vld [vmem:[%s4367_s0 + $0x190] sm:$0xff] }
  0x26   :  { %v2672_v39 = vpack.i.bf16 %v1998_v38, %v3316_v37  ;;  %v2008_v38 = vld [vmem:[%s4367_s0 + $0x1c2] sm:$0xff] }
  0x27   :  { %2463 = vmatpush3.bf16.msra.mxu1 %v2798_v28  ;;  %2177 = vmatpush3.bf16.msra.mxu0 %v2798_v28  ;;  %v1940_v28 = vld [vmem:[%s4367_s0 + $0x180] sm:$0xff] }
  0x28   :  { %2558 = vrot.lane.b32.xlu0 %v2557_v61, %s2889_s28  ;;  %2456 = vmatprep.subr.bf16.mxu1 %v2799_v32  ;;  %v2622_v61 = vpack.i.bf16 %v62_v59, %v61_v55  ;;  %v1944_v59 = vld [vmem:[%s4367_s0 + $0x1c0] sm:$0xff] }
  0x29   :  { %2563 = vrot.lane.b32.xlu1 %v2562_v63, %s2889_s28  ;;  %2178 = vmatprep.subr.bf16.mxu0 %v2799_v32  ;;  %v3265_v63 = vld [vmem:[%s4367_s0 + $0xc2] sm:$0xff] }
  0x2a   :  { %v2632_v8 = vpack.i.bf16 %v3265_v63, %v3259_v62  ;;  %v65_v32 = vld [vmem:[%s4367_s0 + $0x161] sm:$0xff] }
  0x2b   :  { %2464 = vmatpush3.bf16.msra.mxu1 %v2800_v43  ;;  %2179 = vmatpush3.bf16.msra.mxu0 %v2800_v43  ;;  %v1942_v43 = vld [vmem:[%s4367_s0 + $0x1a0] sm:$0xff] }
  0x2c   :  { %2568 = vrot.lane.b32.xlu0 %v3040_v35, %s2889_s28  ;;  %v1934_v35 = vld [vmem:[%s4367_s0 + $0x100] sm:$0xff]  ;;  %2457 = vmatprep.subr.bf16.mxu1 %v2801_v45 }
  0x2d   :  { %2573 = vrot.lane.b32.xlu1 %v2572_v11, %s2889_s28  ;;  %v2597_v44 = vpack.i.bf16 %v1934_v35, %v1933_v34  ;;  %2180 = vmatprep.subr.bf16.mxu0 %v2801_v45  ;;  %v64_v11 = vld [vmem:[%s4367_s0 + $0x151] sm:$0xff] }
  0x2e   :  { %v2642_v15 = vpack.i.bf16 %v64_v11, %v63_v10  ;;  %v68_v45 = vld [vmem:[%s4367_s0 + $0x191] sm:$0xff]  ;;  %v2002_v10 = vld [vmem:[%s4367_s0 + $0x162] sm:$0xff] }
  0x2f   :  { %2465 = vmatpush3.bf16.msra.mxu1 %v2802_v53  ;;  %2181 = vmatpush3.bf16.msra.mxu0 %v2802_v53  ;;  %v1999_v53 = vld [vmem:[%s4367_s0 + $0x112] sm:$0xff] }
  0x30   :  { %2578 = vrot.lane.b32.xlu0 %v2577_v21, %s2889_s28  ;;  %2278 = vmatprep.subr.bf16.mxu1 %v2803_v56  ;;  %v3293_v21 = vld [vmem:[%s4367_s0 + $0xe2] sm:$0xff] }
  0x31   :  { %2583 = vrot.lane.b32.xlu1 %v2582_v23, %s2889_s28  ;;  %2410 = vmatprep.subr.bf16.mxu0 %v3249_v58  ;;  %v2652_v22 = vpack.i.bf16 %v3293_v21, %v3288_v16 }
  0x34   :  { %2588 = vrot.lane.b32.xlu0 %v3083_v48, %s2889_s28  ;;  %v1935_v48 = vld [vmem:[%s4367_s0 + $0x110] sm:$0xff] }
  0x35   :  { %2593 = vrot.lane.b32.xlu1 %v2592_v33, %s2889_s28  ;;  %v2617_v60 = vpack.i.bf16 %v1936_v52, %v1935_v48  ;;  %v66_v33 = vld [vmem:[%s4367_s0 + $0x171] sm:$0xff]  ;;  %v2063_v48 = vld [vmem:[%s4367_s0 + $0x121] sm:$0xff] }
  0x36   :  { %v2662_v35 = vpack.i.bf16 %v66_v33, %v65_v32  ;;  %v2064_v52 = vld [vmem:[%s4367_s0 + $0x131] sm:$0xff]  ;;  %v2071_v33 = vld [vmem:[%s4367_s0 + $0x1c1] sm:$0xff] }
  0x37   :  { %v2687_v55 = vpack.i.bf16 %v2064_v52, %v2063_v48 }
  0x38   :  { %2598 = vrot.lane.b32.xlu0 %v2597_v44, %s2889_s28  ;;  %v67_v44 = vld [vmem:[%s4367_s0 + $0x181] sm:$0xff] }
  0x39   :  { %2603 = vrot.lane.b32.xlu1 %v2602_v46, %s2889_s28  ;;  %v2682_v49 = vpack.i.bf16 %v68_v45, %v67_v44  ;;  %v3417_v44 = vld [vmem:[%s4367_s0 + $0x202] sm:$0xff] }
  0x3c   :  { %2608 = vrot.lane.b32.xlu0 %v2607_v54, %s2889_s28  ;;  %v2000_v54 = vld [vmem:[%s4367_s0 + $0x122] sm:$0xff] }
  0x3d   :  { %2613 = vrot.lane.b32.xlu1 %v2612_v57, %s2889_s28  ;;  %v2692_v56 = vpack.i.bf16 %v2000_v54, %v1999_v53  ;;  %v1943_v57 = vld [vmem:[%s4367_s0 + $0x1b0] sm:$0xff] }
  0x3e   :  { %v2697_v6 = vpack.i.bf16 %v1944_v59, %v1943_v57 }
  0x40   :  { %2618 = vrot.lane.b32.xlu0 %v2617_v60, %s2889_s28  ;;  %v69_v60 = vld [vmem:[%s4367_s0 + $0x1a1] sm:$0xff] }
  0x41   :  { %2623 = vrot.lane.b32.xlu1 %v2622_v61, %s2889_s28 }
  0x44   :  { %2628 = vrot.lane.b32.xlu0 %v2582_v23, %s2889_s28  ;;  %v1939_v23 = vld [vmem:[%s4367_s0 + $0x170] sm:$0xff] }
  0x45   :  { %2633 = vrot.lane.b32.xlu1 %v2632_v8, %s2889_s28  ;;  %v2657_v34 = vpack.i.bf16 %v1940_v28, %v1939_v23  ;;  %v3369_v8 = vld [vmem:[%s4367_s0 + $0x152] sm:$0xff]  ;;  %v2006_v28 = vld [vmem:[%s4367_s0 + $0x1a2] sm:$0xff] }
  0x46   :  { %v2712_v11 = vpack.i.bf16 %v2002_v10, %v3369_v8  ;;  %v2005_v23 = vld [vmem:[%s4367_s0 + $0x192] sm:$0xff] }
  0x47   :  { %v2732_v32 = vpack.i.bf16 %v2006_v28, %v2005_v23  ;;  %v39_v28 = vld [vmem:[%s4367_s0 + $0x1e0] sm:$0xff] }
  0x48   :  { %2638 = vrot.lane.b32.xlu0 %v2637_v14, %s2889_s28  ;;  %v2003_v14 = vld [vmem:[%s4367_s0 + $0x172] sm:$0xff] }
  0x49   :  { %2643 = vrot.lane.b32.xlu1 %v2642_v15, %s2889_s28  ;;  %v2004_v15 = vld [vmem:[%s4367_s0 + $0x182] sm:$0xff] }
  0x4c   :  { %2648 = vrot.lane.b32.xlu0 %v2602_v46, %s2889_s28  ;;  %v2677_v46 = vpack.i.bf16 %v1942_v43, %v1941_v40  ;;  %v104_v43 = vld [vmem:[%s4367_s0 + $0x1f2] sm:$0xff] }
  0x4d   :  { %2653 = vrot.lane.b32.xlu1 %v2652_v22, %s2889_s28  ;;  %v2722_v22 = vpack.i.bf16 %v2004_v15, %v2003_v14  ;;  %v2752_v45 = vpack.i.bf16 %v3417_v44, %v104_v43 }
  0x50   :  { %2658 = vrot.lane.b32.xlu0 %v2657_v34, %s2889_s28  ;;  %v2072_v34 = vld [vmem:[%s4367_s0 + $0x1d1] sm:$0xff] }
  0x51   :  { %2663 = vrot.lane.b32.xlu1 %v2662_v35, %s2889_s28 }
  0x54   :  { %2668 = vrot.lane.b32.xlu0 %v2622_v61, %s2889_s28  ;;  %v70_v61 = vld [vmem:[%s4367_s0 + $0x1b1] sm:$0xff] }
  0x55   :  { %2673 = vrot.lane.b32.xlu1 %v2672_v39, %s2889_s28  ;;  %v2702_v7 = vpack.i.bf16 %v70_v61, %v69_v60  ;;  %v2737_v39 = vpack.i.bf16 %v2072_v34, %v2071_v33  ;;  %v3447_v60 = vld [vmem:[%s4367_s0 + $0x232] sm:$0xff]  ;;  %v3452_v61 = vld [vmem:[%s4367_s0 + $0x242] sm:$0xff] }
  0x56   :  { %v2772_v10 = vpack.i.bf16 %v3452_v61, %v3447_v60 }
  0x58   :  { %2678 = vrot.lane.b32.xlu0 %v2677_v46, %s2889_s28  ;;  %v3426_v46 = vld [vmem:[%s4367_s0 + $0x212] sm:$0xff] }
  0x59   :  { %2683 = vrot.lane.b32.xlu1 %v2682_v49, %s2889_s28 }
  0x5c   :  { %2688 = vrot.lane.b32.xlu0 %v2687_v55, %s2889_s28 }
  0x5d   :  { %2693 = vrot.lane.b32.xlu1 %v2692_v56, %s2889_s28  ;;  %v79_v56 = vld [vmem:[%s4367_s0 + $0x2] sm:$0xff] }
  0x60   :  { %2698 = vrot.lane.b32.xlu0 %v2697_v6, %s2889_s28 }
  0x61   :  { %2703 = vrot.lane.b32.xlu1 %v2702_v7, %s2889_s28 }
  0x64   :  { %2708 = vrot.lane.b32.xlu0 %v2662_v35, %s2889_s28  ;;  %v3402_v35 = vld [vmem:[%s4367_s0 + $0x1b2] sm:$0xff] }
  0x65   :  { %2713 = vrot.lane.b32.xlu1 %v2712_v11, %s2889_s28  ;;  %v2742_v40 = vpack.i.bf16 %v2008_v38, %v3402_v35  ;;  %v2080_v11 = vld [vmem:[%s4367_s0 + $0x271] sm:$0xff] }
  0x68   :  { %2718 = vrot.lane.b32.xlu0 %v2682_v49, %s2889_s28  ;;  %v3431_v49 = vld [vmem:[%s4367_s0 + $0x222] sm:$0xff] }
  0x69   :  { %2723 = vrot.lane.b32.xlu1 %v2722_v22, %s2889_s28  ;;  %v2762_v48 = vpack.i.bf16 %v3431_v49, %v3426_v46 }
  0x6c   :  { %2728 = vrot.lane.b32.xlu0 %v2702_v7, %s2889_s28 }
  0x6d   :  { %2733 = vrot.lane.b32.xlu1 %v2732_v32, %s2889_s28 }
  0x70   :  { %2738 = vrot.lane.b32.xlu0 %v2737_v39, %s2889_s28  ;;  %v15_v39 = vld [vmem:[%s4367_s0] sm:$0xff] }
  0x71   :  { %2743 = vrot.lane.b32.xlu1 %v2742_v40, %s2889_s28 }
  0x74   :  { %2748 = vrot.lane.b32.xlu0 %v2971_v17, %s2889_s28  ;;  %v103_v17 = vld [vmem:[%s4367_s0 + $0x1e2] sm:$0xff] }
  0x75   :  { %2753 = vrot.lane.b32.xlu1 %v2752_v45, %s2889_s28 }
  0x76   :  { %v2469_v52 = vpop.permute.xlu0 %2468 }
  0x77   :  { %v2471_v53 = vunpack.i.h.bf16 %v2469_v52  ;;  %v2470_v54 = vunpack.i.l.bf16 %v2469_v52  ;;  %v2479_v55 = vpop.permute.xlu1 %2478 }
  0x78   :  { %v2481_v57 = vunpack.i.h.bf16 %v2479_v55  ;;  %v2480_v59 = vunpack.i.l.bf16 %v2479_v55  ;;  %2758 = vrot.lane.b32.xlu0 %v3017_v29, %s2889_s28  ;;  %v2079_v29 = vld [vmem:[%s4367_s0 + $0x261] sm:$0xff] }
  0x79   :  { %v874_v6 = vsel %vm817_vm0, %v103_v17, %v2470_v54  ;;  %v875_v7 = vsel %vm817_vm0, %v104_v43, %v2471_v53  ;;  %2763 = vrot.lane.b32.xlu1 %v2762_v48, %s2889_s28  ;;  %v2777_v45 = vpack.i.bf16 %v2080_v11, %v2079_v29  ;;  %v2804_v17 = vld [vmem:[%s4368_s1 + $0x80] sm:$0xff]  }
  0x7a   :  { %v2474_v14 = vpop.permute.xlu0 %2473  ;;  %v1007_v15 = vpack.c.bf16 %v875_v7, %v874_v6  ;;  %v850_v22 = vsel %vm817_vm0, %v79_v56, %v2480_v59  ;;  %v851_v23 = vsel %vm817_vm0, %v3091_v50, %v2481_v57  ;;  %v2016_v50 = vld [vmem:[%s4367_s0 + $0x262] sm:$0xff] }
  0x7b   :  { %v2476_v32 = vunpack.i.h.bf16 %v2474_v14  ;;  %v2475_v33 = vunpack.i.l.bf16 %v2474_v14  ;;  %v2484_v34 = vpop.permute.xlu1 %2483  ;;  %v947_v38 = vpack.c.bf16 %v851_v23, %v850_v22  ;;  %v2806_v56 = vld [vmem:[%s4368_s1 + $0xc8] sm:$0xff]  }
  0x7c   :  { %v2486_v40 = vunpack.i.h.bf16 %v2484_v34  ;;  %v2485_v43 = vunpack.i.l.bf16 %v2484_v34  ;;  %1497 = vmatprep.mubr.bf16.mxu1 %v1007_v15  ;;  %2768 = vrot.lane.b32.xlu0 %v3060_v41, %s2889_s28  ;;  %v2807_v14 = vld [vmem:[%s4368_s1 + $0x88] sm:$0xff]  }
  0x7d   :  { %1401 = vmatprep.mubr.bf16.mxu0 %v947_v38  ;;  %v842_v48 = vsel %vm817_vm0, %v39_v28, %v2475_v33  ;;  %v843_v52 = vsel %vm817_vm0, %v2913_v0, %v2476_v32  ;;  %2773 = vrot.lane.b32.xlu1 %v2772_v10, %s2889_s28  ;;  %v3495_v0 = vld [vmem:[%s4367_s0 + $0x252] sm:$0xff]  ;;  %v2819_v10 = vld [vmem:[%s4368_s1 + $0x108] sm:$0xff]  }
  0x7e   :  { %v2489_v53 = vpop.permute.xlu0 %2488  ;;  %v1006_v54 = vpack.c.bf16 %v843_v52, %v842_v48  ;;  %v818_v41 = vsel %vm817_vm0, %v15_v39, %v2485_v43  ;;  %v819_v55 = vsel %vm817_vm0, %v2923_v2, %v2486_v40  ;;  %v2782_v29 = vpack.i.bf16 %v2016_v50, %v3495_v0  ;;  %v2808_v32 = vld [vmem:[%s4368_s1 + $0xd0] sm:$0xff]  }
  0x7f   :  { %v2491_v57 = vunpack.i.h.bf16 %v2489_v53  ;;  %v2490_v59 = vunpack.i.l.bf16 %v2489_v53  ;;  %v2494_v6 = vpop.permute.xlu1 %2493  ;;  %v946_v7 = vpack.c.bf16 %v819_v55, %v818_v41  ;;  %v2822_v55 = vld [vmem:[%s4368_s1 + $0x118] sm:$0xff]  }
  0x80   :  { %v2496_v2 = vunpack.i.h.bf16 %v2494_v6  ;;  %v2495_v11 = vunpack.i.l.bf16 %v2494_v6  ;;  %1498 = vmatmul.mubr.bf16.vlgmr.msra.gmra.mrb[0].mxu1 %v1006_v54  ;;  %2778 = vrot.lane.b32.xlu0 %v2777_v45, %s2889_s28  ;;  %v2809_v45 = vld [vmem:[%s4368_s1 + $0x90] sm:$0xff]  }
  0x81   :  { %2279 = vmatpush3.bf16.msra.mxu1 %v2804_v17  ;;  %1402 = vmatmul.mubr.bf16.vlgmr.msra.gmra.mrb[0].mxu0 %v946_v7  ;;  %v876_v15 = vsel %vm817_vm0, %v3417_v44, %v2490_v59  ;;  %v877_v22 = vsel %vm817_vm0, %v3426_v46, %v2491_v57 }
  0x82   :  { %v2499_v23 = vpop.permute.xlu0 %2498  ;;  %2280 = vmatprep.subr.bf16.mxu1 %v2806_v56  ;;  %2411 = vmatpush3.bf16.msra.mxu0 %v3249_v58  ;;  %v1012_v28 = vpack.c.bf16 %v877_v22, %v876_v15  ;;  %v844_v33 = vsel %vm817_vm0, %v2918_v1, %v2495_v11  ;;  %v845_v34 = vsel %vm817_vm0, %v2954_v12, %v2496_v2  ;;  %v2821_v58 = vld [vmem:[%s4368_s1 + $0x110] sm:$0xff]  }
  0x83   :  { %v2501_v38 = vunpack.i.h.bf16 %v2499_v23  ;;  %v2500_v44 = vunpack.i.l.bf16 %v2499_v23  ;;  %v2504_v39 = vpop.permute.xlu1 %2503  ;;  %2412 = vmatprep.subr.bf16.mxu0 %v2819_v10  ;;  %2783 = vrot.lane.b32.xlu1 %v2782_v29, %s2889_s28  ;;  %v1011_v43 = vpack.c.bf16 %v845_v34, %v844_v33 }
  0x84   :  { %v2506_v46 = vunpack.i.h.bf16 %v2504_v39  ;;  %v2505_v40 = vunpack.i.l.bf16 %v2504_v39  ;;  %1505 = vmatprep.mubr.bf16.mxu1 %v1012_v28 }
  0x85   :  { %2281 = vmatpush3.bf16.msra.mxu1 %v2807_v14  ;;  %v852_v1 = vsel %vm817_vm0, %v3096_v51, %v2500_v44  ;;  %v853_v12 = vsel %vm817_vm0, %v3135_v3, %v2501_v38  ;;  %v2810_v51 = vld [vmem:[%s4368_s1 + $0xd8] sm:$0xff]  }
  0x86   :  { %v2509_v50 = vpop.permute.xlu0 %2508  ;;  %2282 = vmatprep.subr.bf16.mxu1 %v2808_v32  ;;  %v952_v48 = vpack.c.bf16 %v853_v12, %v852_v1  ;;  %v820_v52 = vsel %vm817_vm0, %v2930_v4, %v2505_v40  ;;  %v821_v17 = vsel %vm817_vm0, %v2976_v18, %v2506_v46  ;;  %2413 = vmatpush3.bf16.msra.mxu0 %v2819_v10  ;;  %v2811_v4 = vld [vmem:[%s4368_s1 + $0x98] sm:$0xff]   ;;  %v2812_v10 = vld [vmem:[%s4368_s1 + $0xe0] sm:$0xff]   ;;  %v2816_v12 = vld [vmem:[%s4368_s1 + $0xf0] sm:$0xff]  }
  0x87   :  { %v2511_v53 = vunpack.i.h.bf16 %v2509_v50  ;;  %v2510_v3 = vunpack.i.l.bf16 %v2509_v50  ;;  %v2514_v54 = vpop.permute.xlu1 %2513  ;;  %v951_v41 = vpack.c.bf16 %v821_v17, %v820_v52  ;;  %2414 = vmatprep.subr.bf16.mxu0 %v2821_v58 }
  0x88   :  { %v2516_v56 = vunpack.i.h.bf16 %v2514_v54  ;;  %v2515_v57 = vunpack.i.l.bf16 %v2514_v54  ;;  %1409 = vmatprep.mubr.bf16.mxu0 %v952_v48  ;;  %1506 = vmatmul.mubr.bf16.gmra.mrb[4].mxu1 %v1011_v43 }
  0x89   :  { %2283 = vmatpush3.bf16.msra.mxu1 %v2809_v45  ;;  %1410 = vmatmul.mubr.bf16.gmra.mrb[4].mxu0 %v951_v41  ;;  %v878_v18 = vsel %vm817_vm0, %v3431_v49, %v2510_v3  ;;  %v879_v59 = vsel %vm817_vm0, %v3447_v60, %v2511_v53 }
  0x8a   :  { %v2519_v6 = vpop.permute.xlu0 %2518  ;;  %2284 = vmatprep.subr.bf16.mxu1 %v2810_v51  ;;  %v1017_v7 = vpack.c.bf16 %v879_v59, %v878_v18  ;;  %v846_v29 = vsel %vm817_vm0, %v2959_v13, %v2515_v57  ;;  %v847_v2 = vsel %vm817_vm0, %v3000_v24, %v2516_v56  ;;  %2415 = vmatpush3.bf16.msra.mxu0 %v2821_v58  ;;  %v2813_v13 = vld [vmem:[%s4368_s1 + $0xa0] sm:$0xff]   ;;  %v2018_v56 = vld [vmem:[%s4367_s0 + $0x30] sm:$0xff] }
  0x8b   :  { %v2521_v11 = vunpack.i.h.bf16 %v2519_v6  ;;  %v2520_v14 = vunpack.i.l.bf16 %v2519_v6  ;;  %v2524_v49 = vpop.permute.xlu1 %2523  ;;  %2416 = vmatprep.subr.bf16.mxu0 %v2822_v55  ;;  %v1016_v22 = vpack.c.bf16 %v847_v2, %v846_v29 }
  0x8c   :  { %v2526_v15 = vunpack.i.h.bf16 %v2524_v49  ;;  %v2525_v60 = vunpack.i.l.bf16 %v2524_v49  ;;  %1513 = vmatprep.mubr.bf16.mxu1 %v1017_v7  ;;  %v87_v49 = vld [vmem:[%s4367_s0 + $0xa2] sm:$0xff] }
  0x8d   :  { %2285 = vmatpush3.bf16.msra.mxu1 %v2811_v4  ;;  %v854_v23 = vsel %vm817_vm0, %v3140_v5, %v2520_v14  ;;  %v855_v28 = vsel %vm817_vm0, %v3176_v26, %v2521_v11  ;;  %v2814_v5 = vld [vmem:[%s4368_s1 + $0xe8] sm:$0xff]  }
  0x8e   :  { %v2529_v24 = vpop.permute.xlu0 %2528  ;;  %2286 = vmatprep.subr.bf16.mxu1 %v2812_v10  ;;  %v957_v32 = vpack.c.bf16 %v855_v28, %v854_v23  ;;  %v822_v33 = vsel %vm817_vm0, %v2981_v19, %v2525_v60  ;;  %v823_v34 = vsel %vm817_vm0, %v3022_v30, %v2526_v15  ;;  %2417 = vmatpush3.bf16.msra.mxu0 %v2822_v55  ;;  %v2815_v19 = vld [vmem:[%s4368_s1 + $0xa8] sm:$0xff]   ;;  %v23_v23 = vld [vmem:[%s4367_s0 + $0xa0] sm:$0xff] }
  0x8f   :  { %v2531_v38 = vunpack.i.h.bf16 %v2529_v24  ;;  %v2530_v26 = vunpack.i.l.bf16 %v2529_v24  ;;  %v2534_v44 = vpop.permute.xlu1 %2533  ;;  %v956_v39 = vpack.c.bf16 %v823_v34, %v822_v33 }
  0x90   :  { %v2536_v58 = vunpack.i.h.bf16 %v2534_v44  ;;  %v2535_v46 = vunpack.i.l.bf16 %v2534_v44  ;;  %1417 = vmatprep.mubr.bf16.mxu0 %v957_v32  ;;  %1514 = vmatmul.mubr.bf16.gmra.mrb[8].mxu1 %v1016_v22  ;;  %v2020_v44 = vld [vmem:[%s4367_s0 + $0x50] sm:$0xff] }
  0x91   :  { %2287 = vmatpush3.bf16.msra.mxu1 %v2813_v13  ;;  %1418 = vmatmul.mubr.bf16.gmra.mrb[8].mxu0 %v956_v39  ;;  %v880_v30 = vsel %vm817_vm0, %v3452_v61, %v2530_v26  ;;  %v881_v40 = vsel %vm817_vm0, %v3495_v0, %v2531_v38  ;;  %v2019_v26 = vld [vmem:[%s4367_s0 + $0x40] sm:$0xff] }
  0x92   :  { %v2539_v43 = vpop.permute.xlu0 %2538  ;;  %2288 = vmatprep.subr.bf16.mxu1 %v2814_v5  ;;  %v1022_v1 = vpack.c.bf16 %v881_v40, %v880_v30  ;;  %v848_v45 = vsel %vm817_vm0, %v3005_v25, %v2535_v46  ;;  %v849_v50 = vsel %vm817_vm0, %v3045_v36, %v2536_v58  ;;  %v2817_v25 = vld [vmem:[%s4368_s1 + $0xb0] sm:$0xff]   ;;  %v1956_v30 = vld [vmem:[%s4367_s0 + $0x41] sm:$0xff] }
  0x93   :  { %v2541_v48 = vunpack.i.h.bf16 %v2539_v43  ;;  %v2540_v52 = vunpack.i.l.bf16 %v2539_v43  ;;  %v2544_v17 = vpop.permute.xlu1 %2543  ;;  %v1021_v0 = vpack.c.bf16 %v849_v50, %v848_v45 }
  0x94   :  { %v2546_v61 = vunpack.i.h.bf16 %v2544_v17  ;;  %v2545_v51 = vunpack.i.l.bf16 %v2544_v17  ;;  %1521 = vmatprep.mubr.bf16.mxu1 %v1022_v1 }
  0x95   :  { %2289 = vmatpush3.bf16.msra.mxu1 %v2815_v19  ;;  %v856_v53 = vsel %vm817_vm0, %v3181_v27, %v2540_v52  ;;  %v857_v3 = vsel %vm817_vm0, %v3223_v47, %v2541_v48  ;;  %v2818_v27 = vld [vmem:[%s4368_s1 + $0xf8] sm:$0xff]   ;;  %v2017_v47 = vld [vmem:[%s4367_s0 + $0x20] sm:$0xff] }
  0x96   :  { %v2549_v54 = vpop.permute.xlu0 %2548  ;;  %2290 = vmatprep.subr.bf16.mxu1 %v2816_v12  ;;  %v962_v36 = vpack.c.bf16 %v857_v3, %v856_v53  ;;  %v824_v41 = vsel %vm817_vm0, %v3027_v31, %v2545_v51  ;;  %v825_v55 = vsel %vm817_vm0, %v3065_v42, %v2546_v61  ;;  %v2820_v42 = vld [vmem:[%s4368_s1 + $0xb8] sm:$0xff]   ;;  %v3647_v53 = vld [vmem:[%s4367_s0 + $0xd0] sm:$0xff] }
  0x97   :  { %v2551_v57 = vunpack.i.h.bf16 %v2549_v54  ;;  %v2550_v4 = vunpack.i.l.bf16 %v2549_v54  ;;  %v2554_v18 = vpop.permute.xlu1 %2553  ;;  %v961_v59 = vpack.c.bf16 %v825_v55, %v824_v41 }
  0x98   :  { %v2556_v31 = vunpack.i.h.bf16 %v2554_v18  ;;  %v2555_v6 = vunpack.i.l.bf16 %v2554_v18  ;;  %1425 = vmatprep.mubr.bf16.mxu0 %v962_v36  ;;  %1522 = vmatmul.mubr.bf16.gmra.mrb[12].mxu1 %v1021_v0  ;;  %v3642_v0 = vld [vmem:[%s4367_s0 + $0xc0] sm:$0xff] }
  0x99   :  { %2291 = vmatpush3.bf16.msra.mxu1 %v2817_v25  ;;  %1426 = vmatmul.mubr.bf16.gmra.mrb[12].mxu0 %v961_v59  ;;  %v914_v7 = vsel %vm817_vm0, %v2017_v47, %v2550_v4  ;;  %v915_v10 = vsel %vm817_vm0, %v2018_v56, %v2551_v57  ;;  %v2021_v57 = vld [vmem:[%s4367_s0 + $0x60] sm:$0xff]  ;;  %v2022_v4 = vld [vmem:[%s4367_s0 + $0x70] sm:$0xff] }
  0x9a   :  { %v883_v29 = vsel %vm817_vm0, %v2986_v20, %v2556_v31  ;;  %v882_v2 = vsel %vm817_vm0, %v2946_v9, %v2555_v6  ;;  %v2559_v11 = vpop.permute.xlu0 %2558  ;;  %2292 = vmatprep.subr.bf16.mxu1 %v2818_v27  ;;  %v949_v14 = vpack.c.bf16 %v915_v10, %v914_v7  ;;  %v24_v20 = vld [vmem:[%s4367_s0 + $0xb0] sm:$0xff]  ;;  %v1958_v6 = vld [vmem:[%s4367_s0 + $0x61] sm:$0xff] }
  0x9b   :  { %v2561_v15 = vunpack.i.h.bf16 %v2559_v11  ;;  %v2560_v60 = vunpack.i.l.bf16 %v2559_v11  ;;  %v2564_v22 = vpop.permute.xlu1 %2563  ;;  %v948_v28 = vpack.c.bf16 %v883_v29, %v882_v2  ;;  %v1957_v31 = vld [vmem:[%s4367_s0 + $0x51] sm:$0xff] }
  0x9c   :  { %v2566_v9 = vunpack.i.h.bf16 %v2564_v22  ;;  %v2565_v13 = vunpack.i.l.bf16 %v2564_v22  ;;  %1562 = vmatprep.mubr.bf16.mxu1 %v949_v14 }
  0x9d   :  { %2293 = vmatpush3.bf16.msra.mxu1 %v2820_v42  ;;  %v858_v24 = vsel %vm817_vm0, %v87_v49, %v2560_v60  ;;  %v859_v32 = vsel %vm817_vm0, %v3259_v62, %v2561_v15  ;;  %v1955_v62 = vld [vmem:[%s4367_s0 + $0x31] sm:$0xff] }
  0x9e   :  { %v2569_v33 = vpop.permute.xlu0 %2568  ;;  %v967_v34 = vpack.c.bf16 %v859_v32, %v858_v24  ;;  %v826_v5 = vsel %vm817_vm0, %v23_v23, %v2565_v13  ;;  %v827_v38 = vsel %vm817_vm0, %v24_v20, %v2566_v9  ;;  %v3676_v23 = vld [vmem:[%s4367_s0 + $0xe0] sm:$0xff]  ;;  %v3681_v20 = vld [vmem:[%s4367_s0 + $0xf0] sm:$0xff] }
  0x9f   :  { %v2571_v39 = vunpack.i.h.bf16 %v2569_v33  ;;  %v2570_v58 = vunpack.i.l.bf16 %v2569_v33  ;;  %v2574_v46 = vpop.permute.xlu1 %2573  ;;  %v966_v19 = vpack.c.bf16 %v827_v38, %v826_v5 }
  0xa0   :  { %v2576_v40 = vunpack.i.h.bf16 %v2574_v46  ;;  %v2575_v43 = vunpack.i.l.bf16 %v2574_v46  ;;  %1433 = vmatprep.mubr.bf16.mxu0 %v967_v34  ;;  %1563 = vmatmul.mubr.bf16.vlgmr.msra.gmra.mrb[16].mxu1 %v948_v28  ;;  %v1959_v46 = vld [vmem:[%s4367_s0 + $0x71] sm:$0xff] }
  0xa1   :  { %1434 = vmatmul.mubr.bf16.gmra.mrb[16].mxu0 %v966_v19  ;;  %v916_v1 = vsel %vm817_vm0, %v2019_v26, %v2570_v58  ;;  %v917_v12 = vsel %vm817_vm0, %v2020_v44, %v2571_v39  ;;  %v2023_v26 = vld [vmem:[%s4367_s0 + $0x80] sm:$0xff]  ;;  %v2024_v44 = vld [vmem:[%s4367_s0 + $0x90] sm:$0xff] }
  0xa2   :  { %v2579_v45 = vpop.permute.xlu0 %2578  ;;  %v954_v50 = vpack.c.bf16 %v917_v12, %v916_v1  ;;  %v884_v48 = vsel %vm817_vm0, %v1955_v62, %v2575_v43  ;;  %v885_v52 = vsel %vm817_vm0, %v1956_v30, %v2576_v40  ;;  %v1960_v19 = vld [vmem:[%s4367_s0 + $0x81] sm:$0xff] }
  0xa3   :  { %v2581_v17 = vunpack.i.h.bf16 %v2579_v45  ;;  %v2580_v61 = vunpack.i.l.bf16 %v2579_v45  ;;  %v2584_v51 = vpop.permute.xlu1 %2583  ;;  %v953_v54 = vpack.c.bf16 %v885_v52, %v884_v48  ;;  %v3708_v45 = vld [vmem:[%s4367_s0 + $0x102] sm:$0xff] }
  0xa4   :  { %v2586_v3 = vunpack.i.h.bf16 %v2584_v51  ;;  %v2585_v25 = vunpack.i.l.bf16 %v2584_v51  ;;  %1570 = vmatprep.mubr.bf16.mxu1 %v954_v50  ;;  %v3713_v50 = vld [vmem:[%s4367_s0 + $0x112] sm:$0xff] }
  0xa5   :  { %v860_v36 = vsel %vm817_vm0, %v3265_v63, %v2580_v61  ;;  %v861_v41 = vsel %vm817_vm0, %v3288_v16, %v2581_v17 }
  0xa6   :  { %v2589_v55 = vpop.permute.xlu0 %2588  ;;  %v972_v27 = vpack.c.bf16 %v861_v41, %v860_v36  ;;  %v828_v47 = vsel %vm817_vm0, %v3642_v0, %v2585_v25  ;;  %v829_v56 = vsel %vm817_vm0, %v3647_v53, %v2586_v3  ;;  %v3720_v3 = vld [vmem:[%s4367_s0 + $0x100] sm:$0xff]  ;;  %v3725_v25 = vld [vmem:[%s4367_s0 + $0x110] sm:$0xff] }
  0xa7   :  { %v2591_v63 = vunpack.i.h.bf16 %v2589_v55  ;;  %v2590_v18 = vunpack.i.l.bf16 %v2589_v55  ;;  %v2594_v59 = vpop.permute.xlu1 %2593  ;;  %v971_v16 = vpack.c.bf16 %v829_v56, %v828_v47 }
  0xa8   :  { %v2596_v42 = vunpack.i.h.bf16 %v2594_v59  ;;  %v2595_v7 = vunpack.i.l.bf16 %v2594_v59  ;;  %1441 = vmatprep.mubr.bf16.mxu0 %v972_v27  ;;  %1571 = vmatmul.mubr.bf16.gmra.mrb[20].mxu1 %v953_v54 }
  0xa9   :  { %1442 = vmatmul.mubr.bf16.gmra.mrb[20].mxu0 %v971_v16  ;;  %v918_v10 = vsel %vm817_vm0, %v2021_v57, %v2590_v18  ;;  %v919_v29 = vsel %vm817_vm0, %v2022_v4, %v2591_v63 }
  0xaa   :  { %v2599_v2 = vpop.permute.xlu0 %2598  ;;  %v959_v11 = vpack.c.bf16 %v919_v29, %v918_v10  ;;  %v886_v14 = vsel %vm817_vm0, %v1957_v31, %v2595_v7  ;;  %v887_v49 = vsel %vm817_vm0, %v1958_v6, %v2596_v42  ;;  %v1961_v31 = vld [vmem:[%s4367_s0 + $0xb1] sm:$0xff]  ;;  %v1962_v6 = vld [vmem:[%s4367_s0 + $0xc1] sm:$0xff] }
  0xab   :  { %v2601_v15 = vunpack.i.h.bf16 %v2599_v2  ;;  %v2600_v60 = vunpack.i.l.bf16 %v2599_v2  ;;  %v2604_v22 = vpop.permute.xlu1 %2603  ;;  %v958_v13 = vpack.c.bf16 %v887_v49, %v886_v14  ;;  %v95_v14 = vld [vmem:[%s4367_s0 + $0x142] sm:$0xff] }
  0xac   :  { %v2606_v28 = vunpack.i.h.bf16 %v2604_v22  ;;  %v2605_v9 = vunpack.i.l.bf16 %v2604_v22  ;;  %1578 = vmatprep.mubr.bf16.mxu1 %v959_v11 }
  0xad   :  { %v862_v24 = vsel %vm817_vm0, %v3293_v21, %v2600_v60  ;;  %v863_v32 = vsel %vm817_vm0, %v3316_v37, %v2601_v15 }
  0xae   :  { %v2609_v33 = vpop.permute.xlu0 %2608  ;;  %v977_v34 = vpack.c.bf16 %v863_v32, %v862_v24  ;;  %v830_v5 = vsel %vm817_vm0, %v3676_v23, %v2605_v9  ;;  %v831_v38 = vsel %vm817_vm0, %v3681_v20, %v2606_v28 }
  0xaf   :  { %v2611_v21 = vunpack.i.h.bf16 %v2609_v33  ;;  %v2610_v39 = vunpack.i.l.bf16 %v2609_v33  ;;  %v2614_v58 = vpop.permute.xlu1 %2613  ;;  %v976_v37 = vpack.c.bf16 %v831_v38, %v830_v5 }
  0xb0   :  { %v2616_v62 = vunpack.i.h.bf16 %v2614_v58  ;;  %v2615_v30 = vunpack.i.l.bf16 %v2614_v58  ;;  %1449 = vmatprep.mubr.bf16.mxu0 %v977_v34  ;;  %1579 = vmatmul.mubr.bf16.gmra.mrb[24].mxu1 %v958_v13 }
  0xb1   :  { %1450 = vmatmul.mubr.bf16.gmra.mrb[24].mxu0 %v976_v37  ;;  %v920_v40 = vsel %vm817_vm0, %v2023_v26, %v2610_v39  ;;  %v921_v43 = vsel %vm817_vm0, %v2024_v44, %v2611_v21  ;;  %v1963_v37 = vld [vmem:[%s4367_s0 + $0xd1] sm:$0xff] }
  0xb2   :  { %v2619_v1 = vpop.permute.xlu0 %2618  ;;  %v964_v12 = vpack.c.bf16 %v921_v43, %v920_v40  ;;  %v888_v48 = vsel %vm817_vm0, %v1959_v46, %v2615_v30  ;;  %v889_v52 = vsel %vm817_vm0, %v1960_v19, %v2616_v62  ;;  %v1964_v46 = vld [vmem:[%s4367_s0 + $0xe1] sm:$0xff] }
  0xb3   :  { %v2621_v17 = vunpack.i.h.bf16 %v2619_v1  ;;  %v2620_v61 = vunpack.i.l.bf16 %v2619_v1  ;;  %v2624_v51 = vpop.permute.xlu1 %2623  ;;  %v963_v41 = vpack.c.bf16 %v889_v52, %v888_v48  ;;  %v3774_v1 = vld [vmem:[%s4367_s0 + $0x162] sm:$0xff] }
  0xb4   :  { %v2626_v54 = vunpack.i.h.bf16 %v2624_v51  ;;  %v2625_v36 = vunpack.i.l.bf16 %v2624_v51  ;;  %1586 = vmatprep.mubr.bf16.mxu1 %v964_v12  ;;  %v3779_v12 = vld [vmem:[%s4367_s0 + $0x172] sm:$0xff] }
  0xb5   :  { %v864_v55 = vsel %vm817_vm0, %v3708_v45, %v2620_v61  ;;  %v865_v27 = vsel %vm817_vm0, %v3713_v50, %v2621_v17  ;;  %v3791_v51 = vld [vmem:[%s4367_s0 + $0x170] sm:$0xff] }
  0xb6   :  { %v2629_v47 = vpop.permute.xlu0 %2628  ;;  %v982_v56 = vpack.c.bf16 %v865_v27, %v864_v55  ;;  %v832_v57 = vsel %vm817_vm0, %v3720_v3, %v2625_v36  ;;  %v833_v4 = vsel %vm817_vm0, %v3725_v25, %v2626_v54 }
  0xb7   :  { %v2631_v63 = vunpack.i.h.bf16 %v2629_v47  ;;  %v2630_v18 = vunpack.i.l.bf16 %v2629_v47  ;;  %v2634_v59 = vpop.permute.xlu1 %2633  ;;  %v981_v16 = vpack.c.bf16 %v833_v4, %v832_v57 }
  0xb8   :  { %v2636_v42 = vunpack.i.h.bf16 %v2634_v59  ;;  %v2635_v7 = vunpack.i.l.bf16 %v2634_v59  ;;  %1457 = vmatprep.mubr.bf16.mxu0 %v982_v56  ;;  %1587 = vmatmul.mubr.bf16.gmra.mrb[28].mxu1 %v963_v41 }
  0xb9   :  { %1458 = vmatmul.mubr.bf16.gmra.mrb[28].mxu0 %v981_v16  ;;  %v922_v10 = vsel %vm817_vm0, %v3642_v0, %v2630_v18  ;;  %v923_v29 = vsel %vm817_vm0, %v3647_v53, %v2631_v63  ;;  %v31_v0 = vld [vmem:[%s4367_s0 + $0x140] sm:$0xff]  ;;  %v32_v53 = vld [vmem:[%s4367_s0 + $0x150] sm:$0xff] }
  0xba   :  { %v2639_v2 = vpop.permute.xlu0 %2638  ;;  %v969_v11 = vpack.c.bf16 %v923_v29, %v922_v10  ;;  %v890_v49 = vsel %vm817_vm0, %v1961_v31, %v2635_v7  ;;  %v891_v15 = vsel %vm817_vm0, %v1962_v6, %v2636_v42  ;;  %v1965_v31 = vld [vmem:[%s4367_s0 + $0xf1] sm:$0xff]  ;;  %v1966_v6 = vld [vmem:[%s4367_s0 + $0x101] sm:$0xff] }
  0xbb   :  { %v2641_v60 = vunpack.i.h.bf16 %v2639_v2  ;;  %v2640_v22 = vunpack.i.l.bf16 %v2639_v2  ;;  %v2644_v28 = vpop.permute.xlu1 %2643  ;;  %v968_v24 = vpack.c.bf16 %v891_v15, %v890_v49  ;;  %v3819_v49 = vld [vmem:[%s4367_s0 + $0x192] sm:$0xff] }
  0xbc   :  { %v2646_v9 = vunpack.i.h.bf16 %v2644_v28  ;;  %v2645_v13 = vunpack.i.l.bf16 %v2644_v28  ;;  %1594 = vmatprep.mubr.bf16.mxu1 %v969_v11 }
  0xbd   :  { %v866_v32 = vsel %vm817_vm0, %v95_v14, %v2640_v22  ;;  %v867_v33 = vsel %vm817_vm0, %v3369_v8, %v2641_v60  ;;  %v3814_v14 = vld [vmem:[%s4367_s0 + $0x182] sm:$0xff] }
  0xbe   :  { %v2649_v34 = vpop.permute.xlu0 %2648  ;;  %v987_v5 = vpack.c.bf16 %v867_v33, %v866_v32  ;;  %v834_v38 = vsel %vm817_vm0, %v31_v0, %v2645_v13  ;;  %v835_v26 = vsel %vm817_vm0, %v32_v53, %v2646_v9  ;;  %v3831_v0 = vld [vmem:[%s4367_s0 + $0x190] sm:$0xff] }
  0xbf   :  { %v2651_v44 = vunpack.i.h.bf16 %v2649_v34  ;;  %v2650_v21 = vunpack.i.l.bf16 %v2649_v34  ;;  %v2654_v39 = vpop.permute.xlu1 %2653  ;;  %v986_v58 = vpack.c.bf16 %v835_v26, %v834_v38  ;;  %v2031_v26 = vld [vmem:[%s4367_s0 + $0x120] sm:$0xff] }
  0xc0   :  { %v2656_v19 = vunpack.i.h.bf16 %v2654_v39  ;;  %v2655_v8 = vunpack.i.l.bf16 %v2654_v39  ;;  %1465 = vmatprep.mubr.bf16.mxu0 %v987_v5  ;;  %1595 = vmatmul.mubr.bf16.gmra.mrb[32].mxu1 %v968_v24 }
  0xc1   :  { %1466 = vmatmul.mubr.bf16.gmra.mrb[32].mxu0 %v986_v58  ;;  %v924_v62 = vsel %vm817_vm0, %v3676_v23, %v2650_v21  ;;  %v925_v30 = vsel %vm817_vm0, %v3681_v20, %v2651_v44  ;;  %v3786_v20 = vld [vmem:[%s4367_s0 + $0x160] sm:$0xff]  ;;  %v2032_v44 = vld [vmem:[%s4367_s0 + $0x130] sm:$0xff] }
  0xc2   :  { %v2659_v40 = vpop.permute.xlu0 %2658  ;;  %v974_v43 = vpack.c.bf16 %v925_v30, %v924_v62  ;;  %v892_v48 = vsel %vm817_vm0, %v1963_v37, %v2655_v8  ;;  %v893_v52 = vsel %vm817_vm0, %v1964_v46, %v2656_v19  ;;  %v1967_v46 = vld [vmem:[%s4367_s0 + $0x111] sm:$0xff]  ;;  %v1968_v19 = vld [vmem:[%s4367_s0 + $0x121] sm:$0xff] }
  0xc3   :  { %v2661_v23 = vunpack.i.h.bf16 %v2659_v40  ;;  %v2660_v17 = vunpack.i.l.bf16 %v2659_v40  ;;  %v2664_v61 = vpop.permute.xlu1 %2663  ;;  %v973_v41 = vpack.c.bf16 %v893_v52, %v892_v48  ;;  %v3858_v52 = vld [vmem:[%s4367_s0 + $0x1a2] sm:$0xff] }
  0xc4   :  { %v2666_v54 = vunpack.i.h.bf16 %v2664_v61  ;;  %v2665_v36 = vunpack.i.l.bf16 %v2664_v61  ;;  %1602 = vmatprep.mubr.bf16.mxu1 %v974_v43  ;;  %v3865_v61 = vld [vmem:[%s4367_s0 + $0x1a0] sm:$0xff] }
  0xc5   :  { %v868_v55 = vsel %vm817_vm0, %v3774_v1, %v2660_v17  ;;  %v869_v27 = vsel %vm817_vm0, %v3779_v12, %v2661_v23 }
  0xc6   :  { %v2669_v47 = vpop.permute.xlu0 %2668  ;;  %v992_v56 = vpack.c.bf16 %v869_v27, %v868_v55  ;;  %v836_v57 = vsel %vm817_vm0, %v3786_v20, %v2665_v36  ;;  %v837_v4 = vsel %vm817_vm0, %v3791_v51, %v2666_v54  ;;  %v3870_v55 = vld [vmem:[%s4367_s0 + $0x1b0] sm:$0xff]  ;;  %v2081_v27 = vld [vmem:[%s4367_s0 + $0x22] sm:$0xff] }
  0xc7   :  { %v2671_v63 = vunpack.i.h.bf16 %v2669_v47  ;;  %v2670_v18 = vunpack.i.l.bf16 %v2669_v47  ;;  %v2674_v59 = vpop.permute.xlu1 %2673  ;;  %v991_v16 = vpack.c.bf16 %v837_v4, %v836_v57  ;;  %v2082_v47 = vld [vmem:[%s4367_s0 + $0x32] sm:$0xff] }
  0xc8   :  { %v2676_v42 = vunpack.i.h.bf16 %v2674_v59  ;;  %v2675_v7 = vunpack.i.l.bf16 %v2674_v59  ;;  %1473 = vmatprep.mubr.bf16.mxu0 %v992_v56  ;;  %1603 = vmatmul.mubr.bf16.gmra.mrb[36].mxu1 %v973_v41 }
  0xc9   :  { %1474 = vmatmul.mubr.bf16.gmra.mrb[36].mxu0 %v991_v16  ;;  %v926_v10 = vsel %vm817_vm0, %v3720_v3, %v2670_v18  ;;  %v927_v29 = vsel %vm817_vm0, %v3725_v25, %v2671_v63  ;;  %v3826_v25 = vld [vmem:[%s4367_s0 + $0x180] sm:$0xff] }
  0xca   :  { %v2679_v2 = vpop.permute.xlu0 %2678  ;;  %v979_v11 = vpack.c.bf16 %v927_v29, %v926_v10  ;;  %v894_v15 = vsel %vm817_vm0, %v1965_v31, %v2675_v7  ;;  %v895_v60 = vsel %vm817_vm0, %v1966_v6, %v2676_v42  ;;  %v950_v42 = vpack.c.bf16 %v2082_v47, %v2081_v27 }
  0xcb   :  { %v2681_v3 = vunpack.i.h.bf16 %v2679_v2  ;;  %v2680_v22 = vunpack.i.l.bf16 %v2679_v2  ;;  %v2684_v28 = vpop.permute.xlu1 %2683  ;;  %v978_v13 = vpack.c.bf16 %v895_v60, %v894_v15 }
  0xcc   :  { %v2686_v53 = vunpack.i.h.bf16 %v2684_v28  ;;  %v2685_v9 = vunpack.i.l.bf16 %v2684_v28  ;;  %1610 = vmatprep.mubr.bf16.mxu1 %v979_v11  ;;  %v1969_v11 = vld [vmem:[%s4367_s0 + $0x151] sm:$0xff]  ;;  %v2083_v28 = vld [vmem:[%s4367_s0 + $0x42] sm:$0xff] }
  0xcd   :  { %v870_v24 = vsel %vm817_vm0, %v3814_v14, %v2680_v22  ;;  %v871_v32 = vsel %vm817_vm0, %v3819_v49, %v2681_v3 }
  0xce   :  { %v2689_v33 = vpop.permute.xlu0 %2688  ;;  %v997_v34 = vpack.c.bf16 %v871_v32, %v870_v24  ;;  %v838_v5 = vsel %vm817_vm0, %v3826_v25, %v2685_v9  ;;  %v839_v38 = vsel %vm817_vm0, %v3831_v0, %v2686_v53  ;;  %v2084_v53 = vld [vmem:[%s4367_s0 + $0x52] sm:$0xff] }
  0xcf   :  { %v2691_v21 = vunpack.i.h.bf16 %v2689_v33  ;;  %v2690_v39 = vunpack.i.l.bf16 %v2689_v33  ;;  %v2694_v58 = vpop.permute.xlu1 %2693  ;;  %v996_v37 = vpack.c.bf16 %v839_v38, %v838_v5  ;;  %v2086_v5 = vld [vmem:[%s4367_s0 + $0x72] sm:$0xff] }
  0xd0   :  { %v2696_v8 = vunpack.i.h.bf16 %v2694_v58  ;;  %v2695_v62 = vunpack.i.l.bf16 %v2694_v58  ;;  %1481 = vmatprep.mubr.bf16.mxu0 %v997_v34  ;;  %1611 = vmatmul.mubr.bf16.gmra.mrb[40].mxu1 %v978_v13 }
  0xd1   :  { %1482 = vmatmul.mubr.bf16.gmra.mrb[40].mxu0 %v996_v37  ;;  %v928_v30 = vsel %vm817_vm0, %v2031_v26, %v2690_v39  ;;  %v929_v40 = vsel %vm817_vm0, %v2032_v44, %v2691_v21  ;;  %v955_v26 = vpack.c.bf16 %v2084_v53, %v2083_v28 }
  0xd2   :  { %v2699_v43 = vpop.permute.xlu0 %2698  ;;  %v984_v48 = vpack.c.bf16 %v929_v40, %v928_v30  ;;  %v896_v23 = vsel %vm817_vm0, %v1967_v46, %v2695_v62  ;;  %v897_v17 = vsel %vm817_vm0, %v1968_v19, %v2696_v8  ;;  %v1971_v46 = vld [vmem:[%s4367_s0 + $0x171] sm:$0xff]  ;;  %v1972_v19 = vld [vmem:[%s4367_s0 + $0x181] sm:$0xff] }
  0xd3   :  { %v2701_v54 = vunpack.i.h.bf16 %v2699_v43  ;;  %v2700_v36 = vunpack.i.l.bf16 %v2699_v43  ;;  %v2704_v41 = vpop.permute.xlu1 %2703  ;;  %v983_v4 = vpack.c.bf16 %v897_v17, %v896_v23  ;;  %v2087_v43 = vld [vmem:[%s4367_s0 + $0x82] sm:$0xff] }
  0xd4   :  { %v2706_v56 = vunpack.i.h.bf16 %v2704_v41  ;;  %v2705_v57 = vunpack.i.l.bf16 %v2704_v41  ;;  %1618 = vmatprep.mubr.bf16.mxu1 %v984_v48  ;;  %v2088_v48 = vld [vmem:[%s4367_s0 + $0x92] sm:$0xff] }
  0xd5   :  { %v872_v63 = vsel %vm817_vm0, %v3858_v52, %v2700_v36  ;;  %v873_v18 = vsel %vm817_vm0, %v3402_v35, %v2701_v54  ;;  %v1970_v35 = vld [vmem:[%s4367_s0 + $0x161] sm:$0xff]  ;;  %v2090_v41 = vld [vmem:[%s4367_s0 + $0xd2] sm:$0xff] }
  0xd6   :  { %v1002_v59 = vpack.c.bf16 %v873_v18, %v872_v63  ;;  %v2709_v16 = vpop.permute.xlu0 %2708  ;;  %v840_v31 = vsel %vm817_vm0, %v3865_v61, %v2705_v57  ;;  %v841_v6 = vsel %vm817_vm0, %v3870_v55, %v2706_v56  ;;  %v2089_v36 = vld [vmem:[%s4367_s0 + $0xc2] sm:$0xff]  ;;  %v965_v56 = vpack.c.bf16 %v2088_v48, %v2087_v43  ;;  %v2044_v43 = vld [vmem:[%s4367_s0 + $0x230] sm:$0xff] }
  0xd7   :  { %v2711_v7 = vunpack.i.h.bf16 %v2709_v16  ;;  %v2710_v10 = vunpack.i.l.bf16 %v2709_v16  ;;  %v1001_v29 = vpack.c.bf16 %v841_v6, %v840_v31  ;;  %v2714_v2 = vpop.permute.xlu1 %2713  ;;  %v970_v18 = vpack.c.bf16 %v2090_v41, %v2089_v36  ;;  %v2039_v31 = vld [vmem:[%s4367_s0 + $0x1c0] sm:$0xff]  ;;  %v2040_v6 = vld [vmem:[%s4367_s0 + $0x1d0] sm:$0xff] }
  0xd8   :  { %1489 = vmatprep.mubr.bf16.mxu0 %v1002_v59  ;;  %1619 = vmatmul.mubr.bf16.gmra.mrb[44].mxu1 %v983_v4  ;;  %v2716_v15 = vunpack.i.h.bf16 %v2714_v2  ;;  %v2715_v60 = vunpack.i.l.bf16 %v2714_v2 }
  0xd9   :  { %1490 = vmatmul.mubr.bf16.gmra.mrb[44].mxu0 %v1001_v29  ;;  %v930_v3 = vsel %vm817_vm0, %v3786_v20, %v2710_v10  ;;  %v931_v22 = vsel %vm817_vm0, %v3791_v51, %v2711_v7  ;;  %v2085_v51 = vld [vmem:[%s4367_s0 + $0x62] sm:$0xff]  ;;  %v2092_v29 = vld [vmem:[%s4367_s0 + $0xf2] sm:$0xff] }
  0xda   :  { %v989_v9 = vpack.c.bf16 %v931_v22, %v930_v3  ;;  %v898_v13 = vsel %vm817_vm0, %v1969_v11, %v2715_v60  ;;  %v899_v24 = vsel %vm817_vm0, %v1970_v35, %v2716_v15  ;;  %2418 = vmatprep.mubr.msk.bf16.mxu0 %vm817_vm0, %v950_v42  ;;  %v2719_v32 = vpop.permute.xlu0 %2718  ;;  %v960_v8 = vpack.c.bf16 %v2086_v5, %v2085_v51  ;;  %v2091_v10 = vld [vmem:[%s4367_s0 + $0xe2] sm:$0xff] }
  0xdb   :  { %v2721_v20 = vunpack.i.h.bf16 %v2719_v32  ;;  %v2720_v33 = vunpack.i.l.bf16 %v2719_v32  ;;  %v2724_v34 = vpop.permute.xlu1 %2723  ;;  %v988_v38 = vpack.c.bf16 %v899_v24, %v898_v13  ;;  %v975_v3 = vpack.c.bf16 %v2092_v29, %v2091_v10  ;;  %v1976_v13 = vld [vmem:[%s4367_s0 + $0x1c1] sm:$0xff]  ;;  %v2106_v29 = vld [vmem:[%s4367_s0 + $0x212] sm:$0xff] }
  0xdc   :  { %1626 = vmatprep.mubr.bf16.mxu1 %v989_v9  ;;  %v2726_v44 = vunpack.i.h.bf16 %v2724_v34  ;;  %v2725_v21 = vunpack.i.l.bf16 %v2724_v34  ;;  %v1975_v9 = vld [vmem:[%s4367_s0 + $0x1b1] sm:$0xff]  ;;  %v980_v24 = vpack.c.bf16 %v3713_v50, %v3708_v45  ;;  %v2095_v45 = vld [vmem:[%s4367_s0 + $0x122] sm:$0xff] }
  0xdd   :  { %v932_v39 = vsel %vm817_vm0, %v3826_v25, %v2720_v33  ;;  %v933_v58 = vsel %vm817_vm0, %v3831_v0, %v2721_v20  ;;  %v2041_v33 = vld [vmem:[%s4367_s0 + $0x200] sm:$0xff]  ;;  %v2042_v34 = vld [vmem:[%s4367_s0 + $0x210] sm:$0xff] }
  0xde   :  { %v994_v37 = vpack.c.bf16 %v933_v58, %v932_v39  ;;  %v2729_v62 = vpop.permute.xlu0 %2728  ;;  %v900_v25 = vsel %vm817_vm0, %v1971_v46, %v2725_v21  ;;  %v901_v0 = vsel %vm817_vm0, %v1972_v19, %v2726_v44  ;;  %v2096_v50 = vld [vmem:[%s4367_s0 + $0x132] sm:$0xff]  ;;  %v2105_v10 = vld [vmem:[%s4367_s0 + $0x202] sm:$0xff] }
  0xdf   :  { %v2731_v30 = vunpack.i.h.bf16 %v2729_v62  ;;  %v2730_v40 = vunpack.i.l.bf16 %v2729_v62  ;;  %v2734_v23 = vpop.permute.xlu1 %2733  ;;  %v993_v47 = vpack.c.bf16 %v901_v0, %v900_v25  ;;  %v985_v58 = vpack.c.bf16 %v2096_v50, %v2095_v45  ;;  %v1978_v62 = vld [vmem:[%s4367_s0 + $0x201] sm:$0xff] }
  0xe0   :  { %1627 = vmatmul.mubr.bf16.gmra.mrb[48].mxu1 %v988_v38  ;;  %v2736_v57 = vunpack.i.h.bf16 %v2734_v23  ;;  %v2735_v4 = vunpack.i.l.bf16 %v2734_v23  ;;  %v2043_v0 = vld [vmem:[%s4367_s0 + $0x220] sm:$0xff] }
  0xe1   :  { %2419 = vmatmul.mubr.msk.bf16.vlgmr.msra.gmra.mrb[48].mxu0 %vm817_vm0, %v955_v26  ;;  %1634 = vmatprep.mubr.bf16.mxu1 %v994_v37  ;;  %v934_v17 = vsel %vm817_vm0, %v3865_v61, %v2730_v40  ;;  %v935_v54 = vsel %vm817_vm0, %v3870_v55, %v2731_v30  ;;  %v1973_v61 = vld [vmem:[%s4367_s0 + $0x191] sm:$0xff]  ;;  %v1974_v55 = vld [vmem:[%s4367_s0 + $0x1a1] sm:$0xff]  ;;  %v990_v30 = vpack.c.bf16 %v3779_v12, %v3774_v1 }
  0xe2   :  { %2422 = vmatprep.mubr.msk.bf16.mxu0 %vm817_vm0, %v960_v8  ;;  %v2739_v27 = vpop.permute.xlu0 %2738  ;;  %v999_v63 = vpack.c.bf16 %v935_v54, %v934_v17  ;;  %v902_v42 = vsel %vm817_vm0, %v1973_v61, %v2735_v4  ;;  %v903_v7 = vsel %vm817_vm0, %v1974_v55, %v2736_v57  ;;  %v1977_v8 = vld [vmem:[%s4367_s0 + $0x1f1] sm:$0xff] }
  0xe3   :  { %v2741_v59 = vunpack.i.h.bf16 %v2739_v27  ;;  %v2740_v16 = vunpack.i.l.bf16 %v2739_v27  ;;  %v2744_v2 = vpop.permute.xlu1 %2743  ;;  %v998_v60 = vpack.c.bf16 %v903_v7, %v902_v42  ;;  %v2102_v54 = vld [vmem:[%s4367_s0 + $0x1b2] sm:$0xff]  ;;  %v995_v27 = vpack.c.bf16 %v3819_v49, %v3814_v14 }
  0xe4   :  { %v2746_v22 = vunpack.i.h.bf16 %v2744_v2  ;;  %v2745_v28 = vunpack.i.l.bf16 %v2744_v2  ;;  %v1979_v4 = vld [vmem:[%s4367_s0 + $0x211] sm:$0xff]  ;;  %v1000_v61 = vpack.c.bf16 %v2102_v54, %v3858_v52  ;;  %v2103_v52 = vld [vmem:[%s4367_s0 + $0x1c2] sm:$0xff] }
  0xe5   :  { %v936_v11 = vsel %vm817_vm0, %v2039_v31, %v2740_v16  ;;  %v937_v35 = vsel %vm817_vm0, %v2040_v6, %v2741_v59  ;;  %v2045_v59 = vld [vmem:[%s4367_s0 + $0x240] sm:$0xff]  ;;  %v2046_v14 = vld [vmem:[%s4367_s0 + $0x250] sm:$0xff] }
  0xe6   :  { %v2749_v15 = vpop.permute.xlu0 %2748  ;;  %v1004_v53 = vpack.c.bf16 %v937_v35, %v936_v11  ;;  %v904_v51 = vsel %vm817_vm0, %v1975_v9, %v2745_v28  ;;  %v905_v5 = vsel %vm817_vm0, %v1976_v13, %v2746_v22  ;;  %v2104_v31 = vld [vmem:[%s4367_s0 + $0x1d2] sm:$0xff]  ;;  %v1982_v28 = vld [vmem:[%s4367_s0 + $0x241] sm:$0xff] }
  0xe7   :  { %v2751_v32 = vunpack.i.h.bf16 %v2749_v15  ;;  %v2750_v20 = vunpack.i.l.bf16 %v2749_v15  ;;  %v2754_v38 = vpop.permute.xlu1 %2753  ;;  %v1003_v39 = vpack.c.bf16 %v905_v5, %v904_v51  ;;  %v1005_v35 = vpack.c.bf16 %v2104_v31, %v2103_v52  ;;  %v1981_v22 = vld [vmem:[%s4367_s0 + $0x231] sm:$0xff] }
  0xe8   :  { %1635 = vmatmul.mubr.bf16.gmra.mrb[52].mxu1 %v993_v47  ;;  %v2756_v37 = vunpack.i.h.bf16 %v2754_v38  ;;  %v2755_v46 = vunpack.i.l.bf16 %v2754_v38  ;;  %v2108_v51 = vld [vmem:[%s4367_s0 + $0x232] sm:$0xff]  ;;  %v2109_v38 = vld [vmem:[%s4367_s0 + $0x242] sm:$0xff] }
  0xe9   :  { %2423 = vmatmul.mubr.msk.bf16.gmra.mrb[52].mxu0 %vm817_vm0, %v965_v56  ;;  %1642 = vmatprep.mubr.bf16.mxu1 %v999_v63  ;;  %v938_v26 = vsel %vm817_vm0, %v2041_v33, %v2750_v20  ;;  %v939_v44 = vsel %vm817_vm0, %v2042_v34, %v2751_v32  ;;  %v1980_v63 = vld [vmem:[%s4367_s0 + $0x221] sm:$0xff]  ;;  %v2048_v32 = vld [vmem:[%s4367_s0 + $0x270] sm:$0xff] }
  0xea   :  { %2426 = vmatprep.mubr.msk.bf16.mxu0 %vm817_vm0, %v970_v18  ;;  %v2759_v21 = vpop.permute.xlu0 %2758  ;;  %v1009_v19 = vpack.c.bf16 %v939_v44, %v938_v26  ;;  %v906_v48 = vsel %vm817_vm0, %v1977_v8, %v2755_v46  ;;  %v907_v23 = vsel %vm817_vm0, %v1978_v62, %v2756_v37  ;;  %v2107_v34 = vld [vmem:[%s4367_s0 + $0x222] sm:$0xff]  ;;  %v2110_v26 = vld [vmem:[%s4367_s0 + $0x252] sm:$0xff] }
  0xeb   :  { %v2761_v40 = vunpack.i.h.bf16 %v2759_v21  ;;  %v2760_v25 = vunpack.i.l.bf16 %v2759_v21  ;;  %v2764_v1 = vpop.permute.xlu1 %2763  ;;  %v1008_v41 = vpack.c.bf16 %v907_v23, %v906_v48  ;;  %v1015_v21 = vpack.c.bf16 %v2108_v51, %v2107_v34  ;;  %v1983_v46 = vld [vmem:[%s4367_s0 + $0x251] sm:$0xff]  ;;  %v2887_v62 = vld [vmem:[%s4367_s0 + $0x261] sm:$0xff] }
  0xec   :  { %v2766_v47 = vunpack.i.h.bf16 %v2764_v1  ;;  %v2765_v56 = vunpack.i.l.bf16 %v2764_v1 }
  0xed   :  { %v940_v12 = vsel %vm817_vm0, %v2043_v0, %v2760_v25  ;;  %v941_v17 = vsel %vm817_vm0, %v2044_v43, %v2761_v40  ;;  %v2112_v40 = vld [vmem:[%s4367_s0 + $0x272] sm:$0xff]  ;;  %v2888_v0 = vld [vmem:[%s4367_s0 + $0x262] sm:$0xff] }
  0xee   :  { %v2769_v36 = vpop.permute.xlu0 %2768  ;;  %v1014_v57 = vpack.c.bf16 %v941_v17, %v940_v12  ;;  %v908_v49 = vsel %vm817_vm0, %v1979_v4, %v2765_v56  ;;  %v909_v16 = vsel %vm817_vm0, %v1980_v63, %v2766_v47  ;;  %v1025_v43 = vpack.c.bf16 %v2112_v40, %v2888_v0 }
  0xef   :  { %v2771_v55 = vunpack.i.h.bf16 %v2769_v36  ;;  %v2770_v18 = vunpack.i.l.bf16 %v2769_v36  ;;  %v2774_v6 = vpop.permute.xlu1 %2773  ;;  %v1013_v11 = vpack.c.bf16 %v909_v16, %v908_v49 }
  0xf0   :  { %1643 = vmatmul.mubr.bf16.gmra.mrb[56].mxu1 %v998_v60  ;;  %v2776_v15 = vunpack.i.h.bf16 %v2774_v6  ;;  %v2775_v60 = vunpack.i.l.bf16 %v2774_v6 }
  0xf1   :  { %2427 = vmatmul.mubr.msk.bf16.gmra.mrb[56].mxu0 %vm817_vm0, %v975_v3  ;;  %1650 = vmatprep.mubr.bf16.mxu1 %v1004_v53  ;;  %v942_v42 = vsel %vm817_vm0, %v2045_v59, %v2770_v18  ;;  %v943_v7 = vsel %vm817_vm0, %v2046_v14, %v2771_v55  ;;  %v1010_v53 = vpack.c.bf16 %v2106_v29, %v2105_v10 }
  0xf2   :  { %2430 = vmatprep.mubr.msk.bf16.mxu0 %vm817_vm0, %v980_v24  ;;  %v2779_v2 = vpop.permute.xlu0 %2778  ;;  %v1019_v3 = vpack.c.bf16 %v943_v7, %v942_v42  ;;  %v2047_v24 = vld [vmem:[%s4367_s0 + $0x260] sm:$0xff]  ;;  %v910_v20 = vsel %vm817_vm0, %v1981_v22, %v2775_v60  ;;  %v911_v33 = vsel %vm817_vm0, %v1982_v28, %v2776_v15 }
  0xf3   :  { %v2781_v9 = vunpack.i.h.bf16 %v2779_v2  ;;  %v2780_v13 = vunpack.i.l.bf16 %v2779_v2  ;;  %v1018_v44 = vpack.c.bf16 %v911_v33, %v910_v20 }
  0xf5   :  { %v2784_v5 = vpop.permute.xlu1 %2783  ;;  %v944_v45 = vsel %vm817_vm0, %v2047_v24, %v2780_v13  ;;  %v945_v50 = vsel %vm817_vm0, %v2048_v32, %v2781_v9 }
  0xf6   :  { %v1024_v37 = vpack.c.bf16 %v945_v50, %v944_v45 }
  0xf8   :  { %1651 = vmatmul.mubr.bf16.gmra.mrb[60].mxu1 %v1003_v39  ;;  %v2786_v39 = vunpack.i.h.bf16 %v2784_v5 }
  0xf9   :  { %2431 = vmatmul.mubr.msk.bf16.gmra.mrb[60].mxu0 %vm817_vm0, %v985_v58  ;;  %1658 = vmatprep.mubr.bf16.mxu1 %v1009_v19  ;;  %v2785_v58 = vunpack.i.l.bf16 %v2784_v5  ;;  %v1020_v19 = vpack.c.bf16 %v2110_v26, %v2109_v38  ;;  %v4113_v26 = vld [vmem:[%s4369_s2] ss:$0 sm:$0xff] }
  0xfa   :  { %2434 = vmatprep.mubr.msk.bf16.mxu0 %vm817_vm0, %v990_v30  ;;  %v913_v30 = vsel %vm817_vm0, %v2887_v62, %v2786_v39 }
  0xfb   :  { %v912_v8 = vsel %vm817_vm0, %v1983_v46, %v2785_v58 }
  0xfc   :  { %v1023_v25 = vpack.c.bf16 %v913_v30, %v912_v8 }
 0x100   :  { %1659 = vmatmul.mubr.bf16.gmra.mrb[64].mxu1 %v1008_v41 }
 0x101   :  { %2435 = vmatmul.mubr.msk.bf16.gmra.mrb[64].mxu0 %vm817_vm0, %v995_v27  ;;  %1666 = vmatprep.mubr.bf16.mxu1 %v1014_v57 }
 0x102   :  { %2438 = vmatprep.mubr.msk.bf16.mxu0 %vm817_vm0, %v1000_v61 }
 0x108   :  { %1667 = vmatmul.mubr.bf16.gmra.mrb[68].mxu1 %v1013_v11 }
 0x109   :  { %2439 = vmatmul.mubr.msk.bf16.gmra.mrb[68].mxu0 %vm817_vm0, %v1005_v35  ;;  %1674 = vmatprep.mubr.bf16.mxu1 %v1019_v3 }
 0x10a   :  { %2442 = vmatprep.mubr.msk.bf16.mxu0 %vm817_vm0, %v1010_v53 }
 0x110   :  { %1675 = vmatmul.mubr.bf16.gmra.mrb[72].mxu1 %v1018_v44 }
 0x111   :  { %2443 = vmatmul.mubr.msk.bf16.gmra.mrb[72].mxu0 %vm817_vm0, %v1015_v21  ;;  %1682 = vmatprep.mubr.bf16.mxu1 %v1024_v37 }
 0x112   :  { %2446 = vmatprep.mubr.msk.bf16.mxu0 %vm817_vm0, %v1020_v19 }
 0x118   :  { %1683 = vmatmul.mubr.bf16.gmra.mrb[76].mxu1 %v1023_v25 }
 0x119   :  { %2447 = vmatmul.mubr.msk.bf16.gmra.mrb[76].mxu0 %vm817_vm0, %v1025_v43 }
 0x153   :  { %v2254_v48 = vpop.f32.mrb[0].mxu1 }
 0x154   :  { %v2182_v23 = vpop.f32.mrb[0].mxu0  ;;  %v2255_v1 = vpop.f32.mrb[1].mxu1 }
 0x155   :  { %v4094_v12 = vadd.f32 %v2255_v1, %v2254_v48  ;;  %v2183_v17 = vpop.f32.mrb[1].mxu0  ;;  %v2257_v54 = vpop.f32.mrb[2].mxu1 }
 0x156   :  { %v2184_v36 = vadd.f32 %v2183_v17, %v2182_v23  ;;  %v2185_v41 = vpop.f32.mrb[2].mxu0  ;;  %v2258_v27 = vpop.f32.mrb[3].mxu1 }
 0x157   :  { %v4096_v47 = vadd.f32 %v2258_v27, %v2257_v54  ;;  %v2186_v56 = vpop.f32.mrb[3].mxu0 }
 0x158   :  { %v2187_v57 = vadd.f32 %v2186_v56, %v2185_v41  ;;  %v1404_v39 = vadd.f32 %v2184_v36, %v4113_v26 }
 0x15a   :  { %v1407_v30 = vadd.f32 %v2187_v57, %v4113_v26 }
 0x15b   :  { %v2260_v4 = vpop.f32.mrb[4].mxu1 }
 0x15c   :  { %v2188_v63 = vpop.f32.mrb[4].mxu0  ;;  %v2261_v61 = vpop.f32.mrb[5].mxu1 }
 0x15d   :  { %v4098_v55 = vadd.f32 %v2261_v61, %v2260_v4  ;;  %v2189_v18 = vpop.f32.mrb[5].mxu0  ;;  %v2263_v59 = vpop.f32.mrb[6].mxu1 }
 0x15e   :  { %v2190_v14 = vadd.f32 %v2189_v18, %v2188_v63  ;;  %v2191_v49 = vpop.f32.mrb[6].mxu0  ;;  %v2264_v16 = vpop.f32.mrb[7].mxu1 }
 0x15f   :  { %v4100_v52 = vadd.f32 %v2264_v16, %v2263_v59  ;;  %v2192_v31 = vpop.f32.mrb[7].mxu0 }
 0x160   :  { %v2193_v6 = vadd.f32 %v2192_v31, %v2191_v49  ;;  %v1412_v54 = vadd.f32 %v2190_v14, %v4113_v26 }
 0x162   :  { %v1415_v57 = vadd.f32 %v2193_v6, %v4113_v26 }
 0x163   :  { %v2266_v42 = vpop.f32.mrb[8].mxu1 }
 0x164   :  { %v2194_v7 = vpop.f32.mrb[8].mxu0  ;;  %v2267_v10 = vpop.f32.mrb[9].mxu1 }
 0x165   :  { %v4102_v29 = vadd.f32 %v2267_v10, %v2266_v42  ;;  %v2195_v2 = vpop.f32.mrb[9].mxu0  ;;  %v2269_v11 = vpop.f32.mrb[10].mxu1 }
 0x166   :  { %v2196_v35 = vadd.f32 %v2195_v2, %v2194_v7  ;;  %v2197_v15 = vpop.f32.mrb[10].mxu0  ;;  %v2270_v60 = vpop.f32.mrb[11].mxu1 }
 0x167   :  { %v4104_v3 = vadd.f32 %v2270_v60, %v2269_v11  ;;  %v2198_v22 = vpop.f32.mrb[11].mxu0 }
 0x168   :  { %v2199_v28 = vadd.f32 %v2198_v22, %v2197_v15  ;;  %v1420_v14 = vadd.f32 %v2196_v35, %v4113_v26 }
 0x16a   :  { %v1423_v6 = vadd.f32 %v2199_v28, %v4113_v26 }
 0x16b   :  { %v2272_v53 = vpop.f32.mrb[12].mxu1 }
 0x16c   :  { %v2200_v9 = vpop.f32.mrb[12].mxu0  ;;  %v2273_v13 = vpop.f32.mrb[13].mxu1 }
 0x16d   :  { %v4106_v24 = vadd.f32 %v2273_v13, %v2272_v53  ;;  %v2201_v32 = vpop.f32.mrb[13].mxu0  ;;  %v2275_v20 = vpop.f32.mrb[14].mxu1 }
 0x16e   :  { %v2202_v33 = vadd.f32 %v2201_v32, %v2200_v9  ;;  %v2203_v34 = vpop.f32.mrb[14].mxu0  ;;  %v2276_v51 = vpop.f32.mrb[15].mxu1 }
 0x16f   :  { %v4108_v5 = vadd.f32 %v2276_v51, %v2275_v20  ;;  %v2204_v45 = vpop.f32.mrb[15].mxu0 }
 0x170   :  { %v2205_v50 = vadd.f32 %v2204_v45, %v2203_v34  ;;  %v1428_v35 = vadd.f32 %v2202_v33, %v4113_v26 }
 0x172   :  { %v1431_v28 = vadd.f32 %v2205_v50, %v4113_v26 }
 0x173   :  { %v2294_v38 = vpop.f32.mrb[16].mxu1 }
 0x174   :  { %v2206_v44 = vpop.f32.mrb[16].mxu0  ;;  %v2295_v21 = vpop.f32.mrb[17].mxu1 }
 0x175   :  { %v2296_v58 = vadd.f32 %v2295_v21, %v2294_v38  ;;  %v2207_v37 = vpop.f32.mrb[17].mxu0  ;;  %v2297_v46 = vpop.f32.mrb[18].mxu1 }
 0x176   :  { %v2208_v19 = vadd.f32 %v2207_v37, %v2206_v44  ;;  %v2209_v8 = vpop.f32.mrb[18].mxu0  ;;  %v2298_v62 = vpop.f32.mrb[19].mxu1 }
 0x177   :  { %v2299_v40 = vadd.f32 %v2298_v62, %v2297_v46  ;;  %v2210_v25 = vpop.f32.mrb[19].mxu0  ;;  %v4117_v0 = vadd.f32 %v2296_v58, %v1404_v39 }
 0x178   :  { %v2211_v43 = vadd.f32 %v2210_v25, %v2209_v8  ;;  %v1436_v33 = vadd.f32 %v2208_v19, %v4113_v26 }
 0x179   :  { %v4119_v48 = vadd.f32 %v2299_v40, %v1407_v30 }
 0x17a   :  { %v1439_v50 = vadd.f32 %v2211_v43, %v4113_v26 }
 0x17b   :  { %v2300_v23 = vpop.f32.mrb[20].mxu1 }
 0x17c   :  { %v2212_v1 = vpop.f32.mrb[20].mxu0  ;;  %v2301_v17 = vpop.f32.mrb[21].mxu1 }
 0x17d   :  { %v2302_v36 = vadd.f32 %v2301_v17, %v2300_v23  ;;  %v2213_v41 = vpop.f32.mrb[21].mxu0  ;;  %v2303_v27 = vpop.f32.mrb[22].mxu1 }
 0x17e   :  { %v2214_v56 = vadd.f32 %v2213_v41, %v2212_v1  ;;  %v2215_v4 = vpop.f32.mrb[22].mxu0  ;;  %v2304_v63 = vpop.f32.mrb[23].mxu1 }
 0x17f   :  { %v2305_v61 = vadd.f32 %v2304_v63, %v2303_v27  ;;  %v2216_v18 = vpop.f32.mrb[23].mxu0  ;;  %v4123_v59 = vadd.f32 %v2302_v36, %v1412_v54 }
 0x180   :  { %v2217_v49 = vadd.f32 %v2216_v18, %v2215_v4  ;;  %v1444_v19 = vadd.f32 %v2214_v56, %v4113_v26 }
 0x181   :  { %v4125_v16 = vadd.f32 %v2305_v61, %v1415_v57 }
 0x182   :  { %v1447_v43 = vadd.f32 %v2217_v49, %v4113_v26 }
 0x183   :  { %v2306_v31 = vpop.f32.mrb[24].mxu1 }
 0x184   :  { %v2218_v42 = vpop.f32.mrb[24].mxu0  ;;  %v2307_v7 = vpop.f32.mrb[25].mxu1 }
 0x185   :  { %v2308_v10 = vadd.f32 %v2307_v7, %v2306_v31  ;;  %v2219_v2 = vpop.f32.mrb[25].mxu0  ;;  %v2309_v11 = vpop.f32.mrb[26].mxu1 }
 0x186   :  { %v2220_v15 = vadd.f32 %v2219_v2, %v2218_v42  ;;  %v2221_v60 = vpop.f32.mrb[26].mxu0  ;;  %v2310_v22 = vpop.f32.mrb[27].mxu1 }
 0x187   :  { %v2311_v53 = vadd.f32 %v2310_v22, %v2309_v11  ;;  %v2222_v9 = vpop.f32.mrb[27].mxu0  ;;  %v4129_v13 = vadd.f32 %v2308_v10, %v1420_v14 }
 0x188   :  { %v2223_v32 = vadd.f32 %v2222_v9, %v2221_v60 }
 0x189   :  { %v4131_v20 = vadd.f32 %v2311_v53, %v1423_v6 }
 0x18b   :  { %v2312_v34 = vpop.f32.mrb[28].mxu1 }
 0x18c   :  { %v2224_v51 = vpop.f32.mrb[28].mxu0  ;;  %v2313_v45 = vpop.f32.mrb[29].mxu1 }
 0x18d   :  { %v2314_v38 = vadd.f32 %v2313_v45, %v2312_v34  ;;  %v2225_v44 = vpop.f32.mrb[29].mxu0  ;;  %v2315_v21 = vpop.f32.mrb[30].mxu1 }
 0x18e   :  { %v2226_v39 = vadd.f32 %v2225_v44, %v2224_v51  ;;  %v2227_v58 = vpop.f32.mrb[30].mxu0  ;;  %v2316_v37 = vpop.f32.mrb[31].mxu1  ;;  %v1452_v44 = vadd.f32 %v2220_v15, %v4113_v26 }
 0x18f   :  { %v2317_v46 = vadd.f32 %v2316_v37, %v2315_v21  ;;  %v2228_v8 = vpop.f32.mrb[31].mxu0  ;;  %v4135_v62 = vadd.f32 %v2314_v38, %v1428_v35 }
 0x190   :  { %v2229_v30 = vadd.f32 %v2228_v8, %v2227_v58  ;;  %v1455_v8 = vadd.f32 %v2223_v32, %v4113_v26 }
 0x191   :  { %v4137_v40 = vadd.f32 %v2317_v46, %v1431_v28 }
 0x193   :  { %v2318_v25 = vpop.f32.mrb[32].mxu1 }
 0x194   :  { %v2230_v23 = vpop.f32.mrb[32].mxu0  ;;  %v2319_v1 = vpop.f32.mrb[33].mxu1 }
 0x195   :  { %v2320_v17 = vadd.f32 %v2319_v1, %v2318_v25  ;;  %v2231_v54 = vpop.f32.mrb[33].mxu0  ;;  %v2321_v36 = vpop.f32.mrb[34].mxu1 }
 0x196   :  { %v2232_v41 = vadd.f32 %v2231_v54, %v2230_v23  ;;  %v2233_v27 = vpop.f32.mrb[34].mxu0  ;;  %v2322_v4 = vpop.f32.mrb[35].mxu1 }
 0x197   :  { %v2323_v63 = vadd.f32 %v2322_v4, %v2321_v36  ;;  %v2234_v57 = vpop.f32.mrb[35].mxu0  ;;  %v4141_v61 = vadd.f32 %v2320_v17, %v1436_v33 }
 0x198   :  { %v2235_v18 = vadd.f32 %v2234_v57, %v2233_v27  ;;  %v1460_v27 = vadd.f32 %v2226_v39, %v4113_v26 }
 0x199   :  { %v4143_v31 = vadd.f32 %v2323_v63, %v1439_v50 }
 0x19b   :  { %v2324_v42 = vpop.f32.mrb[36].mxu1 }
 0x19c   :  { %v2236_v7 = vpop.f32.mrb[36].mxu0  ;;  %v2325_v14 = vpop.f32.mrb[37].mxu1 }
 0x19d   :  { %v2326_v10 = vadd.f32 %v2325_v14, %v2324_v42  ;;  %v2237_v2 = vpop.f32.mrb[37].mxu0  ;;  %v2327_v11 = vpop.f32.mrb[38].mxu1 }
 0x19e   :  { %v4146_v60 = vadd.f32 %v2237_v2, %v2236_v7  ;;  %v2239_v22 = vpop.f32.mrb[38].mxu0  ;;  %v2328_v6 = vpop.f32.mrb[39].mxu1  ;;  %v1463_v7 = vadd.f32 %v2229_v30, %v4113_v26  ;;  %v1471_v30 = vadd.f32 %v2235_v18, %v4113_v26 }
 0x19f   :  { %v2329_v53 = vadd.f32 %v2328_v6, %v2327_v11  ;;  %v2240_v9 = vpop.f32.mrb[39].mxu0  ;;  %v4149_v34 = vadd.f32 %v2326_v10, %v1444_v19 }
 0x1a0   :  { %v4151_v51 = vadd.f32 %v2240_v9, %v2239_v22 }
 0x1a1   :  { %v4153_v45 = vadd.f32 %v2329_v53, %v1447_v43  ;;  %v1468_v43 = vadd.f32 %v2232_v41, %v4113_v26 }
 0x1a3   :  { %v2330_v35 = vpop.f32.mrb[40].mxu1 }
 0x1a4   :  { %v2242_v38 = vpop.f32.mrb[40].mxu0  ;;  %v2331_v56 = vpop.f32.mrb[41].mxu1 }
 0x1a5   :  { %v2332_v21 = vadd.f32 %v2331_v56, %v2330_v35  ;;  %v2243_v58 = vpop.f32.mrb[41].mxu0  ;;  %v2333_v37 = vpop.f32.mrb[42].mxu1 }
 0x1a6   :  { %v4156_v28 = vadd.f32 %v2243_v58, %v2242_v38  ;;  %v2245_v46 = vpop.f32.mrb[42].mxu0  ;;  %v2334_v49 = vpop.f32.mrb[43].mxu1 }
 0x1a7   :  { %v2335_v25 = vadd.f32 %v2334_v49, %v2333_v37  ;;  %v2246_v23 = vpop.f32.mrb[43].mxu0  ;;  %v4159_v1 = vadd.f32 %v2332_v21, %v1452_v44 }
 0x1a8   :  { %v4161_v33 = vadd.f32 %v2246_v23, %v2245_v46 }
 0x1a9   :  { %v4163_v17 = vadd.f32 %v2335_v25, %v1455_v8 }
 0x1ab   :  { %v2336_v54 = vpop.f32.mrb[44].mxu1 }
 0x1ac   :  { %v2248_v36 = vpop.f32.mrb[44].mxu0  ;;  %v2337_v15 = vpop.f32.mrb[45].mxu1 }
 0x1ad   :  { %v2338_v4 = vadd.f32 %v2337_v15, %v2336_v54  ;;  %v2249_v50 = vpop.f32.mrb[45].mxu0  ;;  %v2339_v63 = vpop.f32.mrb[46].mxu1  ;;  %v1479_v15 = vadd.f32 %v4151_v51, %v4113_v26 }
 0x1ae   :  { %v4166_v57 = vadd.f32 %v2249_v50, %v2248_v36  ;;  %v2251_v42 = vpop.f32.mrb[46].mxu0  ;;  %v2340_v32 = vpop.f32.mrb[47].mxu1 }
 0x1af   :  { %v2341_v14 = vadd.f32 %v2340_v32, %v2339_v63  ;;  %v2252_v19 = vpop.f32.mrb[47].mxu0  ;;  %v4169_v10 = vadd.f32 %v2338_v4, %v1460_v27 }
 0x1b0   :  { %v4171_v2 = vadd.f32 %v2252_v19, %v2251_v42 }
 0x1b1   :  { %v4173_v11 = vadd.f32 %v2341_v14, %v1463_v7 }
 0x1b3   :  { %v2342_v22 = vpop.f32.mrb[48].mxu1 }
 0x1b4   :  { %v2343_v6 = vpop.f32.mrb[49].mxu1  ;;  %v2420_v39 = vpop.f32.mrb[48].mxu0 }
 0x1b5   :  { %v2344_v53 = vadd.f32 %v2343_v6, %v2342_v22  ;;  %v1734_v9 = vadd.f32 %v2420_v39, %v4123_v59  ;;  %v2345_v35 = vpop.f32.mrb[50].mxu1  ;;  %v1725_v38 = vpop.f32.mrb[49].mxu0  ;;  %v1484_v22 = vadd.f32 %v4156_v28, %v4113_v26 }
 0x1b6   :  { %v1726_v56 = vadd.f32 %v1725_v38, %v4117_v0  ;;  %v2346_v44 = vpop.f32.mrb[51].mxu1  ;;  %v2421_v21 = vpop.f32.mrb[50].mxu0  ;;  %v1476_v0 = vadd.f32 %v4146_v60, %v4113_v26 }
 0x1b7   :  { %2823 = vtanh.f32 %v1734_v9  ;;  %v2347_v58 = vadd.f32 %v2346_v44, %v2345_v35  ;;  %v1737_v37 = vadd.f32 %v2421_v21, %v4125_v16  ;;  %v1728_v46 = vpop.f32.mrb[51].mxu0  ;;  %v4180_v49 = vadd.f32 %v2344_v53, %v1468_v43 }
 0x1b8   :  { %2825 = vtanh.f32 %v1726_v56  ;;  %v1729_v41 = vadd.f32 %v1728_v46, %v4119_v48  ;;  %v1487_v9 = vadd.f32 %v4161_v33, %v4113_v26 }
 0x1b9   :  { %2827 = vtanh.f32 %v1737_v37  ;;  %v4183_v59 = vadd.f32 %v2347_v58, %v1471_v30 }
 0x1ba   :  { %2829 = vtanh.f32 %v1729_v41 }
 0x1bb   :  { %v2348_v8 = vpop.f32.mrb[52].mxu1 }
 0x1bc   :  { %v2349_v18 = vpop.f32.mrb[53].mxu1  ;;  %v2424_v25 = vpop.f32.mrb[52].mxu0 }
 0x1bd   :  { %v2350_v23 = vadd.f32 %v2349_v18, %v2348_v8  ;;  %v1750_v54 = vadd.f32 %v2424_v25, %v4135_v62  ;;  %v2351_v16 = vpop.f32.mrb[54].mxu1  ;;  %v1741_v36 = vpop.f32.mrb[53].mxu0  ;;  %v1492_v8 = vadd.f32 %v4166_v57, %v4113_v26 }
 0x1be   :  { %v1742_v48 = vadd.f32 %v1741_v36, %v4129_v13  ;;  %v2352_v27 = vpop.f32.mrb[55].mxu1  ;;  %v2425_v4 = vpop.f32.mrb[54].mxu0 }
 0x1bf   :  { %2831 = vtanh.f32 %v1750_v54  ;;  %v2353_v50 = vadd.f32 %v2352_v27, %v2351_v16  ;;  %v1753_v63 = vadd.f32 %v2425_v4, %v4137_v40  ;;  %v1744_v42 = vpop.f32.mrb[55].mxu0  ;;  %v4192_v32 = vadd.f32 %v2350_v23, %v1476_v0 }
 0x1c0   :  { %2833 = vtanh.f32 %v1742_v48  ;;  %v1745_v62 = vadd.f32 %v1744_v42, %v4131_v20  ;;  %v1495_v54 = vadd.f32 %v4171_v2, %v4113_v26 }
 0x1c1   :  { %v2824_v60 = vpop.eup %2823  ;;  %2835 = vtanh.f32 %v1753_v63  ;;  %v4195_v7 = vadd.f32 %v2353_v50, %v1479_v15 }
 0x1c2   :  { %v2826_v51 = vpop.eup %2825  ;;  %1887 = vst.msk [vmem:[%s4370_s3 + $0x10] sm:$0xff] %vm1884_vm1, %v2824_v60  ;;  %2837 = vtanh.f32 %v1745_v62  ;;  %v1500_v60 = vadd.f32 %v4094_v12, %v4113_v26 }
 0x1c3   :  { %v2828_v13 = vpop.eup %2827  ;;  %1885 = vst.msk [vmem:[%s4370_s3] sm:$0xff] %vm1884_vm1, %v2826_v51  ;;  %v2354_v40 = vpop.f32.mrb[56].mxu1 }
 0x1c4   :  { %v2830_v14 = vpop.eup %2829  ;;  %1888 = vst.msk [vmem:[%s4370_s3 + $0x18] sm:$0xff] %vm1884_vm1, %v2828_v13  ;;  %v2355_v20 = vpop.f32.mrb[57].mxu1 }
 0x1c5   :  { %v2428_v19 = vpop.f32.mrb[56].mxu0  ;;  %1886 = vst.msk [vmem:[%s4370_s3 + $0x8] sm:$0xff] %vm1884_vm1, %v2830_v14  ;;  %v2356_v6 = vadd.f32 %v2355_v20, %v2354_v40  ;;  %v2357_v43 = vpop.f32.mrb[58].mxu1  ;;  %v1503_v20 = vadd.f32 %v4096_v47, %v4113_v26 }
 0x1c6   :  { %v1766_v39 = vadd.f32 %v2428_v19, %v4149_v34  ;;  %v1757_v53 = vpop.f32.mrb[57].mxu0  ;;  %v2358_v38 = vpop.f32.mrb[59].mxu1 }
 0x1c7   :  { %v1758_v35 = vadd.f32 %v1757_v53, %v4141_v61  ;;  %v2429_v30 = vpop.f32.mrb[58].mxu0  ;;  %v2359_v56 = vadd.f32 %v2358_v38, %v2357_v43  ;;  %v4220_v21 = vadd.f32 %v2356_v6, %v1484_v22 }
 0x1c8   :  { %2839 = vtanh.f32 %v1766_v39  ;;  %v1769_v28 = vadd.f32 %v2429_v30, %v4153_v45  ;;  %v1760_v44 = vpop.f32.mrb[59].mxu0 }
 0x1c9   :  { %2841 = vtanh.f32 %v1758_v35  ;;  %v1761_v58 = vadd.f32 %v1760_v44, %v4143_v31  ;;  %v2832_v34 = vpop.eup %2831  ;;  %v4223_v37 = vadd.f32 %v2359_v56, %v1487_v9  ;;  %v1508_v56 = vadd.f32 %v4098_v55, %v4113_v26 }
 0x1ca   :  { %2843 = vtanh.f32 %v1769_v28  ;;  %v2834_v46 = vpop.eup %2833  ;;  %1891 = vst.msk [vmem:[%s4370_s3 + $0x30] sm:$0xff] %vm1884_vm1, %v2832_v34 }
 0x1cb   :  { %2845 = vtanh.f32 %v1761_v58  ;;  %v2836_v61 = vpop.eup %2835  ;;  %1889 = vst.msk [vmem:[%s4370_s3 + $0x20] sm:$0xff] %vm1884_vm1, %v2834_v46  ;;  %v2360_v45 = vpop.f32.mrb[60].mxu1  ;;  %v1511_v46 = vadd.f32 %v4100_v52, %v4113_v26 }
 0x1cc   :  { %v2838_v33 = vpop.eup %2837  ;;  %1892 = vst.msk [vmem:[%s4370_s3 + $0x38] sm:$0xff] %vm1884_vm1, %v2836_v61  ;;  %v2361_v31 = vpop.f32.mrb[61].mxu1 }
 0x1cd   :  { %v2432_v41 = vpop.f32.mrb[60].mxu0  ;;  %1890 = vst.msk [vmem:[%s4370_s3 + $0x28] sm:$0xff] %vm1884_vm1, %v2838_v33  ;;  %v2362_v18 = vadd.f32 %v2361_v31, %v2360_v45  ;;  %v2363_v0 = vpop.f32.mrb[62].mxu1 }
 0x1ce   :  { %v1782_v25 = vadd.f32 %v2432_v41, %v4169_v10  ;;  %v1773_v23 = vpop.f32.mrb[61].mxu0  ;;  %v2364_v36 = vpop.f32.mrb[63].mxu1 }
 0x1cf   :  { %v1774_v16 = vadd.f32 %v1773_v23, %v4159_v1  ;;  %v2433_v15 = vpop.f32.mrb[62].mxu0  ;;  %v2365_v48 = vadd.f32 %v2364_v36, %v2363_v0  ;;  %v1653_v4 = vadd.f32 %v2362_v18, %v1492_v8  ;;  %v1516_v36 = vadd.f32 %v4102_v29, %v4113_v26 }
 0x1d0   :  { %2847 = vtanh.f32 %v1782_v25  ;;  %v1785_v57 = vadd.f32 %v2433_v15, %v4173_v11  ;;  %v1776_v27 = vpop.f32.mrb[63].mxu0 }
 0x1d1   :  { %2849 = vtanh.f32 %v1774_v16  ;;  %v1777_v50 = vadd.f32 %v1776_v27, %v4163_v17  ;;  %v1656_v10 = vadd.f32 %v2365_v48, %v1495_v54 }
 0x1d2   :  { %v2840_v63 = vpop.eup %2839  ;;  %2851 = vtanh.f32 %v1785_v57 }
 0x1d3   :  { %v2842_v42 = vpop.eup %2841  ;;  %1895 = vst.msk [vmem:[%s4370_s3 + $0x50] sm:$0xff] %vm1884_vm1, %v2840_v63  ;;  %2853 = vtanh.f32 %v1777_v50  ;;  %v2366_v2 = vpop.f32.mrb[64].mxu1 }
 0x1d4   :  { %v2844_v1 = vpop.eup %2843  ;;  %1893 = vst.msk [vmem:[%s4370_s3 + $0x40] sm:$0xff] %vm1884_vm1, %v2842_v42  ;;  %v2367_v17 = vpop.f32.mrb[65].mxu1 }
 0x1d5   :  { %v2846_v11 = vpop.eup %2845  ;;  %1896 = vst.msk [vmem:[%s4370_s3 + $0x58] sm:$0xff] %vm1884_vm1, %v2844_v1  ;;  %v2436_v62 = vpop.f32.mrb[64].mxu0  ;;  %v2368_v51 = vadd.f32 %v2367_v17, %v2366_v2 }
 0x1d6   :  { %1894 = vst.msk [vmem:[%s4370_s3 + $0x48] sm:$0xff] %vm1884_vm1, %v2846_v11  ;;  %v1798_v13 = vadd.f32 %v2436_v62, %v4192_v32  ;;  %v2369_v40 = vpop.f32.mrb[66].mxu1  ;;  %v1789_v14 = vpop.f32.mrb[65].mxu0 }
 0x1d7   :  { %v1790_v19 = vadd.f32 %v1789_v14, %v4180_v49  ;;  %v2370_v22 = vpop.f32.mrb[67].mxu1  ;;  %v2437_v6 = vpop.f32.mrb[66].mxu0  ;;  %v1661_v53 = vadd.f32 %v2368_v51, %v1500_v60 }
 0x1d8   :  { %2855 = vtanh.f32 %v1798_v13  ;;  %v2371_v39 = vadd.f32 %v2370_v22, %v2369_v40  ;;  %v1801_v12 = vadd.f32 %v2437_v6, %v4195_v7  ;;  %v1792_v43 = vpop.f32.mrb[67].mxu0 }
 0x1d9   :  { %2857 = vtanh.f32 %v1790_v19  ;;  %v1793_v9 = vadd.f32 %v1792_v43, %v4183_v59 }
 0x1da   :  { %v2848_v35 = vpop.eup %2847  ;;  %2859 = vtanh.f32 %v1801_v12  ;;  %v1664_v32 = vadd.f32 %v2371_v39, %v1503_v20  ;;  %v1524_v20 = vadd.f32 %v4106_v24, %v4113_v26 }
 0x1db   :  { %v2850_v38 = vpop.eup %2849  ;;  %1899 = vst.msk [vmem:[%s4370_s3 + $0x70] sm:$0xff] %vm1884_vm1, %v2848_v35  ;;  %2861 = vtanh.f32 %v1793_v9  ;;  %v2372_v49 = vpop.f32.mrb[68].mxu1 }
 0x1dc   :  { %v2852_v47 = vpop.eup %2851  ;;  %1897 = vst.msk [vmem:[%s4370_s3 + $0x60] sm:$0xff] %vm1884_vm1, %v2850_v38  ;;  %v2373_v59 = vpop.f32.mrb[69].mxu1 }
 0x1dd   :  { %v2854_v7 = vpop.eup %2853  ;;  %1900 = vst.msk [vmem:[%s4370_s3 + $0x78] sm:$0xff] %vm1884_vm1, %v2852_v47  ;;  %v2440_v30 = vpop.f32.mrb[68].mxu0  ;;  %v2374_v28 = vadd.f32 %v2373_v59, %v2372_v49 }
 0x1de   :  { %1898 = vst.msk [vmem:[%s4370_s3 + $0x68] sm:$0xff] %vm1884_vm1, %v2854_v7  ;;  %v1814_v44 = vadd.f32 %v2440_v30, %v1653_v4  ;;  %v2375_v58 = vpop.f32.mrb[70].mxu1  ;;  %v1805_v34 = vpop.f32.mrb[69].mxu0  ;;  %v1519_v4 = vadd.f32 %v4104_v3, %v4113_v26 }
 0x1df   :  { %v1806_v61 = vadd.f32 %v1805_v34, %v4220_v21  ;;  %v2376_v45 = vpop.f32.mrb[71].mxu1  ;;  %v2441_v33 = vpop.f32.mrb[70].mxu0  ;;  %v1669_v8 = vadd.f32 %v2374_v28, %v1508_v56 }
 0x1e0   :  { %2863 = vtanh.f32 %v1814_v44  ;;  %v2377_v31 = vadd.f32 %v2376_v45, %v2375_v58  ;;  %v1817_v41 = vadd.f32 %v2441_v33, %v1656_v10  ;;  %v1808_v55 = vpop.f32.mrb[71].mxu0 }
 0x1e1   :  { %2865 = vtanh.f32 %v1806_v61  ;;  %v1809_v18 = vadd.f32 %v1808_v55, %v4223_v37 }
 0x1e2   :  { %v2856_v25 = vpop.eup %2855  ;;  %2867 = vtanh.f32 %v1817_v41  ;;  %v1672_v0 = vadd.f32 %v2377_v31, %v1511_v46 }
 0x1e3   :  { %v2858_v23 = vpop.eup %2857  ;;  %1903 = vst.msk [vmem:[%s4370_s3 + $0x90] sm:$0xff] %vm1884_vm1, %v2856_v25  ;;  %2869 = vtanh.f32 %v1809_v18  ;;  %v2378_v21 = vpop.f32.mrb[72].mxu1 }
 0x1e4   :  { %v2860_v52 = vpop.eup %2859  ;;  %1901 = vst.msk [vmem:[%s4370_s3 + $0x80] sm:$0xff] %vm1884_vm1, %v2858_v23  ;;  %v2379_v37 = vpop.f32.mrb[73].mxu1 }
 0x1e5   :  { %v2862_v54 = vpop.eup %2861  ;;  %1904 = vst.msk [vmem:[%s4370_s3 + $0x98] sm:$0xff] %vm1884_vm1, %v2860_v52  ;;  %v2444_v16 = vpop.f32.mrb[72].mxu0  ;;  %v2380_v15 = vadd.f32 %v2379_v37, %v2378_v21 }
 0x1e6   :  { %1902 = vst.msk [vmem:[%s4370_s3 + $0x88] sm:$0xff] %vm1884_vm1, %v2862_v54  ;;  %v1830_v48 = vadd.f32 %v2444_v16, %v1669_v8  ;;  %v2381_v57 = vpop.f32.mrb[74].mxu1  ;;  %v1821_v27 = vpop.f32.mrb[73].mxu0 }
 0x1e7   :  { %v1822_v50 = vadd.f32 %v1821_v27, %v1661_v53  ;;  %v2382_v63 = vpop.f32.mrb[75].mxu1  ;;  %v2445_v10 = vpop.f32.mrb[74].mxu0  ;;  %v1677_v29 = vadd.f32 %v2380_v15, %v1516_v36  ;;  %v1527_v53 = vadd.f32 %v4108_v5, %v4113_v26 }
 0x1e8   :  { %2871 = vtanh.f32 %v1830_v48  ;;  %v2383_v42 = vadd.f32 %v2382_v63, %v2381_v57  ;;  %v1833_v1 = vadd.f32 %v2445_v10, %v1672_v0  ;;  %v1824_v2 = vpop.f32.mrb[75].mxu0 }
 0x1e9   :  { %2873 = vtanh.f32 %v1822_v50  ;;  %v1825_v11 = vadd.f32 %v1824_v2, %v1664_v32 }
 0x1ea   :  { %v2864_v17 = vpop.eup %2863  ;;  %2875 = vtanh.f32 %v1833_v1  ;;  %v1680_v62 = vadd.f32 %v2383_v42, %v1519_v4 }
 0x1eb   :  { %v2866_v60 = vpop.eup %2865  ;;  %1907 = vst.msk [vmem:[%s4370_s3 + $0xb0] sm:$0xff] %vm1884_vm1, %v2864_v17  ;;  %2877 = vtanh.f32 %v1825_v11  ;;  %v2384_v51 = vpop.f32.mrb[76].mxu1 }
 0x1ec   :  { %v2868_v3 = vpop.eup %2867  ;;  %1905 = vst.msk [vmem:[%s4370_s3 + $0xa0] sm:$0xff] %vm1884_vm1, %v2866_v60  ;;  %v2385_v40 = vpop.f32.mrb[77].mxu1 }
 0x1ed   :  { %v2870_v13 = vpop.eup %2869  ;;  %1908 = vst.msk [vmem:[%s4370_s3 + $0xb8] sm:$0xff] %vm1884_vm1, %v2868_v3  ;;  %v2448_v14 = vpop.f32.mrb[76].mxu0  ;;  %v2386_v19 = vadd.f32 %v2385_v40, %v2384_v51 }
 0x1ee   :  { %1906 = vst.msk [vmem:[%s4370_s3 + $0xa8] sm:$0xff] %vm1884_vm1, %v2870_v13  ;;  %v2387_v22 = vpop.f32.mrb[78].mxu1  ;;  %v1837_v6 = vpop.f32.mrb[77].mxu0 }
 0x1ef   :  { %v1838_v39 = vadd.f32 %v1837_v6, %v1677_v29  ;;  %v2388_v12 = vpop.f32.mrb[79].mxu1  ;;  %v2449_v43 = vpop.f32.mrb[78].mxu0  ;;  %v1685_v9 = vadd.f32 %v2386_v19, %v1524_v20 }
 0x1f0   :  { %v2389_v35 = vadd.f32 %v2388_v12, %v2387_v22  ;;  %v1840_v32 = vpop.f32.mrb[79].mxu0 }
 0x1f1   :  { %2879 = vtanh.f32 %v1838_v39  ;;  %v1841_v38 = vadd.f32 %v1840_v32, %v1680_v62  ;;  %v1846_v47 = vadd.f32 %v2448_v14, %v1685_v9 }
 0x1f2   :  { %v2872_v24 = vpop.eup %2871  ;;  %v1688_v49 = vadd.f32 %v2389_v35, %v1527_v53 }
 0x1f3   :  { %v2874_v7 = vpop.eup %2873  ;;  %1911 = vst.msk [vmem:[%s4370_s3 + $0xd0] sm:$0xff] %vm1884_vm1, %v2872_v24  ;;  %2881 = vtanh.f32 %v1841_v38 }
 0x1f4   :  { %v2876_v59 = vpop.eup %2875  ;;  %1909 = vst.msk [vmem:[%s4370_s3 + $0xc0] sm:$0xff] %vm1884_vm1, %v2874_v7  ;;  %2883 = vtanh.f32 %v1846_v47  ;;  %v1849_v5 = vadd.f32 %v2449_v43, %v1688_v49 }
 0x1f5   :  { %v2878_v26 = vpop.eup %2877  ;;  %1912 = vst.msk [vmem:[%s4370_s3 + $0xd8] sm:$0xff] %vm1884_vm1, %v2876_v59 }
 0x1f6   :  { %1910 = vst.msk [vmem:[%s4370_s3 + $0xc8] sm:$0xff] %vm1884_vm1, %v2878_v26  ;;  %2885 = vtanh.f32 %v1849_v5 }
 0x1fb   :  { %v2880_v30 = vpop.eup %2879 }
 0x1fc   :  { %1913 = vst.msk [vmem:[%s4370_s3 + $0xe0] sm:$0xff] %vm1884_vm1, %v2880_v30 }
 0x1fd   :  { %v2882_v56 = vpop.eup %2881 }
 0x1fe   :  { %v2884_v28 = vpop.eup %2883  ;;  %1914 = vst.msk [vmem:[%s4370_s3 + $0xe8] sm:$0xff] %vm1884_vm1, %v2882_v56 }
 0x1ff   :  { %1915 = vst.msk [vmem:[%s4370_s3 + $0xf0] sm:$0xff] %vm1884_vm1, %v2884_v28 }
 0x200   :  { %v2886_v44 = vpop.eup %2885 }
 0x201   :  { %1916 = vst.msk [vmem:[%s4370_s3 + $0xf8] sm:$0xff] %vm1884_vm1, %v2886_v44 }

</bundles_post_ra>
